<compile_context>
chip_gen: v7x
topology: tpu7x:2x2x1
jax: 0.10.0
libtpu: 0.0.40
codegen_flags: <defaults>
</compile_context>

<pallas_src>
import functools

import jax
import jax.numpy as jnp
from jax.experimental import pallas as pl
from jax.experimental.pallas import tpu as pltpu

# Original (PyTorch) feature sizes.
D_IN, D_H1, D_H2, D_OUT = 784, 1000, 500, 62
# Lane-padded feature sizes (multiples of 128).
P_H1, P_H2, P_OUT = 1024, 512, 128


def mlp_kernel(x_ref, w1_ref, b1_ref, w2_ref, b2_ref, w3_ref, b3_ref, o_ref):
    # fc1 + ReLU  (bf16 MXU inputs, f32 accumulation)
    h1 = jnp.dot(x_ref[...], w1_ref[...], preferred_element_type=jnp.float32)
    h1 = jnp.maximum(h1 + b1_ref[...], 0.0)
    # fc2 + ReLU
    h2 = jnp.dot(h1.astype(w2_ref.dtype), w2_ref[...],
                 preferred_element_type=jnp.float32)
    h2 = jnp.maximum(h2 + b2_ref[...], 0.0)
    # fc3 (no activation)
    o = jnp.dot(h2.astype(w3_ref.dtype), w3_ref[...],
                preferred_element_type=jnp.float32)
    o_ref[...] = (o + b3_ref[...]).astype(o_ref.dtype)


def _pad2(a, rows, cols):
    r, c = a.shape
    return jnp.pad(a, ((0, rows - r), (0, cols - c)))


def prepare_params(params):
    """Pad feature dims to multiples of 128 and cast weights to bf16.

    Zero padding is exact: padded hidden units get bias 0 -> relu(0) = 0, and
    padded weight rows/columns contribute nothing downstream.
    """
    w1, b1, w2, b2, w3, b3 = params
    w1p = _pad2(w1, D_IN, P_H1).astype(jnp.bfloat16)
    w2p = _pad2(w2, P_H1, P_H2).astype(jnp.bfloat16)
    w3p = _pad2(w3, P_H2, P_OUT).astype(jnp.bfloat16)
    b1p = _pad2(b1.reshape(1, -1), 1, P_H1).astype(jnp.float32)
    b2p = _pad2(b2.reshape(1, -1), 1, P_H2).astype(jnp.float32)
    b3p = _pad2(b3.reshape(1, -1), 1, P_OUT).astype(jnp.float32)
    return (w1p, b1p, w2p, b2p, w3p, b3p)


def _round_up(n, m):
    return -(-n // m) * m


@functools.partial(jax.jit, static_argnames=("tm_max",))
def mlp_forward_prepared(x_nchw, prepared, tm_max=256):
    """x_nchw: (B, 1, 28, 28) -> logits (B, 62) float32."""
    w1, b1, w2, b2, w3, b3 = prepared
    B = x_nchw.shape[0]
    # nn.Flatten() + cast activations to bf16 (MXU-native on v5e/v6e/v7x).
    x = x_nchw.reshape(B, -1).astype(jnp.bfloat16)          # (B, 784)

    # Batch tiling: round B up to the f32/bf16 sublane multiple, pick TM, and
    # zero-pad the batch so the grid divides evenly.
    b_sub = max(8, _round_up(B, 8))
    tm = min(tm_max, b_sub)
    b_pad = _round_up(b_sub, tm)
    if b_pad != B:
        x = jnp.pad(x, ((0, b_pad - B), (0, 0)))

    grid = (b_pad // tm,)
    resident = lambda shape: pl.BlockSpec(shape, lambda i: (0, 0))

    out = pl.pallas_call(
        mlp_kernel,
        out_shape=jax.ShapeDtypeStruct((b_pad, P_OUT), jnp.float32),
        grid_spec=pl.GridSpec(
            grid=grid,
            in_specs=[
                pl.BlockSpec((tm, D_IN), lambda i: (i, 0)),   # x batch tile
                resident((D_IN, P_H1)), resident((1, P_H1)),  # fc1 (VMEM-resident)
                resident((P_H1, P_H2)), resident((1, P_H2)),  # fc2
                resident((P_H2, P_OUT)), resident((1, P_OUT)),  # fc3
            ],
            out_specs=pl.BlockSpec((tm, P_OUT), lambda i: (i, 0)),
        ),
        compiler_params=pltpu.CompilerParams(
            dimension_semantics=("parallel",),   # megacore sharding on v7x
        ),
    )(x, w1, b1, w2, b2, w3, b3)

    return out[:B, :D_OUT]


def mlp_forward(x_nchw, params):
    return mlp_forward_prepared(x_nchw, prepare_params(params))


def init_params(key):
    """Deterministic parameter init with the shapes implied by the module."""
    ks = jax.random.split(key, 6)

    def linear(kw, kb, fan_in, fan_out):
        # PyTorch Linear default: U(-1/sqrt(fan_in), 1/sqrt(fan_in))
        bound = 1.0 / jnp.sqrt(fan_in)
        # Stored as (in, out) so the kernel computes x @ W (== PyTorch x @ W.T).
        w = jax.random.uniform(kw, (fan_in, fan_out), jnp.float32, -bound, bound)
        b = jax.random.uniform(kb, (1, fan_out), jnp.float32, -bound, bound)
        return w, b

    w1, b1 = linear(ks[0], ks[1], D_IN, D_H1)
    w2, b2 = linear(ks[2], ks[3], D_H1, D_H2)
    w3, b3 = linear(ks[4], ks[5], D_H2, D_OUT)
    return (w1, b1, w2, b2, w3, b3)


if __name__ == "__main__":
    key = jax.random.PRNGKey(0)
    kx, kp = jax.random.split(key)

    B = 2
    x = jax.random.normal(kx, (B, 1, 28, 28), jnp.float32)  # FEMNIST-shaped input
    params = init_params(kp)

    prepared = prepare_params(params)
    out = mlp_forward_prepared(x, prepared)
    out = jax.block_until_ready(out)
    assert out.shape == (B, D_OUT)

    # Reference in plain JAX using the same bf16-quantized weights/activations
    # (f32 math on the decoded values), so tolerances stay tight.
    w1, b1, w2, b2, w3, b3 = prepared
    hp = jax.lax.Precision.HIGHEST
    xf = x.reshape(B, -1).astype(jnp.bfloat16).astype(jnp.float32)
    h1 = jnp.maximum(
        jnp.dot(xf, w1.astype(jnp.float32), precision=hp) + b1, 0.0)
    h2 = jnp.maximum(
        jnp.dot(h1.astype(jnp.bfloat16).astype(jnp.float32),
                w2.astype(jnp.float32), precision=hp) + b2, 0.0)
    ref = jnp.dot(h2.astype(jnp.bfloat16).astype(jnp.float32),
                  w3.astype(jnp.float32), precision=hp) + b3
    ref = ref[:, :D_OUT]

    assert jnp.allclose(out, ref, atol=2e-3, rtol=2e-3), float(
        jnp.max(jnp.abs(out - ref)))

    print("KERNEL_OK")
</pallas_src>

<mosaic_0001>
module attributes {stable_mosaic.version = 11 : i64} {
  func.func @mlp_kernel(%arg0: i32, %arg1: memref<8x784xbf16, #tpu.memory_space<vmem>>, %arg2: memref<784x1024xbf16, #tpu.memory_space<vmem>>, %arg3: memref<1x1024xf32, #tpu.memory_space<vmem>>, %arg4: memref<1024x512xbf16, #tpu.memory_space<vmem>>, %arg5: memref<1x512xf32, #tpu.memory_space<vmem>>, %arg6: memref<512x128xbf16, #tpu.memory_space<vmem>>, %arg7: memref<1x128xf32, #tpu.memory_space<vmem>>, %arg8: memref<8x128xf32, #tpu.memory_space<vmem>>) attributes {dimension_semantics = [#tpu.dimension_semantics<parallel>], iteration_bounds = array<i64: 1>, scalar_prefetch = 0 : i64, scratch_operands = 0 : i64, tpu.core_type = #tpu.core_type<tc>, window_params = [{transform_indices = @transform_0, window_bounds = array<i64: 8, 784>}, {pipeline_mode = #tpu.pipeline_mode<synchronous>, transform_indices = @transform_1, window_bounds = array<i64: 784, 1024>}, {pipeline_mode = #tpu.pipeline_mode<synchronous>, transform_indices = @transform_2, window_bounds = array<i64: 1, 1024>}, {pipeline_mode = #tpu.pipeline_mode<synchronous>, transform_indices = @transform_3, window_bounds = array<i64: 1024, 512>}, {pipeline_mode = #tpu.pipeline_mode<synchronous>, transform_indices = @transform_4, window_bounds = array<i64: 1, 512>}, {pipeline_mode = #tpu.pipeline_mode<synchronous>, transform_indices = @transform_5, window_bounds = array<i64: 512, 128>}, {pipeline_mode = #tpu.pipeline_mode<synchronous>, transform_indices = @transform_6, window_bounds = array<i64: 1, 128>}, {transform_indices = @transform_7, window_bounds = array<i64: 8, 128>}]} {
    %c0 = arith.constant 0 : index
    %c0_0 = arith.constant 0 : index
    %0 = vector.load %arg1[%c0, %c0_0] : memref<8x784xbf16, #tpu.memory_space<vmem>>, vector<8x784xbf16>
    %c0_1 = arith.constant 0 : index
    %c0_2 = arith.constant 0 : index
    %1 = vector.load %arg2[%c0_1, %c0_2] : memref<784x1024xbf16, #tpu.memory_space<vmem>>, vector<784x1024xbf16>
    %cst = arith.constant dense<0.000000e+00> : vector<8x1024xf32>
    %2 = tpu.matmul %0, %1, %cst {dimension_numbers = #tpu.dot_dimension_numbers<[1], [0], [0], [1], [0, 0, 1, 1], [], []>} : vector<8x784xbf16>, vector<784x1024xbf16>, vector<8x1024xf32> -> vector<8x1024xf32>
    %c0_3 = arith.constant 0 : index
    %c0_4 = arith.constant 0 : index
    %3 = vector.load %arg3[%c0_3, %c0_4] : memref<1x1024xf32, #tpu.memory_space<vmem>>, vector<1x1024xf32>
    %4 = vector.broadcast %3 : vector<1x1024xf32> to vector<8x1024xf32>
    %5 = arith.addf %2, %4 : vector<8x1024xf32>
    %cst_5 = arith.constant 0.000000e+00 : f32
    %6 = vector.broadcast %cst_5 : f32 to vector<8x1024xf32>
    %7 = arith.maximumf %5, %6 : vector<8x1024xf32>
    %8 = arith.truncf %7 : vector<8x1024xf32> to vector<8x1024xbf16>
    %c0_6 = arith.constant 0 : index
    %c0_7 = arith.constant 0 : index
    %9 = vector.load %arg4[%c0_6, %c0_7] : memref<1024x512xbf16, #tpu.memory_space<vmem>>, vector<1024x512xbf16>
    %cst_8 = arith.constant dense<0.000000e+00> : vector<8x512xf32>
    %10 = tpu.matmul %8, %9, %cst_8 {dimension_numbers = #tpu.dot_dimension_numbers<[1], [0], [0], [1], [0, 0, 1, 1], [], []>} : vector<8x1024xbf16>, vector<1024x512xbf16>, vector<8x512xf32> -> vector<8x512xf32>
    %c0_9 = arith.constant 0 : index
    %c0_10 = arith.constant 0 : index
    %11 = vector.load %arg5[%c0_9, %c0_10] : memref<1x512xf32, #tpu.memory_space<vmem>>, vector<1x512xf32>
    %12 = vector.broadcast %11 : vector<1x512xf32> to vector<8x512xf32>
    %13 = arith.addf %10, %12 : vector<8x512xf32>
    %cst_11 = arith.constant 0.000000e+00 : f32
    %14 = vector.broadcast %cst_11 : f32 to vector<8x512xf32>
    %15 = arith.maximumf %13, %14 : vector<8x512xf32>
    %16 = arith.truncf %15 : vector<8x512xf32> to vector<8x512xbf16>
    %c0_12 = arith.constant 0 : index
    %c0_13 = arith.constant 0 : index
    %17 = vector.load %arg6[%c0_12, %c0_13] : memref<512x128xbf16, #tpu.memory_space<vmem>>, vector<512x128xbf16>
    %cst_14 = arith.constant dense<0.000000e+00> : vector<8x128xf32>
    %18 = tpu.matmul %16, %17, %cst_14 {dimension_numbers = #tpu.dot_dimension_numbers<[1], [0], [0], [1], [0, 0, 1, 1], [], []>} : vector<8x512xbf16>, vector<512x128xbf16>, vector<8x128xf32> -> vector<8x128xf32>
    %c0_15 = arith.constant 0 : index
    %c0_16 = arith.constant 0 : index
    %19 = vector.load %arg7[%c0_15, %c0_16] : memref<1x128xf32, #tpu.memory_space<vmem>>, vector<1x128xf32>
    %20 = vector.broadcast %19 : vector<1x128xf32> to vector<8x128xf32>
    %21 = arith.addf %18, %20 : vector<8x128xf32>
    %c0_17 = arith.constant 0 : index
    %c0_18 = arith.constant 0 : index
    %22 = vector.load %arg8[%c0_17, %c0_18] : memref<8x128xf32, #tpu.memory_space<vmem>>, vector<8x128xf32>
    tpu.vector_store %arg8[%c0_17, %c0_18], %21 {strides = array<i32>} : memref<8x128xf32, #tpu.memory_space<vmem>>, vector<8x128xf32>,
    return
  }
  func.func @transform_0(%arg0: i32) -> (i32, i32) {
    %c0_i32 = arith.constant 0 : i32
    %c0_i32_0 = arith.constant 0 : i32
    return %arg0, %c0_i32 : i32, i32
  }
  func.func @transform_1(%arg0: i32) -> (i32, i32) {
    %c0_i32 = arith.constant 0 : i32
    %c0_i32_0 = arith.constant 0 : i32
    %c0_i32_1 = arith.constant 0 : i32
    return %c0_i32, %c0_i32_0 : i32, i32
  }
  func.func @transform_2(%arg0: i32) -> (i32, i32) {
    %c0_i32 = arith.constant 0 : i32
    %c0_i32_0 = arith.constant 0 : i32
    %c0_i32_1 = arith.constant 0 : i32
    return %c0_i32, %c0_i32_0 : i32, i32
  }
  func.func @transform_3(%arg0: i32) -> (i32, i32) {
    %c0_i32 = arith.constant 0 : i32
    %c0_i32_0 = arith.constant 0 : i32
    %c0_i32_1 = arith.constant 0 : i32
    return %c0_i32, %c0_i32_0 : i32, i32
  }
  func.func @transform_4(%arg0: i32) -> (i32, i32) {
    %c0_i32 = arith.constant 0 : i32
    %c0_i32_0 = arith.constant 0 : i32
    %c0_i32_1 = arith.constant 0 : i32
    return %c0_i32, %c0_i32_0 : i32, i32
  }
  func.func @transform_5(%arg0: i32) -> (i32, i32) {
    %c0_i32 = arith.constant 0 : i32
    %c0_i32_0 = arith.constant 0 : i32
    %c0_i32_1 = arith.constant 0 : i32
    return %c0_i32, %c0_i32_0 : i32, i32
  }
  func.func @transform_6(%arg0: i32) -> (i32, i32) {
    %c0_i32 = arith.constant 0 : i32
    %c0_i32_0 = arith.constant 0 : i32
    %c0_i32_1 = arith.constant 0 : i32
    return %c0_i32, %c0_i32_0 : i32, i32
  }
  func.func @transform_7(%arg0: i32) -> (i32, i32) {
    %c0_i32 = arith.constant 0 : i32
    %c0_i32_0 = arith.constant 0 : i32
    return %arg0, %c0_i32 : i32, i32
  }
}

</mosaic_0001>

<bundles_post_ra>
// kernel: mlp_forward_prepared.1
= control target key start
LH: loop header
LB: loop body
LE: loop exit
PB: predicated region body
PF: predicated region fallthrough
CT: control target
= control target key end

     0   :  { %12 = vsyncpa [#allocation3], 0  ;;  %s7097_s0 = inlined_call_operand.vmem [shape: bf16[8,784], index: 0, kind: input, shape index: {}]   ;;  %s7098_s1 = inlined_call_operand.hbm [shape: bf16[784,1024], index: 1, kind: input, shape index: {}]   ;;  %s7099_s2 = inlined_call_operand.hbm [shape: f32[1,1024], index: 2, kind: input, shape index: {}]   ;;  %s7100_s3 = inlined_call_operand.hbm [shape: bf16[1024,512], index: 3, kind: input, shape index: {}]   ;;  %s7101_s4 = inlined_call_operand.hbm [shape: f32[1,512], index: 4, kind: input, shape index: {}]   ;;  %s7102_s5 = inlined_call_operand.hbm [shape: bf16[512,128], index: 5, kind: input, shape index: {}]   ;;  %s7103_s6 = inlined_call_operand.hbm [shape: f32[1,128], index: 6, kind: input, shape index: {}]   ;;  %s7104_s7 = inlined_call_operand.vmem [shape: f32[8,128], index: 7, kind: output, shape index: {}]  }
   0x1   :  { %13 = vsyncpa [#allocation5], 0 }
   0x2   :  { %14 = vsyncpa [#allocation8], 0 }
   0x3   :  { %15 = vsyncpa [#allocation11], 0  ;;  %s6845_s24 = smov [#allocation4]   ;;  %s6846_s26 = smov [#allocation7]  }
   0x4   :  { %s36_s25 = sshll.u32 %s6845_s24, 4  ;;  %s58_s27 = sshll.u32 %s6846_s26, 4  ;;  %s37_s25 = int_to_ptr.vmem [resolvable:$true] %s36_s25  ;;  %s59_s27 = int_to_ptr.vmem [resolvable:$true] %s58_s27 }
   0x5   :  { %s6705_s30 = scalar_lea.hbm %s7099_s2, 128 }
   0x6   :  { %p6706_p0 = scmp.ne.s32.totalorder %s7099_s2, %s6705_s30  ;;  %p6709_p1 = scmp.lt.u32.totalorder %s6705_s30, %s7099_s2 }
   0x8   :  { %p6711_p2 = pnand %p6709_p1, %p6706_p0 }
   0xa   :  { %6714 = shalt.err (!%p6711_p2)
}
   0xb   :  { %s6715_s12 = scalar_lea.vmem %s37_s25, 128  ;;  %p6720_p4 = scmp.lt.s32.totalorder %s37_s25, %s37_s25 }
   0xc   :  { %p6716_p3 = scmp.ne.s32.totalorder %s37_s25, %s6715_s12  ;;  %p6721_p5 = scmp.lt.s32.totalorder %s6715_s12, %s6715_s12 }
   0xe   :  { %p6722_p6 = por %p6721_p5, %p6720_p4 }
  0x10   :  { %p6723_p7 = pnand %p6722_p6, %p6716_p3 }
  0x12   :  { %6726 = shalt.err (!%p6723_p7)
}
  0x13   :  { %39 = dma.hbm_to_vmem [thread:$0]  %s7099_s2, 128, %s37_s25, [#allocation5]  }
  0x14   :  { %s6727_s17 = scalar_lea.hbm %s7101_s4, 64 }
  0x15   :  { %p6728_p8 = scmp.ne.s32.totalorder %s7101_s4, %s6727_s17  ;;  %p6731_p9 = scmp.lt.u32.totalorder %s6727_s17, %s7101_s4 }
  0x17   :  { %p6733_p10 = pnand %p6731_p9, %p6728_p8 }
  0x19   :  { %6736 = shalt.err (!%p6733_p10)
}
  0x1a   :  { %s6737_s22 = scalar_lea.vmem %s59_s27, 64  ;;  %p6742_p12 = scmp.lt.s32.totalorder %s59_s27, %s59_s27 }
  0x1b   :  { %p6738_p11 = scmp.ne.s32.totalorder %s59_s27, %s6737_s22  ;;  %p6743_p13 = scmp.lt.s32.totalorder %s6737_s22, %s6737_s22 }
  0x1d   :  { %p6744_p0 = por %p6743_p13, %p6742_p12 }
  0x1f   :  { %p6745_p1 = pnand %p6744_p0, %p6738_p11 }
  0x21   :  { %6748 = shalt.err (!%p6745_p1)
}
  0x22   :  { %61 = dma.hbm_to_vmem [thread:$0]  %s7101_s4, 64, %s59_s27, [#allocation8]  }
  0x23   :  { %s6847_s24 = smov [#allocation2]   ;;  %s6749_s29 = scalar_lea.hbm %s7098_s1, 50176 }
  0x24   :  { %s23_s25 = sshll.u32 %s6847_s24, 4  ;;  %p6750_p2 = scmp.ne.s32.totalorder %s7098_s1, %s6749_s29  ;;  %s24_s25 = int_to_ptr.vmem [resolvable:$true] %s23_s25 }
  0x25   :  { %p6753_p3 = scmp.lt.u32.totalorder %s6749_s29, %s7098_s1 }
  0x27   :  { %p6755_p4 = pnand %p6753_p3, %p6750_p2 }
  0x29   :  { %6758 = shalt.err (!%p6755_p4)
}
  0x2a   :  { %s6759_s11 = scalar_lea.vmem %s24_s25, 50176  ;;  %p6764_p6 = scmp.lt.s32.totalorder %s24_s25, %s24_s25 }
  0x2b   :  { %p6760_p5 = scmp.ne.s32.totalorder %s24_s25, %s6759_s11  ;;  %p6765_p7 = scmp.lt.s32.totalorder %s6759_s11, %s6759_s11 }
  0x2d   :  { %p6766_p8 = por %p6765_p7, %p6764_p6 }
  0x2f   :  { %p6767_p9 = pnand %p6766_p8, %p6760_p5 }
  0x31   :  { %6770 = shalt.err (!%p6767_p9)
}
  0x32   :  { %s6848_s4 = smov 512   ;;  %s6849_s27 = smov 32  }
  0x33   :  { %29 = dma.hbm_to_vmem [thread:$0]  %s7098_s1, 50176, %s24_s25, [#allocation3], %s6848_s4, %s6848_s4, %s6849_s27  }
  0x34   :  { %s6850_s14 = smov [#allocation6]   ;;  %s6771_s18 = scalar_lea.hbm %s7100_s3, 32768 }
  0x35   :  { %s45_s15 = sshll.u32 %s6850_s14, 4  ;;  %p6772_p10 = scmp.ne.s32.totalorder %s7100_s3, %s6771_s18  ;;  %s46_s15 = int_to_ptr.vmem [resolvable:$true] %s45_s15 }
  0x36   :  { %p6775_p11 = scmp.lt.u32.totalorder %s6771_s18, %s7100_s3 }
  0x38   :  { %p6777_p12 = pnand %p6775_p11, %p6772_p10 }
  0x3a   :  { %6780 = shalt.err (!%p6777_p12)
}
  0x3b   :  { %s6781_s2 = scalar_lea.vmem %s46_s15, 32768  ;;  %p6786_p0 = scmp.lt.s32.totalorder %s46_s15, %s46_s15 }
  0x3c   :  { %p6782_p13 = scmp.ne.s32.totalorder %s46_s15, %s6781_s2  ;;  %p6787_p1 = scmp.lt.s32.totalorder %s6781_s2, %s6781_s2 }
  0x3e   :  { %p6788_p2 = por %p6787_p1, %p6786_p0 }
  0x40   :  { %p6789_p3 = pnand %p6788_p2, %p6782_p13 }
  0x42   :  { %6792 = shalt.err (!%p6789_p3)
}
  0x43   :  { %s6851_s1 = smov 256   ;;  %s6852_s23 = smov 16  }
  0x44   :  { %51 = dma.hbm_to_vmem [thread:$0]  %s7100_s3, 32768, %s46_s15, [#allocation5], %s6851_s1, %s6851_s1, %s6852_s23  }
  0x45   :  { %s6853_s26 = smov [#allocation9]   ;;  %s6793_s8 = scalar_lea.hbm %s7102_s5, 4096 }
  0x46   :  { %s67_s28 = sshll.u32 %s6853_s26, 4  ;;  %p6794_p4 = scmp.ne.s32.totalorder %s7102_s5, %s6793_s8  ;;  %s68_s28 = int_to_ptr.vmem [resolvable:$true] %s67_s28 }
  0x47   :  { %p6797_p5 = scmp.lt.u32.totalorder %s6793_s8, %s7102_s5 }
  0x49   :  { %p6799_p6 = pnand %p6797_p5, %p6794_p4 }
  0x4b   :  { %6802 = shalt.err (!%p6799_p6)
}
  0x4c   :  { %s6803_s27 = scalar_lea.vmem %s68_s28, 4096  ;;  %p6808_p8 = scmp.lt.s32.totalorder %s68_s28, %s68_s28 }
  0x4d   :  { %p6804_p7 = scmp.ne.s32.totalorder %s68_s28, %s6803_s27  ;;  %p6809_p9 = scmp.lt.s32.totalorder %s6803_s27, %s6803_s27 }
  0x4f   :  { %p6810_p10 = por %p6809_p9, %p6808_p8 }
  0x51   :  { %p6811_p11 = pnand %p6810_p10, %p6804_p7 }
  0x53   :  { %6814 = shalt.err (!%p6811_p11)
}
  0x54   :  { %s6854_s3 = smov 64   ;;  %s6855_s12 = smov 4  }
  0x55   :  { %73 = dma.hbm_to_vmem [thread:$0]  %s7102_s5, 4096, %s68_s28, [#allocation8], %s6854_s3, %s6854_s3, %s6855_s12  }
  0x56   :  { %s6856_s15 = smov [#allocation10]   ;;  %s6815_s19 = scalar_lea.hbm %s7103_s6, 16 }
  0x57   :  { %s80_s16 = sshll.u32 %s6856_s15, 4  ;;  %p6816_p12 = scmp.ne.s32.totalorder %s7103_s6, %s6815_s19  ;;  %s81_s16 = int_to_ptr.vmem [resolvable:$true] %s80_s16 }
  0x58   :  { %p6819_p13 = scmp.lt.u32.totalorder %s6815_s19, %s7103_s6 }
  0x5a   :  { %p6821_p0 = pnand %p6819_p13, %p6816_p12 }
  0x5c   :  { %6824 = shalt.err (!%p6821_p0)
}
  0x5d   :  { %s6825_s1 = scalar_lea.vmem %s81_s16, 16  ;;  %s6829_s5 = scalar_lea.vmem %s81_s16, 32 }
  0x5e   :  { %p6826_p1 = scmp.ne.s32.totalorder %s81_s16, %s6825_s1  ;;  %p6830_p2 = scmp.lt.s32.totalorder %s81_s16, %s81_s16 }
  0x5f   :  { %p6831_p3 = scmp.lt.s32.totalorder %s6829_s5, %s6825_s1 }
  0x61   :  { %p6832_p4 = por %p6831_p3, %p6830_p2 }
  0x63   :  { %p6833_p5 = pnand %p6832_p4, %p6826_p1 }
  0x65   :  { %6836 = shalt.err (!%p6833_p5)
}
  0x66   :  { %83 = dma.hbm_to_vmem [thread:$0]  %s7103_s6, 16, %s81_s16, [#allocation11]  }
  0x67   :  { %6837 = dma.done.wait [#allocation3], 50176  }
  0x68   :  { %6838 = vsyncadd [#allocation3], 4294917120 }
  0x69   :  { %6839 = dma.done.wait [#allocation5], 32896  }
  0x6a   :  { %6840 = vsyncadd [#allocation5], 4294934400 }
  0x6b   :  { %6841 = dma.done.wait [#allocation8], 4160  }
  0x6c   :  { %6842 = vsyncadd [#allocation8], 4294963136 }
  0x6d   :  { %6843 = dma.done.wait [#allocation11], 16  }
  0x6e   :  { %6844 = vsyncadd [#allocation11], 4294967280  ;;  %v107_v0 = vld [vmem:[#allocation2] sm:$0xff]  ;;  %v108_v2 = vld [vmem:[#allocation2 + $0x8] sm:$0xff]  ;;  %vm2525_vm0 = vcmask 130048  }
  0x6f   :  { %v111_v1 = vld [vmem:[#allocation2 + $0x20] sm:$0xff]  ;;  %v112_v4 = vld [vmem:[#allocation2 + $0x28] sm:$0xff] }
  0x70   :  { %v5455_v3 = vcombine.high %v107_v0, %v111_v1  ;;  %v5454_v5 = vcombine.low %v107_v0, %v111_v1  ;;  %v115_v6 = vld [vmem:[#allocation2 + $0x40] sm:$0xff]  ;;  %v5457_v8 = vcombine.high %v108_v2, %v112_v4  ;;  %v5456_v9 = vcombine.low %v108_v2, %v112_v4  ;;  %v116_v11 = vld [vmem:[#allocation2 + $0x48] sm:$0xff] }
  0x71   :  { %v119_v7 = vld [vmem:[#allocation2 + $0x60] sm:$0xff]  ;;  %v120_v12 = vld [vmem:[#allocation2 + $0x68] sm:$0xff] }
  0x72   :  { %v5463_v10 = vcombine.high %v115_v6, %v119_v7  ;;  %v123_v13 = vld [vmem:[#allocation2 + $0x80] sm:$0xff]  ;;  %2529 = vmatprep.subr.bf16.mxu0 %v5455_v3  ;;  %v5465_v14 = vcombine.high %v116_v11, %v120_v12  ;;  %v124_v16 = vld [vmem:[#allocation2 + $0x88] sm:$0xff]  ;;  %2693 = vmatprep.subr.bf16.mxu1 %v5457_v8  ;;  %v5462_v18 = vcombine.low %v115_v6, %v119_v7 }
  0x73   :  { %v127_v15 = vld [vmem:[#allocation2 + $0xa0] sm:$0xff]  ;;  %v128_v17 = vld [vmem:[#allocation2 + $0xa8] sm:$0xff]  ;;  %2530 = vmatpush1.bf16.msra.mxu0 %v5454_v5  ;;  %2694 = vmatpush1.bf16.msra.mxu1 %v5456_v9  ;;  %v5464_v19 = vcombine.low %v116_v11, %v120_v12 }
  0x74   :  { %2531 = vmatprep.subr.bf16.mxu0 %v5463_v10  ;;  %v5471_v20 = vcombine.high %v123_v13, %v127_v15  ;;  %2695 = vmatprep.subr.bf16.mxu1 %v5465_v14  ;;  %v5473_v21 = vcombine.high %v124_v16, %v128_v17  ;;  %v131_v22 = vld [vmem:[#allocation2 + $0xc0] sm:$0xff]  ;;  %v132_v24 = vld [vmem:[#allocation2 + $0xc8] sm:$0xff]  ;;  %v5470_v26 = vcombine.low %v123_v13, %v127_v15 }
  0x75   :  { %v135_v23 = vld [vmem:[#allocation2 + $0xe0] sm:$0xff]  ;;  %v136_v25 = vld [vmem:[#allocation2 + $0xe8] sm:$0xff]  ;;  %v5472_v27 = vcombine.low %v124_v16, %v128_v17 }
  0x76   :  { %v5479_v28 = vcombine.high %v131_v22, %v135_v23  ;;  %v5481_v29 = vcombine.high %v132_v24, %v136_v25  ;;  %v139_v30 = vld [vmem:[#allocation2 + $0x100] sm:$0xff]  ;;  %v140_v32 = vld [vmem:[#allocation2 + $0x108] sm:$0xff]  ;;  %v5478_v34 = vcombine.low %v131_v22, %v135_v23  ;;  %v5480_v35 = vcombine.low %v132_v24, %v136_v25 }
  0x77   :  { %2532 = vmatpush1.bf16.msra.mxu0 %v5462_v18  ;;  %2696 = vmatpush1.bf16.msra.mxu1 %v5464_v19  ;;  %v143_v31 = vld [vmem:[#allocation2 + $0x120] sm:$0xff]  ;;  %v144_v33 = vld [vmem:[#allocation2 + $0x128] sm:$0xff] }
  0x78   :  { %2533 = vmatprep.subr.bf16.mxu0 %v5471_v20  ;;  %2697 = vmatprep.subr.bf16.mxu1 %v5473_v21  ;;  %v5487_v36 = vcombine.high %v139_v30, %v143_v31  ;;  %v5489_v37 = vcombine.high %v140_v32, %v144_v33  ;;  %v147_v38 = vld [vmem:[#allocation2 + $0x140] sm:$0xff]  ;;  %v148_v40 = vld [vmem:[#allocation2 + $0x148] sm:$0xff]  ;;  %v5486_v42 = vcombine.low %v139_v30, %v143_v31 }
  0x79   :  { %v151_v39 = vld [vmem:[#allocation2 + $0x160] sm:$0xff]  ;;  %v152_v41 = vld [vmem:[#allocation2 + $0x168] sm:$0xff]  ;;  %v5488_v43 = vcombine.low %v140_v32, %v144_v33 }
  0x7a   :  { %v5495_v44 = vcombine.high %v147_v38, %v151_v39  ;;  %v5497_v45 = vcombine.high %v148_v40, %v152_v41  ;;  %v155_v46 = vld [vmem:[#allocation2 + $0x180] sm:$0xff]  ;;  %v156_v48 = vld [vmem:[#allocation2 + $0x188] sm:$0xff]  ;;  %v5494_v50 = vcombine.low %v147_v38, %v151_v39  ;;  %v5496_v51 = vcombine.low %v148_v40, %v152_v41 }
  0x7b   :  { %2534 = vmatpush1.bf16.msra.mxu0 %v5470_v26  ;;  %2698 = vmatpush1.bf16.msra.mxu1 %v5472_v27  ;;  %v159_v47 = vld [vmem:[#allocation2 + $0x1a0] sm:$0xff]  ;;  %v160_v49 = vld [vmem:[#allocation2 + $0x1a8] sm:$0xff] }
  0x7c   :  { %2535 = vmatprep.subr.bf16.mxu0 %v5479_v28  ;;  %2699 = vmatprep.subr.bf16.mxu1 %v5481_v29  ;;  %v5503_v52 = vcombine.high %v155_v46, %v159_v47  ;;  %v6973_v53 = vld [vmem:[%s7097_s0] sm:$0xff]  ;;  %v5505_v54 = vcombine.high %v156_v48, %v160_v49  ;;  %v164_v58 = vld [vmem:[#allocation2 + $0x1c8] sm:$0xff]  ;;  %v5502_v60 = vcombine.low %v155_v46, %v159_v47 }
  0x7d   :  { %v163_v55 = vld [vmem:[#allocation2 + $0x1c0] sm:$0xff]  ;;  %v6977_v57 = vcombine.high %v6973_v53, %v6973_v53  ;;  %v168_v59 = vld [vmem:[#allocation2 + $0x1e8] sm:$0xff]  ;;  %v5504_v61 = vcombine.low %v156_v48, %v160_v49 }
  0x7e   :  { %v167_v56 = vld [vmem:[#allocation2 + $0x1e0] sm:$0xff]  ;;  %v5513_v63 = vcombine.high %v164_v58, %v168_v59  ;;  %v172_v2 = vld [vmem:[#allocation2 + $0x208] sm:$0xff]  ;;  %v5512_v5 = vcombine.low %v164_v58, %v168_v59 }
  0x7f   :  { %2536 = vmatpush1.bf16.msra.mxu0 %v5478_v34  ;;  %2700 = vmatpush1.bf16.msra.mxu1 %v5480_v35  ;;  %v5511_v62 = vcombine.high %v163_v55, %v167_v56  ;;  %v171_v0 = vld [vmem:[#allocation2 + $0x200] sm:$0xff]  ;;  %v176_v3 = vld [vmem:[#allocation2 + $0x228] sm:$0xff]  ;;  %v5510_v4 = vcombine.low %v163_v55, %v167_v56 }
  0x80   :  { %2537 = vmatprep.subr.bf16.mxu0 %v5487_v36  ;;  %2701 = vmatprep.subr.bf16.mxu1 %v5489_v37  ;;  %v175_v1 = vld [vmem:[#allocation2 + $0x220] sm:$0xff]  ;;  %v5521_v7 = vcombine.high %v172_v2, %v176_v3  ;;  %v180_v10 = vld [vmem:[#allocation2 + $0x248] sm:$0xff]  ;;  %v5520_v13 = vcombine.low %v172_v2, %v176_v3 }
  0x81   :  { %2561 = vmatprep.mubr.bf16.mxu0 %v6977_v57  ;;  %2725 = vmatprep.mubr.bf16.mxu1 %v6977_v57  ;;  %v5519_v6 = vcombine.high %v171_v0, %v175_v1  ;;  %v179_v8 = vld [vmem:[#allocation2 + $0x240] sm:$0xff]  ;;  %v184_v11 = vld [vmem:[#allocation2 + $0x268] sm:$0xff]  ;;  %v5518_v12 = vcombine.low %v171_v0, %v175_v1 }
  0x82   :  { %v183_v9 = vld [vmem:[#allocation2 + $0x260] sm:$0xff]  ;;  %v5529_v15 = vcombine.high %v180_v10, %v184_v11  ;;  %v188_v18 = vld [vmem:[#allocation2 + $0x288] sm:$0xff]  ;;  %v5528_v21 = vcombine.low %v180_v10, %v184_v11 }
  0x83   :  { %2538 = vmatpush1.bf16.msra.mxu0 %v5486_v42  ;;  %2702 = vmatpush1.bf16.msra.mxu1 %v5488_v43  ;;  %v5527_v14 = vcombine.high %v179_v8, %v183_v9  ;;  %v187_v16 = vld [vmem:[#allocation2 + $0x280] sm:$0xff]  ;;  %v192_v19 = vld [vmem:[#allocation2 + $0x2a8] sm:$0xff]  ;;  %v5526_v20 = vcombine.low %v179_v8, %v183_v9 }
  0x84   :  { %2539 = vmatprep.subr.bf16.mxu0 %v5495_v44  ;;  %2703 = vmatprep.subr.bf16.mxu1 %v5497_v45  ;;  %v191_v17 = vld [vmem:[#allocation2 + $0x2a0] sm:$0xff]  ;;  %v5537_v23 = vcombine.high %v188_v18, %v192_v19  ;;  %v196_v26 = vld [vmem:[#allocation2 + $0x2c8] sm:$0xff]  ;;  %v5536_v29 = vcombine.low %v188_v18, %v192_v19 }
  0x85   :  { %v5535_v22 = vcombine.high %v187_v16, %v191_v17  ;;  %v195_v24 = vld [vmem:[#allocation2 + $0x2c0] sm:$0xff]  ;;  %v200_v27 = vld [vmem:[#allocation2 + $0x2e8] sm:$0xff]  ;;  %v5534_v28 = vcombine.low %v187_v16, %v191_v17 }
  0x86   :  { %v199_v25 = vld [vmem:[#allocation2 + $0x2e0] sm:$0xff]  ;;  %v5545_v31 = vcombine.high %v196_v26, %v200_v27  ;;  %v204_v34 = vld [vmem:[#allocation2 + $0x308] sm:$0xff]  ;;  %v5544_v37 = vcombine.low %v196_v26, %v200_v27 }
  0x87   :  { %2540 = vmatpush1.bf16.msra.mxu0 %v5494_v50  ;;  %2704 = vmatpush1.bf16.msra.mxu1 %v5496_v51  ;;  %v5543_v30 = vcombine.high %v195_v24, %v199_v25  ;;  %v203_v32 = vld [vmem:[#allocation2 + $0x300] sm:$0xff]  ;;  %v208_v35 = vld [vmem:[#allocation2 + $0x328] sm:$0xff]  ;;  %v5542_v36 = vcombine.low %v195_v24, %v199_v25 }
  0x88   :  { %2541 = vmatprep.subr.bf16.mxu0 %v5503_v52  ;;  %2705 = vmatprep.subr.bf16.mxu1 %v5505_v54  ;;  %v207_v33 = vld [vmem:[#allocation2 + $0x320] sm:$0xff]  ;;  %v5553_v39 = vcombine.high %v204_v34, %v208_v35  ;;  %v212_v42 = vld [vmem:[#allocation2 + $0x348] sm:$0xff]  ;;  %v5552_v45 = vcombine.low %v204_v34, %v208_v35 }
  0x89   :  { %v5551_v38 = vcombine.high %v203_v32, %v207_v33  ;;  %v211_v40 = vld [vmem:[#allocation2 + $0x340] sm:$0xff]  ;;  %v216_v43 = vld [vmem:[#allocation2 + $0x368] sm:$0xff]  ;;  %v5550_v44 = vcombine.low %v203_v32, %v207_v33 }
  0x8a   :  { %v215_v41 = vld [vmem:[#allocation2 + $0x360] sm:$0xff]  ;;  %v5561_v47 = vcombine.high %v212_v42, %v216_v43  ;;  %v220_v50 = vld [vmem:[#allocation2 + $0x388] sm:$0xff]  ;;  %v5560_v54 = vcombine.low %v212_v42, %v216_v43 }
  0x8b   :  { %2542 = vmatpush1.bf16.msra.mxu0 %v5502_v60  ;;  %2706 = vmatpush1.bf16.msra.mxu1 %v5504_v61  ;;  %v5559_v46 = vcombine.high %v211_v40, %v215_v41  ;;  %v219_v48 = vld [vmem:[#allocation2 + $0x380] sm:$0xff]  ;;  %v224_v51 = vld [vmem:[#allocation2 + $0x3a8] sm:$0xff]  ;;  %v5558_v52 = vcombine.low %v211_v40, %v215_v41 }
  0x8c   :  { %2543 = vmatprep.subr.bf16.mxu0 %v5511_v62  ;;  %2707 = vmatprep.subr.bf16.mxu1 %v5513_v63  ;;  %v223_v49 = vld [vmem:[#allocation2 + $0x3a0] sm:$0xff]  ;;  %v5569_v56 = vcombine.high %v220_v50, %v224_v51  ;;  %v228_v60 = vld [vmem:[#allocation2 + $0x3c8] sm:$0xff]  ;;  %v5568_v63 = vcombine.low %v220_v50, %v224_v51 }
  0x8d   :  { %v5567_v55 = vcombine.high %v219_v48, %v223_v49  ;;  %v227_v58 = vld [vmem:[#allocation2 + $0x3c0] sm:$0xff]  ;;  %v232_v61 = vld [vmem:[#allocation2 + $0x3e8] sm:$0xff]  ;;  %v5566_v62 = vcombine.low %v219_v48, %v223_v49 }
  0x8e   :  { %v231_v59 = vld [vmem:[#allocation2 + $0x3e0] sm:$0xff]  ;;  %v5577_v1 = vcombine.high %v228_v60, %v232_v61 }
  0x8f   :  { %2544 = vmatpush1.bf16.msra.mxu0 %v5510_v4  ;;  %2708 = vmatpush1.bf16.msra.mxu1 %v5512_v5  ;;  %v5575_v0 = vcombine.high %v227_v58, %v231_v59  ;;  %v235_v2 = vld [vmem:[#allocation2 + $0x400] sm:$0xff]  ;;  %v236_v4 = vld [vmem:[#allocation2 + $0x408] sm:$0xff] }
  0x90   :  { %2545 = vmatprep.subr.bf16.mxu0 %v5519_v6  ;;  %2709 = vmatprep.subr.bf16.mxu1 %v5521_v7  ;;  %v239_v3 = vld [vmem:[#allocation2 + $0x420] sm:$0xff]  ;;  %v240_v5 = vld [vmem:[#allocation2 + $0x428] sm:$0xff]  ;;  %v5574_v6 = vcombine.low %v227_v58, %v231_v59  ;;  %v5576_v7 = vcombine.low %v228_v60, %v232_v61 }
  0x91   :  { %v5583_v8 = vcombine.high %v235_v2, %v239_v3  ;;  %v5585_v9 = vcombine.high %v236_v4, %v240_v5  ;;  %v243_v10 = vld [vmem:[#allocation2 + $0x440] sm:$0xff]  ;;  %v5582_v16 = vcombine.low %v235_v2, %v239_v3  ;;  %v5584_v19 = vcombine.low %v236_v4, %v240_v5 }
  0x92   :  { %v247_v11 = vld [vmem:[#allocation2 + $0x460] sm:$0xff] }
  0x93   :  { %2546 = vmatpush1.bf16.msra.mxu0 %v5518_v12  ;;  %2710 = vmatpush1.bf16.msra.mxu1 %v5520_v13  ;;  %v6983_v12 = vcombine.low %v6973_v53, %v6973_v53  ;;  %v244_v13 = vld [vmem:[#allocation2 + $0x448] sm:$0xff]  ;;  %v251_v17 = vld [vmem:[#allocation2 + $0x480] sm:$0xff]  ;;  %v5590_v24 = vcombine.low %v243_v10, %v247_v11 }
  0x94   :  { %2547 = vmatprep.subr.bf16.mxu0 %v5527_v14  ;;  %2711 = vmatprep.subr.bf16.mxu1 %v5529_v15  ;;  %v248_v14 = vld [vmem:[#allocation2 + $0x468] sm:$0xff]  ;;  %v255_v18 = vld [vmem:[#allocation2 + $0x4a0] sm:$0xff] }
  0x95   :  { %v6988_v15 = vld [vmem:[%s7097_s0 + $0x8] sm:$0xff]  ;;  %v5592_v25 = vcombine.low %v244_v13, %v248_v14  ;;  %v5599_v26 = vcombine.high %v251_v17, %v255_v18  ;;  %v5598_v32 = vcombine.low %v251_v17, %v255_v18  ;;  %v267_v33 = vld [vmem:[#allocation2 + $0x500] sm:$0xff] }
  0x96   :  { %v6992_v53 = vcombine.high %v6988_v15, %v6988_v15  ;;  %v271_v34 = vld [vmem:[#allocation2 + $0x520] sm:$0xff]  ;;  %v308_v17 = vld [vmem:[#allocation2 + $0x648] sm:$0xff] }
  0x97   :  { %2548 = vmatpush1.bf16.msra.mxu0 %v5526_v20  ;;  %2712 = vmatpush1.bf16.msra.mxu1 %v5528_v21  ;;  %v5591_v20 = vcombine.high %v243_v10, %v247_v11  ;;  %v5593_v21 = vcombine.high %v244_v13, %v248_v14  ;;  %v275_v41 = vld [vmem:[#allocation2 + $0x540] sm:$0xff]  ;;  %v5614_v48 = vcombine.low %v267_v33, %v271_v34 }
  0x98   :  { %2549 = vmatprep.subr.bf16.mxu0 %v5535_v22  ;;  %2713 = vmatprep.subr.bf16.mxu1 %v5537_v23  ;;  %v252_v22 = vld [vmem:[#allocation2 + $0x488] sm:$0xff]  ;;  %v279_v42 = vld [vmem:[#allocation2 + $0x560] sm:$0xff] }
  0x99   :  { %v256_v23 = vld [vmem:[#allocation2 + $0x4a8] sm:$0xff]  ;;  %v5623_v50 = vcombine.high %v275_v41, %v279_v42  ;;  %v283_v51 = vld [vmem:[#allocation2 + $0x580] sm:$0xff]  ;;  %v5622_v58 = vcombine.low %v275_v41, %v279_v42 }
  0x9a   :  { %v5601_v27 = vcombine.high %v252_v22, %v256_v23  ;;  %v5600_v35 = vcombine.low %v252_v22, %v256_v23  ;;  %v291_v61 = vld [vmem:[#allocation2 + $0x5c0] sm:$0xff]  ;;  %v332_v41 = vld [vmem:[#allocation2 + $0x708] sm:$0xff] }
  0x9b   :  { %2550 = vmatpush1.bf16.msra.mxu0 %v5534_v28  ;;  %2714 = vmatpush1.bf16.msra.mxu1 %v5536_v29  ;;  %v259_v28 = vld [vmem:[#allocation2 + $0x4c0] sm:$0xff] }
  0x9c   :  { %2551 = vmatprep.subr.bf16.mxu0 %v5543_v30  ;;  %2715 = vmatprep.subr.bf16.mxu1 %v5545_v31  ;;  %v263_v29 = vld [vmem:[#allocation2 + $0x4e0] sm:$0xff]  ;;  %v260_v30 = vld [vmem:[#allocation2 + $0x4c8] sm:$0xff] }
  0x9d   :  { %v264_v31 = vld [vmem:[#allocation2 + $0x4e8] sm:$0xff]  ;;  %v5606_v40 = vcombine.low %v259_v28, %v263_v29  ;;  %v299_v5 = vld [vmem:[#allocation2 + $0x600] sm:$0xff] }
  0x9e   :  { %v5608_v43 = vcombine.low %v260_v30, %v264_v31  ;;  %v307_v14 = vld [vmem:[#allocation2 + $0x640] sm:$0xff] }
  0x9f   :  { %2552 = vmatpush1.bf16.msra.mxu0 %v5542_v36  ;;  %2716 = vmatpush1.bf16.msra.mxu1 %v5544_v37  ;;  %v5607_v36 = vcombine.high %v259_v28, %v263_v29  ;;  %v268_v37 = vld [vmem:[#allocation2 + $0x508] sm:$0xff]  ;;  %v315_v23 = vld [vmem:[#allocation2 + $0x680] sm:$0xff] }
  0xa0   :  { %2553 = vmatprep.subr.bf16.mxu0 %v5551_v38  ;;  %2717 = vmatprep.subr.bf16.mxu1 %v5553_v39  ;;  %v272_v38 = vld [vmem:[#allocation2 + $0x528] sm:$0xff]  ;;  %v5609_v39 = vcombine.high %v260_v30, %v264_v31  ;;  %v323_v31 = vld [vmem:[#allocation2 + $0x6c0] sm:$0xff] }
  0xa1   :  { %v5616_v49 = vcombine.low %v268_v37, %v272_v38 }
  0xa3   :  { %2554 = vmatpush1.bf16.msra.mxu0 %v5550_v44  ;;  %2718 = vmatpush1.bf16.msra.mxu1 %v5552_v45  ;;  %v5615_v44 = vcombine.high %v267_v33, %v271_v34  ;;  %v276_v45 = vld [vmem:[#allocation2 + $0x548] sm:$0xff] }
  0xa4   :  { %2555 = vmatprep.subr.bf16.mxu0 %v5559_v46  ;;  %2719 = vmatprep.subr.bf16.mxu1 %v5561_v47  ;;  %v280_v46 = vld [vmem:[#allocation2 + $0x568] sm:$0xff]  ;;  %v5617_v47 = vcombine.high %v268_v37, %v272_v38 }
  0xa5   :  { %v5624_v59 = vcombine.low %v276_v45, %v280_v46  ;;  %v324_v33 = vld [vmem:[#allocation2 + $0x6c8] sm:$0xff] }
  0xa7   :  { %2556 = vmatpush1.bf16.msra.mxu0 %v5558_v52  ;;  %2720 = vmatpush1.bf16.msra.mxu1 %v5560_v54  ;;  %v287_v52 = vld [vmem:[#allocation2 + $0x5a0] sm:$0xff]  ;;  %v284_v54 = vld [vmem:[#allocation2 + $0x588] sm:$0xff] }
  0xa8   :  { %2557 = vmatprep.subr.bf16.mxu0 %v5567_v55  ;;  %2721 = vmatprep.subr.bf16.mxu1 %v5569_v56  ;;  %v5625_v55 = vcombine.high %v276_v45, %v280_v46  ;;  %v288_v56 = vld [vmem:[#allocation2 + $0x5a8] sm:$0xff]  ;;  %v5631_v60 = vcombine.high %v283_v51, %v287_v52  ;;  %v5630_v2 = vcombine.low %v283_v51, %v287_v52 }
  0xa9   :  { %v5632_v3 = vcombine.low %v284_v54, %v288_v56  ;;  %v344_v51 = vld [vmem:[#allocation2 + $0x768] sm:$0xff] }
  0xab   :  { %2558 = vmatpush1.bf16.msra.mxu0 %v5566_v62  ;;  %2722 = vmatpush1.bf16.msra.mxu1 %v5568_v63  ;;  %v295_v62 = vld [vmem:[#allocation2 + $0x5e0] sm:$0xff]  ;;  %v292_v63 = vld [vmem:[#allocation2 + $0x5c8] sm:$0xff] }
  0xac   :  { %2559 = vmatprep.subr.bf16.mxu0 %v5575_v0  ;;  %2723 = vmatprep.subr.bf16.mxu1 %v5577_v1  ;;  %v5633_v0 = vcombine.high %v284_v54, %v288_v56  ;;  %v296_v1 = vld [vmem:[#allocation2 + $0x5e8] sm:$0xff]  ;;  %v5639_v4 = vcombine.high %v291_v61, %v295_v62  ;;  %v5638_v10 = vcombine.low %v291_v61, %v295_v62  ;;  %v347_v56 = vld [vmem:[#allocation2 + $0x780] sm:$0xff] }
  0xad   :  { %v5640_v11 = vcombine.low %v292_v63, %v296_v1  ;;  %v352_v61 = vld [vmem:[#allocation2 + $0x7a8] sm:$0xff] }
  0xaf   :  { %2560 = vmatpush1.bf16.msra.mxu0 %v5574_v6  ;;  %2724 = vmatpush1.bf16.msra.mxu1 %v5576_v7  ;;  %v303_v6 = vld [vmem:[#allocation2 + $0x620] sm:$0xff]  ;;  %v300_v7 = vld [vmem:[#allocation2 + $0x608] sm:$0xff] }
  0xb0   :  { %2570 = vmatprep.subr.bf16.mxu0 %v5583_v8  ;;  %2734 = vmatprep.subr.bf16.mxu1 %v5585_v9  ;;  %v5641_v8 = vcombine.high %v292_v63, %v296_v1  ;;  %v304_v9 = vld [vmem:[#allocation2 + $0x628] sm:$0xff]  ;;  %v5647_v13 = vcombine.high %v299_v5, %v303_v6  ;;  %v355_v1 = vld [vmem:[#allocation2 + $0x7c0] sm:$0xff] }
  0xb1   :  { %v5649_v18 = vcombine.high %v300_v7, %v304_v9 }
  0xb2   :  { %2562 = vmatmul.mubr.bf16.vlgmr.msra.gmra.mrb[0].mxu0 %v6983_v12  ;;  %2726 = vmatmul.mubr.bf16.vlgmr.msra.gmra.mrb[0].mxu1 %v6983_v12 }
  0xb3   :  { %2571 = vmatpush1.bf16.msra.mxu0 %v5582_v16  ;;  %2735 = vmatpush1.bf16.msra.mxu1 %v5584_v19  ;;  %v311_v16 = vld [vmem:[#allocation2 + $0x660] sm:$0xff]  ;;  %v312_v19 = vld [vmem:[#allocation2 + $0x668] sm:$0xff] }
  0xb4   :  { %2572 = vmatprep.subr.bf16.mxu0 %v5591_v20  ;;  %2736 = vmatprep.subr.bf16.mxu1 %v5593_v21  ;;  %v5646_v20 = vcombine.low %v299_v5, %v303_v6  ;;  %v5648_v21 = vcombine.low %v300_v7, %v304_v9  ;;  %v5655_v22 = vcombine.high %v307_v14, %v311_v16  ;;  %v360_v5 = vld [vmem:[#allocation2 + $0x7e8] sm:$0xff]  ;;  %v363_v9 = vld [vmem:[#allocation2 + $0x800] sm:$0xff] }
  0xb5   :  { %2602 = vmatprep.mubr.bf16.mxu0 %v6992_v53  ;;  %2766 = vmatprep.mubr.bf16.mxu1 %v6992_v53  ;;  %v5654_v28 = vcombine.low %v307_v14, %v311_v16  ;;  %v5656_v29 = vcombine.low %v308_v17, %v312_v19  ;;  %v368_v14 = vld [vmem:[#allocation2 + $0x828] sm:$0xff] }
  0xb7   :  { %2573 = vmatpush1.bf16.msra.mxu0 %v5590_v24  ;;  %2737 = vmatpush1.bf16.msra.mxu1 %v5592_v25  ;;  %v319_v24 = vld [vmem:[#allocation2 + $0x6a0] sm:$0xff]  ;;  %v316_v25 = vld [vmem:[#allocation2 + $0x688] sm:$0xff] }
  0xb8   :  { %2574 = vmatprep.subr.bf16.mxu0 %v5599_v26  ;;  %2738 = vmatprep.subr.bf16.mxu1 %v5601_v27  ;;  %v5657_v26 = vcombine.high %v308_v17, %v312_v19  ;;  %v320_v27 = vld [vmem:[#allocation2 + $0x6a8] sm:$0xff]  ;;  %v5663_v30 = vcombine.high %v315_v23, %v319_v24  ;;  %v371_v17 = vld [vmem:[#allocation2 + $0x840] sm:$0xff] }
  0xb9   :  { %v5665_v34 = vcombine.high %v316_v25, %v320_v27  ;;  %v5664_v37 = vcombine.low %v316_v25, %v320_v27  ;;  %v7005_v25 = vcombine.low %v6988_v15, %v6988_v15 }
  0xbb   :  { %2575 = vmatpush1.bf16.msra.mxu0 %v5598_v32  ;;  %2739 = vmatpush1.bf16.msra.mxu1 %v5600_v35  ;;  %v327_v32 = vld [vmem:[#allocation2 + $0x6e0] sm:$0xff]  ;;  %v328_v35 = vld [vmem:[#allocation2 + $0x6e8] sm:$0xff] }
  0xbc   :  { %2576 = vmatprep.subr.bf16.mxu0 %v5607_v36  ;;  %2740 = vmatprep.subr.bf16.mxu1 %v5609_v39  ;;  %v5662_v36 = vcombine.low %v315_v23, %v319_v24  ;;  %v5671_v38 = vcombine.high %v323_v31, %v327_v32  ;;  %v331_v39 = vld [vmem:[#allocation2 + $0x700] sm:$0xff]  ;;  %v5673_v42 = vcombine.high %v324_v33, %v328_v35  ;;  %v7001_v24 = vld [vmem:[%s7097_s0 + $0x10] sm:$0xff] }
  0xbd   :  { %v5672_v45 = vcombine.low %v324_v33, %v328_v35  ;;  %v384_v33 = vld [vmem:[#allocation2 + $0x8a8] sm:$0xff] }
  0xbf   :  { %2577 = vmatpush1.bf16.msra.mxu0 %v5606_v40  ;;  %2741 = vmatpush1.bf16.msra.mxu1 %v5608_v43  ;;  %v335_v40 = vld [vmem:[#allocation2 + $0x720] sm:$0xff]  ;;  %v336_v43 = vld [vmem:[#allocation2 + $0x728] sm:$0xff] }
  0xc0   :  { %2578 = vmatprep.subr.bf16.mxu0 %v5615_v44  ;;  %2742 = vmatprep.subr.bf16.mxu1 %v5617_v47  ;;  %v5670_v44 = vcombine.low %v323_v31, %v327_v32  ;;  %v5679_v46 = vcombine.high %v331_v39, %v335_v40  ;;  %v339_v47 = vld [vmem:[#allocation2 + $0x740] sm:$0xff]  ;;  %v5678_v52 = vcombine.low %v331_v39, %v335_v40  ;;  %v380_v31 = vld [vmem:[#allocation2 + $0x888] sm:$0xff] }
  0xc1   :  { %v5680_v54 = vcombine.low %v332_v41, %v336_v43  ;;  %v388_v39 = vld [vmem:[#allocation2 + $0x8c8] sm:$0xff]  ;;  %v5729_v40 = vcombine.high %v380_v31, %v384_v33 }
  0xc3   :  { %2579 = vmatpush1.bf16.msra.mxu0 %v5614_v48  ;;  %2743 = vmatpush1.bf16.msra.mxu1 %v5616_v49  ;;  %v343_v48 = vld [vmem:[#allocation2 + $0x760] sm:$0xff]  ;;  %v340_v49 = vld [vmem:[#allocation2 + $0x748] sm:$0xff] }
  0xc4   :  { %2580 = vmatprep.subr.bf16.mxu0 %v5623_v50  ;;  %2744 = vmatprep.subr.bf16.mxu1 %v5625_v55  ;;  %v5681_v50 = vcombine.high %v332_v41, %v336_v43  ;;  %v5687_v55 = vcombine.high %v339_v47, %v343_v48  ;;  %v5686_v62 = vcombine.low %v339_v47, %v343_v48  ;;  %v392_v41 = vld [vmem:[#allocation2 + $0x8e8] sm:$0xff] }
  0xc5   :  { %v5688_v63 = vcombine.low %v340_v49, %v344_v51  ;;  %v5728_v43 = vcombine.low %v380_v31, %v384_v33  ;;  %v396_v47 = vld [vmem:[#allocation2 + $0x908] sm:$0xff]  ;;  %v5737_v48 = vcombine.high %v388_v39, %v392_v41 }
  0xc6   :  { %v440_v31 = vld [vmem:[#allocation2 + $0xa68] sm:$0xff] }
  0xc7   :  { %2581 = vmatpush1.bf16.msra.mxu0 %v5622_v58  ;;  %2745 = vmatpush1.bf16.msra.mxu1 %v5624_v59  ;;  %v351_v58 = vld [vmem:[#allocation2 + $0x7a0] sm:$0xff]  ;;  %v348_v59 = vld [vmem:[#allocation2 + $0x788] sm:$0xff] }
  0xc8   :  { %2582 = vmatprep.subr.bf16.mxu0 %v5631_v60  ;;  %2746 = vmatprep.subr.bf16.mxu1 %v5633_v0  ;;  %v5689_v60 = vcombine.high %v340_v49, %v344_v51  ;;  %v5695_v0 = vcombine.high %v347_v56, %v351_v58  ;;  %v5694_v6 = vcombine.low %v347_v56, %v351_v58  ;;  %v400_v49 = vld [vmem:[#allocation2 + $0x928] sm:$0xff] }
  0xc9   :  { %v5696_v7 = vcombine.low %v348_v59, %v352_v61  ;;  %v5736_v51 = vcombine.low %v388_v39, %v392_v41  ;;  %v404_v56 = vld [vmem:[#allocation2 + $0x948] sm:$0xff]  ;;  %v5745_v58 = vcombine.high %v396_v47, %v400_v49 }
  0xca   :  { %v448_v39 = vld [vmem:[#allocation2 + $0xaa8] sm:$0xff] }
  0xcb   :  { %2583 = vmatpush1.bf16.msra.mxu0 %v5630_v2  ;;  %2747 = vmatpush1.bf16.msra.mxu1 %v5632_v3  ;;  %v359_v2 = vld [vmem:[#allocation2 + $0x7e0] sm:$0xff]  ;;  %v356_v3 = vld [vmem:[#allocation2 + $0x7c8] sm:$0xff] }
  0xcc   :  { %2584 = vmatprep.subr.bf16.mxu0 %v5639_v4  ;;  %2748 = vmatprep.subr.bf16.mxu1 %v5641_v8  ;;  %v5697_v4 = vcombine.high %v348_v59, %v352_v61  ;;  %v5703_v8 = vcombine.high %v355_v1, %v359_v2  ;;  %v5702_v16 = vcombine.low %v355_v1, %v359_v2  ;;  %v408_v59 = vld [vmem:[#allocation2 + $0x968] sm:$0xff] }
  0xcd   :  { %v5744_v61 = vcombine.low %v396_v47, %v400_v49  ;;  %v412_v1 = vld [vmem:[#allocation2 + $0x988] sm:$0xff]  ;;  %v5753_v2 = vcombine.high %v404_v56, %v408_v59 }
  0xce   :  { %v456_v47 = vld [vmem:[#allocation2 + $0xae8] sm:$0xff] }
  0xcf   :  { %2585 = vmatpush1.bf16.msra.mxu0 %v5638_v10  ;;  %2749 = vmatpush1.bf16.msra.mxu1 %v5640_v11  ;;  %v367_v10 = vld [vmem:[#allocation2 + $0x820] sm:$0xff]  ;;  %v364_v11 = vld [vmem:[#allocation2 + $0x808] sm:$0xff] }
  0xd0   :  { %2586 = vmatprep.subr.bf16.mxu0 %v5647_v13  ;;  %2750 = vmatprep.subr.bf16.mxu1 %v5649_v18  ;;  %v5705_v13 = vcombine.high %v356_v3, %v360_v5  ;;  %v5704_v18 = vcombine.low %v356_v3, %v360_v5  ;;  %v5711_v19 = vcombine.high %v363_v9, %v367_v10  ;;  %v416_v3 = vld [vmem:[#allocation2 + $0x9a8] sm:$0xff] }
  0xd1   :  { %v5713_v23 = vcombine.high %v364_v11, %v368_v14  ;;  %v5712_v27 = vcombine.low %v364_v11, %v368_v14  ;;  %v5752_v5 = vcombine.low %v404_v56, %v408_v59  ;;  %v424_v11 = vld [vmem:[#allocation2 + $0x9e8] sm:$0xff]  ;;  %v5760_v14 = vcombine.low %v412_v1, %v416_v3 }
  0xd2   :  { %v464_v56 = vld [vmem:[#allocation2 + $0xb28] sm:$0xff] }
  0xd3   :  { %2587 = vmatpush1.bf16.msra.mxu0 %v5646_v20  ;;  %2751 = vmatpush1.bf16.msra.mxu1 %v5648_v21  ;;  %v375_v20 = vld [vmem:[#allocation2 + $0x860] sm:$0xff]  ;;  %v372_v21 = vld [vmem:[#allocation2 + $0x848] sm:$0xff] }
  0xd4   :  { %2588 = vmatprep.subr.bf16.mxu0 %v5655_v22  ;;  %2752 = vmatprep.subr.bf16.mxu1 %v5657_v26  ;;  %v376_v22 = vld [vmem:[#allocation2 + $0x868] sm:$0xff]  ;;  %v5710_v26 = vcombine.low %v363_v9, %v367_v10  ;;  %v5718_v15 = vcombine.low %v371_v17, %v375_v20  ;;  %v5761_v10 = vcombine.high %v412_v1, %v416_v3 }
  0xd5   :  { %v5721_v32 = vcombine.high %v372_v21, %v376_v22  ;;  %v5720_v35 = vcombine.low %v372_v21, %v376_v22  ;;  %v420_v9 = vld [vmem:[#allocation2 + $0x9c8] sm:$0xff] }
  0xd6   :  { %v432_v21 = vld [vmem:[#allocation2 + $0xa28] sm:$0xff] }
  0xd7   :  { %2589 = vmatpush1.bf16.msra.mxu0 %v5654_v28  ;;  %2753 = vmatpush1.bf16.msra.mxu1 %v5656_v29  ;;  %v5719_v28 = vcombine.high %v371_v17, %v375_v20  ;;  %v379_v29 = vld [vmem:[#allocation2 + $0x880] sm:$0xff]  ;;  %v5769_v20 = vcombine.high %v420_v9, %v424_v11  ;;  %v472_v1 = vld [vmem:[#allocation2 + $0xb68] sm:$0xff] }
  0xd8   :  { %2590 = vmatprep.subr.bf16.mxu0 %v5663_v30  ;;  %2754 = vmatprep.subr.bf16.mxu1 %v5665_v34  ;;  %v383_v30 = vld [vmem:[#allocation2 + $0x8a0] sm:$0xff]  ;;  %v7009_v34 = vcombine.high %v7001_v24, %v7001_v24 }
  0xd9   :  { %v427_v17 = vld [vmem:[#allocation2 + $0xa00] sm:$0xff] }
  0xdb   :  { %2591 = vmatpush1.bf16.msra.mxu0 %v5662_v36  ;;  %2755 = vmatpush1.bf16.msra.mxu1 %v5664_v37  ;;  %v5727_v36 = vcombine.high %v379_v29, %v383_v30  ;;  %v387_v37 = vld [vmem:[#allocation2 + $0x8c0] sm:$0xff] }
  0xdc   :  { %2592 = vmatprep.subr.bf16.mxu0 %v5671_v38  ;;  %2756 = vmatprep.subr.bf16.mxu1 %v5673_v42  ;;  %v391_v38 = vld [vmem:[#allocation2 + $0x8e0] sm:$0xff]  ;;  %v5726_v42 = vcombine.low %v379_v29, %v383_v30  ;;  %v436_v29 = vld [vmem:[#allocation2 + $0xa48] sm:$0xff] }
  0xdd   :  { %v5784_v41 = vcombine.low %v436_v29, %v440_v31 }
  0xdf   :  { %2593 = vmatpush1.bf16.msra.mxu0 %v5670_v44  ;;  %2757 = vmatpush1.bf16.msra.mxu1 %v5672_v45  ;;  %v5735_v44 = vcombine.high %v387_v37, %v391_v38  ;;  %v395_v45 = vld [vmem:[#allocation2 + $0x900] sm:$0xff] }
  0xe0   :  { %2594 = vmatprep.subr.bf16.mxu0 %v5679_v46  ;;  %2758 = vmatprep.subr.bf16.mxu1 %v5681_v50  ;;  %v399_v46 = vld [vmem:[#allocation2 + $0x920] sm:$0xff]  ;;  %v5734_v50 = vcombine.low %v387_v37, %v391_v38  ;;  %v444_v37 = vld [vmem:[#allocation2 + $0xa88] sm:$0xff]  ;;  %v5785_v38 = vcombine.high %v436_v29, %v440_v31 }
  0xe1   :  { %v5792_v49 = vcombine.low %v444_v37, %v448_v39  ;;  %v496_v29 = vld [vmem:[#allocation2 + $0xc28] sm:$0xff] }
  0xe3   :  { %2595 = vmatpush1.bf16.msra.mxu0 %v5678_v52  ;;  %2759 = vmatpush1.bf16.msra.mxu1 %v5680_v54  ;;  %v5743_v52 = vcombine.high %v395_v45, %v399_v46  ;;  %v403_v54 = vld [vmem:[#allocation2 + $0x940] sm:$0xff] }
  0xe4   :  { %2596 = vmatprep.subr.bf16.mxu0 %v5687_v55  ;;  %2760 = vmatprep.subr.bf16.mxu1 %v5689_v60  ;;  %v407_v55 = vld [vmem:[#allocation2 + $0x960] sm:$0xff]  ;;  %v5742_v60 = vcombine.low %v395_v45, %v399_v46  ;;  %v452_v45 = vld [vmem:[#allocation2 + $0xac8] sm:$0xff]  ;;  %v5793_v46 = vcombine.high %v444_v37, %v448_v39  ;;  %v114_v37 = vld [vmem:[#allocation2 + $0x38] sm:$0xff] }
  0xe5   :  { %v5800_v59 = vcombine.low %v452_v45, %v456_v47 }
  0xe7   :  { %2597 = vmatpush1.bf16.msra.mxu0 %v5686_v62  ;;  %2761 = vmatpush1.bf16.msra.mxu1 %v5688_v63  ;;  %v5751_v62 = vcombine.high %v403_v54, %v407_v55  ;;  %v411_v63 = vld [vmem:[#allocation2 + $0x980] sm:$0xff] }
  0xe8   :  { %2598 = vmatprep.subr.bf16.mxu0 %v5695_v0  ;;  %2762 = vmatprep.subr.bf16.mxu1 %v5697_v4  ;;  %v415_v0 = vld [vmem:[#allocation2 + $0x9a0] sm:$0xff]  ;;  %v5750_v4 = vcombine.low %v403_v54, %v407_v55  ;;  %v460_v54 = vld [vmem:[#allocation2 + $0xb08] sm:$0xff]  ;;  %v5801_v55 = vcombine.high %v452_v45, %v456_v47  ;;  %v121_v45 = vld [vmem:[#allocation2 + $0x70] sm:$0xff] }
  0xe9   :  { %v5808_v3 = vcombine.low %v460_v54, %v464_v56  ;;  %v122_v47 = vld [vmem:[#allocation2 + $0x78] sm:$0xff] }
  0xeb   :  { %2599 = vmatpush1.bf16.msra.mxu0 %v5694_v6  ;;  %2763 = vmatpush1.bf16.msra.mxu1 %v5696_v7  ;;  %v5759_v6 = vcombine.high %v411_v63, %v415_v0  ;;  %v419_v7 = vld [vmem:[#allocation2 + $0x9c0] sm:$0xff] }
  0xec   :  { %2600 = vmatprep.subr.bf16.mxu0 %v5703_v8  ;;  %2764 = vmatprep.subr.bf16.mxu1 %v5705_v13  ;;  %v423_v8 = vld [vmem:[#allocation2 + $0x9e0] sm:$0xff]  ;;  %v5758_v13 = vcombine.low %v411_v63, %v415_v0  ;;  %v468_v63 = vld [vmem:[#allocation2 + $0xb48] sm:$0xff]  ;;  %v5809_v0 = vcombine.high %v460_v54, %v464_v56  ;;  %v126_v54 = vld [vmem:[#allocation2 + $0x98] sm:$0xff] }
  0xed   :  { %v5766_v22 = vcombine.low %v419_v7, %v423_v8  ;;  %v130_v56 = vld [vmem:[#allocation2 + $0xb8] sm:$0xff] }
  0xef   :  { %2601 = vmatpush1.bf16.msra.mxu0 %v5702_v16  ;;  %2765 = vmatpush1.bf16.msra.mxu1 %v5704_v18  ;;  %v5767_v16 = vcombine.high %v419_v7, %v423_v8  ;;  %v431_v18 = vld [vmem:[#allocation2 + $0xa20] sm:$0xff]  ;;  %v476_v7 = vld [vmem:[#allocation2 + $0xb88] sm:$0xff]  ;;  %v5817_v8 = vcombine.high %v468_v63, %v472_v1 }
  0xf0   :  { %2611 = vmatprep.subr.bf16.mxu0 %v5711_v19  ;;  %2775 = vmatprep.subr.bf16.mxu1 %v5713_v23  ;;  %v428_v19 = vld [vmem:[#allocation2 + $0xa08] sm:$0xff]  ;;  %v5768_v23 = vcombine.low %v420_v9, %v424_v11  ;;  %v5816_v11 = vcombine.low %v468_v63, %v472_v1  ;;  %v134_v63 = vld [vmem:[#allocation2 + $0xd8] sm:$0xff] }
  0xf1   :  { %v5777_v30 = vcombine.high %v428_v19, %v432_v21  ;;  %v5776_v33 = vcombine.low %v428_v19, %v432_v21  ;;  %v480_v9 = vld [vmem:[#allocation2 + $0xba8] sm:$0xff]  ;;  %v138_v1 = vld [vmem:[#allocation2 + $0xf8] sm:$0xff] }
  0xf2   :  { %2603 = vmatmul.mubr.bf16.vlgmr.msra.gmra.mrb[0].mxu0 %v7005_v25  ;;  %2767 = vmatmul.mubr.bf16.vlgmr.msra.gmra.mrb[0].mxu1 %v7005_v25  ;;  %v488_v19 = vld [vmem:[#allocation2 + $0xbe8] sm:$0xff]  ;;  %v5824_v21 = vcombine.low %v476_v7, %v480_v9 }
  0xf3   :  { %2612 = vmatpush1.bf16.msra.mxu0 %v5710_v26  ;;  %2776 = vmatpush1.bf16.msra.mxu1 %v5712_v27  ;;  %v5775_v26 = vcombine.high %v427_v17, %v431_v18  ;;  %v435_v27 = vld [vmem:[#allocation2 + $0xa40] sm:$0xff] }
  0xf4   :  { %2613 = vmatprep.subr.bf16.mxu0 %v5719_v28  ;;  %2777 = vmatprep.subr.bf16.mxu1 %v5721_v32  ;;  %v439_v28 = vld [vmem:[#allocation2 + $0xa60] sm:$0xff]  ;;  %v5774_v32 = vcombine.low %v427_v17, %v431_v18  ;;  %v484_v17 = vld [vmem:[#allocation2 + $0xbc8] sm:$0xff]  ;;  %v5825_v18 = vcombine.high %v476_v7, %v480_v9  ;;  %v142_v7 = vld [vmem:[#allocation2 + $0x118] sm:$0xff] }
  0xf5   :  { %2643 = vmatprep.mubr.bf16.mxu0 %v7009_v34  ;;  %2807 = vmatprep.mubr.bf16.mxu1 %v7009_v34  ;;  %v5832_v31 = vcombine.low %v484_v17, %v488_v19  ;;  %v146_v9 = vld [vmem:[#allocation2 + $0x138] sm:$0xff] }
  0xf7   :  { %2614 = vmatpush1.bf16.msra.mxu0 %v5718_v15  ;;  %2778 = vmatpush1.bf16.msra.mxu1 %v5720_v35  ;;  %v5783_v15 = vcombine.high %v435_v27, %v439_v28  ;;  %v443_v35 = vld [vmem:[#allocation2 + $0xa80] sm:$0xff] }
  0xf8   :  { %2615 = vmatprep.subr.bf16.mxu0 %v5727_v36  ;;  %2779 = vmatprep.subr.bf16.mxu1 %v5729_v40  ;;  %v447_v36 = vld [vmem:[#allocation2 + $0xaa0] sm:$0xff]  ;;  %v5782_v40 = vcombine.low %v435_v27, %v439_v28  ;;  %v492_v27 = vld [vmem:[#allocation2 + $0xc08] sm:$0xff]  ;;  %v5833_v28 = vcombine.high %v484_v17, %v488_v19  ;;  %v5493_v17 = vcombine.high %v142_v7, %v146_v9 }
  0xfb   :  { %2616 = vmatpush1.bf16.msra.mxu0 %v5726_v42  ;;  %2780 = vmatpush1.bf16.msra.mxu1 %v5728_v43  ;;  %v5791_v42 = vcombine.high %v443_v35, %v447_v36  ;;  %v451_v43 = vld [vmem:[#allocation2 + $0xac0] sm:$0xff] }
  0xfc   :  { %2617 = vmatprep.subr.bf16.mxu0 %v5735_v44  ;;  %2781 = vmatprep.subr.bf16.mxu1 %v5737_v48  ;;  %v455_v44 = vld [vmem:[#allocation2 + $0xae0] sm:$0xff]  ;;  %v5790_v48 = vcombine.low %v443_v35, %v447_v36  ;;  %v5841_v35 = vcombine.high %v492_v27, %v496_v29  ;;  %v110_v36 = vld [vmem:[#allocation2 + $0x18] sm:$0xff] }
  0xff   :  { %2618 = vmatpush1.bf16.msra.mxu0 %v5734_v50  ;;  %2782 = vmatpush1.bf16.msra.mxu1 %v5736_v51  ;;  %v5799_v50 = vcombine.high %v451_v43, %v455_v44  ;;  %v459_v51 = vld [vmem:[#allocation2 + $0xb00] sm:$0xff] }
 0x100   :  { %2619 = vmatprep.subr.bf16.mxu0 %v5743_v52  ;;  %2783 = vmatprep.subr.bf16.mxu1 %v5745_v58  ;;  %v463_v52 = vld [vmem:[#allocation2 + $0xb20] sm:$0xff]  ;;  %v5798_v58 = vcombine.low %v451_v43, %v455_v44  ;;  %v6857_v43 = vmov 0   ;;  %v117_v44 = vld [vmem:[#allocation2 + $0x50] sm:$0xff] }
 0x103   :  { %2620 = vmatpush1.bf16.msra.mxu0 %v5742_v60  ;;  %2784 = vmatpush1.bf16.msra.mxu1 %v5744_v61  ;;  %v5807_v60 = vcombine.high %v459_v51, %v463_v52  ;;  %v467_v61 = vld [vmem:[#allocation2 + $0xb40] sm:$0xff] }
 0x104   :  { %2621 = vmatprep.subr.bf16.mxu0 %v5751_v62  ;;  %2785 = vmatprep.subr.bf16.mxu1 %v5753_v2  ;;  %v471_v62 = vld [vmem:[#allocation2 + $0xb60] sm:$0xff]  ;;  %v5806_v2 = vcombine.low %v459_v51, %v463_v52  ;;  %v125_v51 = vld [vmem:[#allocation2 + $0x90] sm:$0xff] }
 0x105   :  { %v129_v52 = vld [vmem:[#allocation2 + $0xb0] sm:$0xff] }
 0x107   :  { %2622 = vmatpush1.bf16.msra.mxu0 %v5750_v4  ;;  %2786 = vmatpush1.bf16.msra.mxu1 %v5752_v5  ;;  %v5815_v4 = vcombine.high %v467_v61, %v471_v62  ;;  %v475_v5 = vld [vmem:[#allocation2 + $0xb80] sm:$0xff] }
 0x108   :  { %2623 = vmatprep.subr.bf16.mxu0 %v5759_v6  ;;  %2787 = vmatprep.subr.bf16.mxu1 %v5761_v10  ;;  %v479_v6 = vld [vmem:[#allocation2 + $0xba0] sm:$0xff]  ;;  %v5814_v10 = vcombine.low %v467_v61, %v471_v62  ;;  %v133_v61 = vld [vmem:[#allocation2 + $0xd0] sm:$0xff] }
 0x109   :  { %v137_v62 = vld [vmem:[#allocation2 + $0xf0] sm:$0xff] }
 0x10b   :  { %2624 = vmatpush1.bf16.msra.mxu0 %v5758_v13  ;;  %2788 = vmatpush1.bf16.msra.mxu1 %v5760_v14  ;;  %v5823_v13 = vcombine.high %v475_v5, %v479_v6  ;;  %v483_v14 = vld [vmem:[#allocation2 + $0xbc0] sm:$0xff] }
 0x10c   :  { %2625 = vmatprep.subr.bf16.mxu0 %v5767_v16  ;;  %2789 = vmatprep.subr.bf16.mxu1 %v5769_v20  ;;  %v487_v16 = vld [vmem:[#allocation2 + $0xbe0] sm:$0xff]  ;;  %v5822_v20 = vcombine.low %v475_v5, %v479_v6  ;;  %v141_v5 = vld [vmem:[#allocation2 + $0x110] sm:$0xff] }
 0x10d   :  { %v145_v6 = vld [vmem:[#allocation2 + $0x130] sm:$0xff] }
 0x10e   :  { %v5490_v19 = vcombine.low %v141_v5, %v145_v6 }
 0x10f   :  { %2626 = vmatpush1.bf16.msra.mxu0 %v5766_v22  ;;  %2790 = vmatpush1.bf16.msra.mxu1 %v5768_v23  ;;  %v5831_v22 = vcombine.high %v483_v14, %v487_v16  ;;  %v491_v23 = vld [vmem:[#allocation2 + $0xc00] sm:$0xff] }
 0x110   :  { %2627 = vmatprep.subr.bf16.mxu0 %v5775_v26  ;;  %2791 = vmatprep.subr.bf16.mxu1 %v5777_v30  ;;  %v495_v26 = vld [vmem:[#allocation2 + $0xc20] sm:$0xff]  ;;  %v5830_v30 = vcombine.low %v483_v14, %v487_v16  ;;  %v149_v14 = vld [vmem:[#allocation2 + $0x150] sm:$0xff]  ;;  %v150_v16 = vld [vmem:[#allocation2 + $0x158] sm:$0xff] }
 0x111   :  { %v5838_v39 = vcombine.low %v491_v23, %v495_v26 }
 0x113   :  { %2628 = vmatpush1.bf16.msra.mxu0 %v5774_v32  ;;  %2792 = vmatpush1.bf16.msra.mxu1 %v5776_v33  ;;  %v5839_v32 = vcombine.high %v491_v23, %v495_v26  ;;  %v109_v33 = vld [vmem:[#allocation2 + $0x10] sm:$0xff] }
 0x114   :  { %2629 = vmatprep.subr.bf16.mxu0 %v5783_v15  ;;  %2793 = vmatprep.subr.bf16.mxu1 %v5785_v38  ;;  %v113_v15 = vld [vmem:[#allocation2 + $0x30] sm:$0xff]  ;;  %v7017_v38 = vcombine.low %v7001_v24, %v7001_v24  ;;  %v6286_v24 = vld [vmem:[%s7097_s0 + $0x18] ss:$0 sps:$4 sm:$0xff]  }
 0x115   :  { %v161_v26 = vld [vmem:[#allocation2 + $0x1b0] sm:$0xff] }
 0x117   :  { %2630 = vmatpush1.bf16.msra.mxu0 %v5782_v40  ;;  %2794 = vmatpush1.bf16.msra.mxu1 %v5784_v41  ;;  %v5840_v40 = vcombine.low %v492_v27, %v496_v29  ;;  %v5459_v41 = vcombine.high %v109_v33, %v113_v15  ;;  %v158_v27 = vld [vmem:[#allocation2 + $0x198] sm:$0xff] }
 0x118   :  { %2631 = vmatprep.subr.bf16.mxu0 %v5791_v42  ;;  %2795 = vmatprep.subr.bf16.mxu1 %v5793_v46  ;;  %v5461_v42 = vcombine.high %v110_v36, %v114_v37  ;;  %v118_v46 = vld [vmem:[#allocation2 + $0x58] sm:$0xff] }
 0x11b   :  { %2632 = vmatpush1.bf16.msra.mxu0 %v5790_v48  ;;  %2796 = vmatpush1.bf16.msra.mxu1 %v5792_v49  ;;  %v5458_v48 = vcombine.low %v109_v33, %v113_v15  ;;  %v5460_v49 = vcombine.low %v110_v36, %v114_v37  ;;  %v165_v33 = vld [vmem:[#allocation2 + $0x1d0] sm:$0xff]  ;;  %v170_v36 = vld [vmem:[#allocation2 + $0x1f8] sm:$0xff] }
 0x11c   :  { %2633 = vmatprep.subr.bf16.mxu0 %v5799_v50  ;;  %2797 = vmatprep.subr.bf16.mxu1 %v5801_v55  ;;  %v5467_v50 = vcombine.high %v117_v44, %v121_v45  ;;  %v5469_v55 = vcombine.high %v118_v46, %v122_v47  ;;  %v169_v15 = vld [vmem:[#allocation2 + $0x1f0] sm:$0xff] }
 0x11f   :  { %2634 = vmatpush1.bf16.msra.mxu0 %v5798_v58  ;;  %2798 = vmatpush1.bf16.msra.mxu1 %v5800_v59  ;;  %v5466_v58 = vcombine.low %v117_v44, %v121_v45  ;;  %v5468_v59 = vcombine.low %v118_v46, %v122_v47  ;;  %v174_v44 = vld [vmem:[#allocation2 + $0x218] sm:$0xff]  ;;  %v5514_v46 = vcombine.low %v165_v33, %v169_v15 }
 0x120   :  { %2635 = vmatprep.subr.bf16.mxu0 %v5807_v60  ;;  %2799 = vmatprep.subr.bf16.mxu1 %v5809_v0  ;;  %v5475_v60 = vcombine.high %v125_v51, %v129_v52  ;;  %v5477_v0 = vcombine.high %v126_v54, %v130_v56  ;;  %v178_v45 = vld [vmem:[#allocation2 + $0x238] sm:$0xff] }
 0x123   :  { %2636 = vmatpush1.bf16.msra.mxu0 %v5806_v2  ;;  %2800 = vmatpush1.bf16.msra.mxu1 %v5808_v3  ;;  %v5474_v2 = vcombine.low %v125_v51, %v129_v52  ;;  %v5476_v3 = vcombine.low %v126_v54, %v130_v56  ;;  %v185_v51 = vld [vmem:[#allocation2 + $0x270] sm:$0xff]  ;;  %v182_v52 = vld [vmem:[#allocation2 + $0x258] sm:$0xff]  ;;  %v5524_v56 = vcombine.low %v174_v44, %v178_v45 }
 0x124   :  { %2637 = vmatprep.subr.bf16.mxu0 %v5815_v4  ;;  %2801 = vmatprep.subr.bf16.mxu1 %v5817_v8  ;;  %v5483_v4 = vcombine.high %v133_v61, %v137_v62  ;;  %v5485_v8 = vcombine.high %v134_v63, %v138_v1  ;;  %v186_v54 = vld [vmem:[#allocation2 + $0x278] sm:$0xff] }
 0x127   :  { %2638 = vmatpush1.bf16.msra.mxu0 %v5814_v10  ;;  %2802 = vmatpush1.bf16.msra.mxu1 %v5816_v11  ;;  %v5482_v10 = vcombine.low %v133_v61, %v137_v62  ;;  %v5484_v11 = vcombine.low %v134_v63, %v138_v1  ;;  %v193_v61 = vld [vmem:[#allocation2 + $0x2b0] sm:$0xff]  ;;  %v190_v62 = vld [vmem:[#allocation2 + $0x298] sm:$0xff]  ;;  %v5532_v1 = vcombine.low %v182_v52, %v186_v54 }
 0x128   :  { %2639 = vmatprep.subr.bf16.mxu0 %v5823_v13  ;;  %2803 = vmatprep.subr.bf16.mxu1 %v5825_v18  ;;  %v5491_v13 = vcombine.high %v141_v5, %v145_v6  ;;  %v154_v18 = vld [vmem:[#allocation2 + $0x178] sm:$0xff]  ;;  %v201_v5 = vld [vmem:[#allocation2 + $0x2f0] sm:$0xff] }
 0x129   :  { %v5501_v23 = vcombine.high %v150_v16, %v154_v18  ;;  %v194_v63 = vld [vmem:[#allocation2 + $0x2b8] sm:$0xff] }
 0x12a   :  { %v198_v6 = vld [vmem:[#allocation2 + $0x2d8] sm:$0xff] }
 0x12b   :  { %2640 = vmatpush1.bf16.msra.mxu0 %v5822_v20  ;;  %2804 = vmatpush1.bf16.msra.mxu1 %v5824_v21  ;;  %v5492_v20 = vcombine.low %v142_v7, %v146_v9  ;;  %v202_v7 = vld [vmem:[#allocation2 + $0x2f8] sm:$0xff]  ;;  %v5540_v9 = vcombine.low %v190_v62, %v194_v63 }
 0x12c   :  { %2641 = vmatprep.subr.bf16.mxu0 %v5831_v22  ;;  %2805 = vmatprep.subr.bf16.mxu1 %v5833_v28  ;;  %v157_v22 = vld [vmem:[#allocation2 + $0x190] sm:$0xff]  ;;  %v162_v28 = vld [vmem:[#allocation2 + $0x1b8] sm:$0xff] }
 0x12d   :  { %v5506_v37 = vcombine.low %v157_v22, %v161_v26 }
 0x12f   :  { %2642 = vmatpush1.bf16.msra.mxu0 %v5830_v30  ;;  %2806 = vmatpush1.bf16.msra.mxu1 %v5832_v31  ;;  %v5500_v30 = vcombine.low %v150_v16, %v154_v18  ;;  %v5507_v31 = vcombine.high %v157_v22, %v161_v26  ;;  %v210_v16 = vld [vmem:[#allocation2 + $0x338] sm:$0xff]  ;;  %v5548_v18 = vcombine.low %v198_v6, %v202_v7  ;;  %v217_v22 = vld [vmem:[#allocation2 + $0x370] sm:$0xff] }
 0x130   :  { %2652 = vmatprep.subr.bf16.mxu0 %v5839_v32  ;;  %2816 = vmatprep.subr.bf16.mxu1 %v5841_v35  ;;  %v5509_v32 = vcombine.high %v158_v27, %v162_v28  ;;  %v166_v35 = vld [vmem:[#allocation2 + $0x1d8] sm:$0xff] }
 0x131   :  { %v5516_v47 = vcombine.low %v166_v35, %v170_v36  ;;  %v218_v26 = vld [vmem:[#allocation2 + $0x378] sm:$0xff] }
 0x132   :  { %2644 = vmatmul.mubr.bf16.vlgmr.msra.gmra.mrb[0].mxu0 %v7017_v38  ;;  %2808 = vmatmul.mubr.bf16.vlgmr.msra.gmra.mrb[0].mxu1 %v7017_v38 }
 0x133   :  { %2653 = vmatpush1.bf16.msra.mxu0 %v5838_v39  ;;  %2817 = vmatpush1.bf16.msra.mxu1 %v5840_v40  ;;  %v5508_v39 = vcombine.low %v158_v27, %v162_v28  ;;  %v5515_v40 = vcombine.high %v165_v33, %v169_v15  ;;  %v222_v33 = vld [vmem:[#allocation2 + $0x398] sm:$0xff] }
 0x134   :  { %2684 = vmatprep.mubr.bf16.mxu0 %v6857_v43  ;;  %2848 = vmatprep.mubr.bf16.mxu1 %v6857_v43  ;;  %v226_v15 = vld [vmem:[#allocation2 + $0x3b8] sm:$0xff] }
 0x135   :  { %2857 = vmatprep.subr.bf16.mxu0 %v5459_v41  ;;  %3021 = vmatprep.subr.bf16.mxu1 %v5461_v42  ;;  %v5517_v41 = vcombine.high %v166_v35, %v170_v36  ;;  %v173_v42 = vld [vmem:[#allocation2 + $0x210] sm:$0xff] }
 0x13e   :  { %5846 = vmatmul.mubr.msk.bf16.vlgmr.msra.gmra.mrb[0].mxu0 %vm2525_vm0, %v6286_v24  ;;  %5847 = vmatmul.mubr.msk.bf16.vlgmr.msra.gmra.mrb[0].mxu1 %vm2525_vm0, %v6286_v24  ;;  %v177_v24 = vld [vmem:[#allocation2 + $0x230] sm:$0xff] }
 0x13f   :  { %2858 = vmatpush1.bf16.msra.mxu0 %v5458_v48  ;;  %3022 = vmatpush1.bf16.msra.mxu1 %v5460_v49  ;;  %v5523_v48 = vcombine.high %v173_v42, %v177_v24  ;;  %v5525_v49 = vcombine.high %v174_v44, %v178_v45  ;;  %v5572_v45 = vcombine.low %v222_v33, %v226_v15 }
 0x140   :  { %2859 = vmatprep.subr.bf16.mxu0 %v5467_v50  ;;  %3023 = vmatprep.subr.bf16.mxu1 %v5469_v55  ;;  %v181_v50 = vld [vmem:[#allocation2 + $0x250] sm:$0xff]  ;;  %v5522_v55 = vcombine.low %v173_v42, %v177_v24  ;;  %v230_v42 = vld [vmem:[#allocation2 + $0x3d8] sm:$0xff] }
 0x141   :  { %2889 = vmatprep.mubr.bf16.mxu0 %v6977_v57  ;;  %3053 = vmatprep.mubr.bf16.mxu1 %v6977_v57  ;;  %v153_v57 = vld [vmem:[#allocation2 + $0x170] sm:$0xff]  ;;  %v234_v24 = vld [vmem:[#allocation2 + $0x3f8] sm:$0xff] }
 0x142   :  { %v5499_v21 = vcombine.high %v149_v14, %v153_v57  ;;  %v5498_v29 = vcombine.low %v149_v14, %v153_v57  ;;  %v209_v14 = vld [vmem:[#allocation2 + $0x330] sm:$0xff]  ;;  %v206_v57 = vld [vmem:[#allocation2 + $0x318] sm:$0xff] }
 0x143   :  { %2860 = vmatpush1.bf16.msra.mxu0 %v5466_v58  ;;  %3024 = vmatpush1.bf16.msra.mxu1 %v5468_v59  ;;  %v5531_v58 = vcombine.high %v181_v50, %v185_v51  ;;  %v5533_v59 = vcombine.high %v182_v52, %v186_v54  ;;  %v5556_v28 = vcombine.low %v206_v57, %v210_v16 }
 0x144   :  { %2861 = vmatprep.subr.bf16.mxu0 %v5475_v60  ;;  %3025 = vmatprep.subr.bf16.mxu1 %v5477_v0  ;;  %v189_v60 = vld [vmem:[#allocation2 + $0x290] sm:$0xff]  ;;  %v5530_v0 = vcombine.low %v181_v50, %v185_v51  ;;  %v238_v50 = vld [vmem:[#allocation2 + $0x418] sm:$0xff]  ;;  %v5580_v54 = vcombine.low %v230_v42, %v234_v24 }
 0x145   :  { %v242_v51 = vld [vmem:[#allocation2 + $0x438] sm:$0xff] }
 0x147   :  { %2862 = vmatpush1.bf16.msra.mxu0 %v5474_v2  ;;  %3026 = vmatpush1.bf16.msra.mxu1 %v5476_v3  ;;  %v5539_v2 = vcombine.high %v189_v60, %v193_v61  ;;  %v5541_v3 = vcombine.high %v190_v62, %v194_v63  ;;  %v5588_v63 = vcombine.low %v238_v50, %v242_v51 }
 0x148   :  { %2863 = vmatprep.subr.bf16.mxu0 %v5483_v4  ;;  %3027 = vmatprep.subr.bf16.mxu1 %v5485_v8  ;;  %v197_v4 = vld [vmem:[#allocation2 + $0x2d0] sm:$0xff]  ;;  %v5538_v8 = vcombine.low %v189_v60, %v193_v61  ;;  %v246_v60 = vld [vmem:[#allocation2 + $0x458] sm:$0xff] }
 0x149   :  { %v250_v61 = vld [vmem:[#allocation2 + $0x478] sm:$0xff] }
 0x14b   :  { %2864 = vmatpush1.bf16.msra.mxu0 %v5482_v10  ;;  %3028 = vmatpush1.bf16.msra.mxu1 %v5484_v11  ;;  %v5547_v10 = vcombine.high %v197_v4, %v201_v5  ;;  %v5549_v11 = vcombine.high %v198_v6, %v202_v7  ;;  %v5596_v7 = vcombine.low %v246_v60, %v250_v61 }
 0x14c   :  { %2865 = vmatprep.subr.bf16.mxu0 %v5491_v13  ;;  %3029 = vmatprep.subr.bf16.mxu1 %v5493_v17  ;;  %v205_v13 = vld [vmem:[#allocation2 + $0x310] sm:$0xff]  ;;  %v5546_v17 = vcombine.low %v197_v4, %v201_v5  ;;  %v254_v4 = vld [vmem:[#allocation2 + $0x498] sm:$0xff] }
 0x14d   :  { %v5554_v27 = vcombine.low %v205_v13, %v209_v14  ;;  %v258_v5 = vld [vmem:[#allocation2 + $0x4b8] sm:$0xff] }
 0x14f   :  { %2866 = vmatpush1.bf16.msra.mxu0 %v5490_v19  ;;  %3030 = vmatpush1.bf16.msra.mxu1 %v5492_v20  ;;  %v5555_v19 = vcombine.high %v205_v13, %v209_v14  ;;  %v5557_v20 = vcombine.high %v206_v57, %v210_v16  ;;  %v262_v13 = vld [vmem:[#allocation2 + $0x4d8] sm:$0xff] }
 0x150   :  { %2867 = vmatprep.subr.bf16.mxu0 %v5499_v21  ;;  %3031 = vmatprep.subr.bf16.mxu1 %v5501_v23  ;;  %v213_v21 = vld [vmem:[#allocation2 + $0x350] sm:$0xff]  ;;  %v214_v23 = vld [vmem:[#allocation2 + $0x358] sm:$0xff] }
 0x151   :  { %v5562_v35 = vcombine.low %v213_v21, %v217_v22  ;;  %v5564_v36 = vcombine.low %v214_v23, %v218_v26  ;;  %v266_v14 = vld [vmem:[#allocation2 + $0x4f8] sm:$0xff] }
 0x153   :  { %2868 = vmatpush1.bf16.msra.mxu0 %v5498_v29  ;;  %3032 = vmatpush1.bf16.msra.mxu1 %v5500_v30  ;;  %v5563_v29 = vcombine.high %v213_v21, %v217_v22  ;;  %v5565_v30 = vcombine.high %v214_v23, %v218_v26  ;;  %v274_v21 = vld [vmem:[#allocation2 + $0x538] sm:$0xff]  ;;  %v5612_v23 = vcombine.low %v262_v13, %v266_v14 }
 0x154   :  { %2869 = vmatprep.subr.bf16.mxu0 %v5507_v31  ;;  %3033 = vmatprep.subr.bf16.mxu1 %v5509_v32  ;;  %v221_v31 = vld [vmem:[#allocation2 + $0x390] sm:$0xff] }
 0x155   :  { %v225_v32 = vld [vmem:[#allocation2 + $0x3b0] sm:$0xff] }
 0x156   :  { %v5570_v44 = vcombine.low %v221_v31, %v225_v32 }
 0x157   :  { %2870 = vmatpush1.bf16.msra.mxu0 %v5506_v37  ;;  %3034 = vmatpush1.bf16.msra.mxu1 %v5508_v39  ;;  %v5571_v37 = vcombine.high %v221_v31, %v225_v32  ;;  %v5573_v39 = vcombine.high %v222_v33, %v226_v15 }
 0x158   :  { %2871 = vmatprep.subr.bf16.mxu0 %v5515_v40  ;;  %3035 = vmatprep.subr.bf16.mxu1 %v5517_v41  ;;  %v229_v40 = vld [vmem:[#allocation2 + $0x3d0] sm:$0xff] }
 0x159   :  { %v233_v41 = vld [vmem:[#allocation2 + $0x3f0] sm:$0xff] }
 0x15a   :  { %v5578_v52 = vcombine.low %v229_v40, %v233_v41 }
 0x15b   :  { %2872 = vmatpush1.bf16.msra.mxu0 %v5514_v46  ;;  %3036 = vmatpush1.bf16.msra.mxu1 %v5516_v47  ;;  %v5579_v46 = vcombine.high %v229_v40, %v233_v41  ;;  %v5581_v47 = vcombine.high %v230_v42, %v234_v24 }
 0x15c   :  { %2873 = vmatprep.subr.bf16.mxu0 %v5523_v48  ;;  %3037 = vmatprep.subr.bf16.mxu1 %v5525_v49  ;;  %v237_v48 = vld [vmem:[#allocation2 + $0x410] sm:$0xff] }
 0x15d   :  { %v241_v49 = vld [vmem:[#allocation2 + $0x430] sm:$0xff] }
 0x15e   :  { %v5586_v62 = vcombine.low %v237_v48, %v241_v49 }
 0x15f   :  { %2874 = vmatpush1.bf16.msra.mxu0 %v5522_v55  ;;  %3038 = vmatpush1.bf16.msra.mxu1 %v5524_v56  ;;  %v5587_v55 = vcombine.high %v237_v48, %v241_v49  ;;  %v5589_v56 = vcombine.high %v238_v50, %v242_v51 }
 0x160   :  { %2875 = vmatprep.subr.bf16.mxu0 %v5531_v58  ;;  %3039 = vmatprep.subr.bf16.mxu1 %v5533_v59  ;;  %v245_v58 = vld [vmem:[#allocation2 + $0x450] sm:$0xff] }
 0x161   :  { %v249_v59 = vld [vmem:[#allocation2 + $0x470] sm:$0xff] }
 0x162   :  { %v5594_v6 = vcombine.low %v245_v58, %v249_v59 }
 0x163   :  { %2876 = vmatpush1.bf16.msra.mxu0 %v5530_v0  ;;  %3040 = vmatpush1.bf16.msra.mxu1 %v5532_v1  ;;  %v5595_v0 = vcombine.high %v245_v58, %v249_v59  ;;  %v5597_v1 = vcombine.high %v246_v60, %v250_v61 }
 0x164   :  { %2877 = vmatprep.subr.bf16.mxu0 %v5539_v2  ;;  %3041 = vmatprep.subr.bf16.mxu1 %v5541_v3  ;;  %v253_v2 = vld [vmem:[#allocation2 + $0x490] sm:$0xff] }
 0x165   :  { %v257_v3 = vld [vmem:[#allocation2 + $0x4b0] sm:$0xff] }
 0x166   :  { %v5602_v57 = vcombine.low %v253_v2, %v257_v3 }
 0x167   :  { %2878 = vmatpush1.bf16.msra.mxu0 %v5538_v8  ;;  %3042 = vmatpush1.bf16.msra.mxu1 %v5540_v9  ;;  %v5603_v8 = vcombine.high %v253_v2, %v257_v3  ;;  %v5605_v9 = vcombine.high %v254_v4, %v258_v5 }
 0x168   :  { %2879 = vmatprep.subr.bf16.mxu0 %v5547_v10  ;;  %3043 = vmatprep.subr.bf16.mxu1 %v5549_v11  ;;  %v261_v10 = vld [vmem:[#allocation2 + $0x4d0] sm:$0xff] }
 0x169   :  { %v265_v11 = vld [vmem:[#allocation2 + $0x4f0] sm:$0xff] }
 0x16a   :  { %v5611_v16 = vcombine.high %v261_v10, %v265_v11  ;;  %v5610_v22 = vcombine.low %v261_v10, %v265_v11 }
 0x16b   :  { %2880 = vmatpush1.bf16.msra.mxu0 %v5546_v17  ;;  %3044 = vmatpush1.bf16.msra.mxu1 %v5548_v18  ;;  %v5613_v17 = vcombine.high %v262_v13, %v266_v14  ;;  %v269_v18 = vld [vmem:[#allocation2 + $0x510] sm:$0xff] }
 0x16c   :  { %2881 = vmatprep.subr.bf16.mxu0 %v5555_v19  ;;  %3045 = vmatprep.subr.bf16.mxu1 %v5557_v20  ;;  %v273_v19 = vld [vmem:[#allocation2 + $0x530] sm:$0xff]  ;;  %v270_v20 = vld [vmem:[#allocation2 + $0x518] sm:$0xff] }
 0x16d   :  { %v5619_v26 = vcombine.high %v269_v18, %v273_v19  ;;  %v5618_v31 = vcombine.low %v269_v18, %v273_v19  ;;  %v5620_v32 = vcombine.low %v270_v20, %v274_v21 }
 0x16f   :  { %2882 = vmatpush1.bf16.msra.mxu0 %v5554_v27  ;;  %3046 = vmatpush1.bf16.msra.mxu1 %v5556_v28  ;;  %v277_v27 = vld [vmem:[#allocation2 + $0x550] sm:$0xff] }
 0x170   :  { %2883 = vmatprep.subr.bf16.mxu0 %v5563_v29  ;;  %3047 = vmatprep.subr.bf16.mxu1 %v5565_v30  ;;  %v281_v28 = vld [vmem:[#allocation2 + $0x570] sm:$0xff]  ;;  %v278_v29 = vld [vmem:[#allocation2 + $0x558] sm:$0xff] }
 0x171   :  { %v282_v30 = vld [vmem:[#allocation2 + $0x578] sm:$0xff]  ;;  %v5627_v33 = vcombine.high %v277_v27, %v281_v28  ;;  %v5626_v40 = vcombine.low %v277_v27, %v281_v28 }
 0x172   :  { %v5629_v15 = vcombine.high %v278_v29, %v282_v30  ;;  %v5628_v41 = vcombine.low %v278_v29, %v282_v30 }
 0x173   :  { %2884 = vmatpush1.bf16.msra.mxu0 %v5562_v35  ;;  %3048 = vmatpush1.bf16.msra.mxu1 %v5564_v36  ;;  %v285_v35 = vld [vmem:[#allocation2 + $0x590] sm:$0xff] }
 0x174   :  { %2885 = vmatprep.subr.bf16.mxu0 %v5571_v37  ;;  %3049 = vmatprep.subr.bf16.mxu1 %v5573_v39  ;;  %v289_v36 = vld [vmem:[#allocation2 + $0x5b0] sm:$0xff]  ;;  %v286_v37 = vld [vmem:[#allocation2 + $0x598] sm:$0xff] }
 0x175   :  { %v290_v39 = vld [vmem:[#allocation2 + $0x5b8] sm:$0xff]  ;;  %v5635_v42 = vcombine.high %v285_v35, %v289_v36  ;;  %v5634_v48 = vcombine.low %v285_v35, %v289_v36 }
 0x176   :  { %v5637_v24 = vcombine.high %v286_v37, %v290_v39  ;;  %v5636_v49 = vcombine.low %v286_v37, %v290_v39 }
 0x177   :  { %2886 = vmatpush1.bf16.msra.mxu0 %v5570_v44  ;;  %3050 = vmatpush1.bf16.msra.mxu1 %v5572_v45  ;;  %v293_v44 = vld [vmem:[#allocation2 + $0x5d0] sm:$0xff] }
 0x178   :  { %2887 = vmatprep.subr.bf16.mxu0 %v5579_v46  ;;  %3051 = vmatprep.subr.bf16.mxu1 %v5581_v47  ;;  %v297_v45 = vld [vmem:[#allocation2 + $0x5f0] sm:$0xff]  ;;  %v294_v46 = vld [vmem:[#allocation2 + $0x5d8] sm:$0xff] }
 0x179   :  { %v298_v47 = vld [vmem:[#allocation2 + $0x5f8] sm:$0xff]  ;;  %v5643_v50 = vcombine.high %v293_v44, %v297_v45  ;;  %v5642_v58 = vcombine.low %v293_v44, %v297_v45 }
 0x17a   :  { %v5645_v51 = vcombine.high %v294_v46, %v298_v47  ;;  %v5644_v59 = vcombine.low %v294_v46, %v298_v47 }
 0x17b   :  { %2888 = vmatpush1.bf16.msra.mxu0 %v5578_v52  ;;  %3052 = vmatpush1.bf16.msra.mxu1 %v5580_v54  ;;  %v301_v52 = vld [vmem:[#allocation2 + $0x610] sm:$0xff] }
 0x17c   :  { %2898 = vmatprep.subr.bf16.mxu0 %v5587_v55  ;;  %3062 = vmatprep.subr.bf16.mxu1 %v5589_v56  ;;  %v305_v54 = vld [vmem:[#allocation2 + $0x630] sm:$0xff]  ;;  %v302_v55 = vld [vmem:[#allocation2 + $0x618] sm:$0xff] }
 0x17d   :  { %v306_v56 = vld [vmem:[#allocation2 + $0x638] sm:$0xff]  ;;  %v5651_v60 = vcombine.high %v301_v52, %v305_v54  ;;  %v5650_v2 = vcombine.low %v301_v52, %v305_v54 }
 0x17e   :  { %2890 = vmatmul.mubr.bf16.vlgmr.msra.gmra.mrb[4].mxu0 %v6983_v12  ;;  %3054 = vmatmul.mubr.bf16.vlgmr.msra.gmra.mrb[4].mxu1 %v6983_v12  ;;  %v5604_v12 = vcombine.low %v254_v4, %v258_v5  ;;  %v5653_v61 = vcombine.high %v302_v55, %v306_v56  ;;  %v5652_v3 = vcombine.low %v302_v55, %v306_v56 }
 0x17f   :  { %2899 = vmatpush1.bf16.msra.mxu0 %v5586_v62  ;;  %3063 = vmatpush1.bf16.msra.mxu1 %v5588_v63  ;;  %v309_v62 = vld [vmem:[#allocation2 + $0x650] sm:$0xff] }
 0x180   :  { %2900 = vmatprep.subr.bf16.mxu0 %v5595_v0  ;;  %3064 = vmatprep.subr.bf16.mxu1 %v5597_v1  ;;  %v313_v63 = vld [vmem:[#allocation2 + $0x670] sm:$0xff]  ;;  %v310_v0 = vld [vmem:[#allocation2 + $0x658] sm:$0xff] }
 0x181   :  { %2930 = vmatprep.mubr.bf16.mxu0 %v6992_v53  ;;  %3094 = vmatprep.mubr.bf16.mxu1 %v6992_v53  ;;  %v5621_v53 = vcombine.high %v270_v20, %v274_v21  ;;  %v314_v1 = vld [vmem:[#allocation2 + $0x678] sm:$0xff]  ;;  %v5659_v4 = vcombine.high %v309_v62, %v313_v63  ;;  %v5658_v10 = vcombine.low %v309_v62, %v313_v63 }
 0x182   :  { %v5661_v5 = vcombine.high %v310_v0, %v314_v1  ;;  %v5660_v11 = vcombine.low %v310_v0, %v314_v1 }
 0x183   :  { %2901 = vmatpush1.bf16.msra.mxu0 %v5594_v6  ;;  %3065 = vmatpush1.bf16.msra.mxu1 %v5596_v7  ;;  %v317_v6 = vld [vmem:[#allocation2 + $0x690] sm:$0xff] }
 0x184   :  { %2902 = vmatprep.subr.bf16.mxu0 %v5603_v8  ;;  %3066 = vmatprep.subr.bf16.mxu1 %v5605_v9  ;;  %v321_v7 = vld [vmem:[#allocation2 + $0x6b0] sm:$0xff]  ;;  %v318_v8 = vld [vmem:[#allocation2 + $0x698] sm:$0xff] }
 0x185   :  { %v322_v9 = vld [vmem:[#allocation2 + $0x6b8] sm:$0xff]  ;;  %v5667_v13 = vcombine.high %v317_v6, %v321_v7  ;;  %v5666_v18 = vcombine.low %v317_v6, %v321_v7 }
 0x186   :  { %v5669_v14 = vcombine.high %v318_v8, %v322_v9  ;;  %v5668_v19 = vcombine.low %v318_v8, %v322_v9 }
 0x187   :  { %2903 = vmatpush1.bf16.msra.mxu0 %v5602_v57  ;;  %3067 = vmatpush1.bf16.msra.mxu1 %v5604_v12  ;;  %v325_v57 = vld [vmem:[#allocation2 + $0x6d0] sm:$0xff] }
 0x188   :  { %2904 = vmatprep.subr.bf16.mxu0 %v5611_v16  ;;  %3068 = vmatprep.subr.bf16.mxu1 %v5613_v17  ;;  %v329_v12 = vld [vmem:[#allocation2 + $0x6f0] sm:$0xff]  ;;  %v326_v16 = vld [vmem:[#allocation2 + $0x6d8] sm:$0xff] }
 0x189   :  { %v330_v17 = vld [vmem:[#allocation2 + $0x6f8] sm:$0xff]  ;;  %v5675_v20 = vcombine.high %v325_v57, %v329_v12  ;;  %v5674_v27 = vcombine.low %v325_v57, %v329_v12 }
 0x18a   :  { %v5677_v21 = vcombine.high %v326_v16, %v330_v17  ;;  %v5676_v28 = vcombine.low %v326_v16, %v330_v17 }
 0x18b   :  { %2905 = vmatpush1.bf16.msra.mxu0 %v5610_v22  ;;  %3069 = vmatpush1.bf16.msra.mxu1 %v5612_v23  ;;  %v333_v22 = vld [vmem:[#allocation2 + $0x710] sm:$0xff] }
 0x18c   :  { %2906 = vmatprep.subr.bf16.mxu0 %v5619_v26  ;;  %3070 = vmatprep.subr.bf16.mxu1 %v5621_v53  ;;  %v337_v23 = vld [vmem:[#allocation2 + $0x730] sm:$0xff]  ;;  %v334_v26 = vld [vmem:[#allocation2 + $0x718] sm:$0xff] }
 0x18d   :  { %v338_v53 = vld [vmem:[#allocation2 + $0x738] sm:$0xff]  ;;  %v5683_v29 = vcombine.high %v333_v22, %v337_v23  ;;  %v5682_v35 = vcombine.low %v333_v22, %v337_v23 }
 0x18e   :  { %v5685_v30 = vcombine.high %v334_v26, %v338_v53  ;;  %v5684_v36 = vcombine.low %v334_v26, %v338_v53  ;;  %v397_v53 = vld [vmem:[#allocation2 + $0x910] sm:$0xff] }
 0x18f   :  { %2907 = vmatpush1.bf16.msra.mxu0 %v5618_v31  ;;  %3071 = vmatpush1.bf16.msra.mxu1 %v5620_v32  ;;  %v341_v31 = vld [vmem:[#allocation2 + $0x750] sm:$0xff] }
 0x190   :  { %2908 = vmatprep.subr.bf16.mxu0 %v5627_v33  ;;  %3072 = vmatprep.subr.bf16.mxu1 %v5629_v15  ;;  %v345_v32 = vld [vmem:[#allocation2 + $0x770] sm:$0xff]  ;;  %v342_v33 = vld [vmem:[#allocation2 + $0x758] sm:$0xff] }
 0x191   :  { %v346_v15 = vld [vmem:[#allocation2 + $0x778] sm:$0xff]  ;;  %v5691_v37 = vcombine.high %v341_v31, %v345_v32  ;;  %v5690_v44 = vcombine.low %v341_v31, %v345_v32 }
 0x192   :  { %v5693_v39 = vcombine.high %v342_v33, %v346_v15  ;;  %v5692_v45 = vcombine.low %v342_v33, %v346_v15  ;;  %v405_v33 = vld [vmem:[#allocation2 + $0x950] sm:$0xff] }
 0x193   :  { %2909 = vmatpush1.bf16.msra.mxu0 %v5626_v40  ;;  %3073 = vmatpush1.bf16.msra.mxu1 %v5628_v41  ;;  %v349_v40 = vld [vmem:[#allocation2 + $0x790] sm:$0xff] }
 0x194   :  { %2910 = vmatprep.subr.bf16.mxu0 %v5635_v42  ;;  %3074 = vmatprep.subr.bf16.mxu1 %v5637_v24  ;;  %v353_v41 = vld [vmem:[#allocation2 + $0x7b0] sm:$0xff]  ;;  %v350_v42 = vld [vmem:[#allocation2 + $0x798] sm:$0xff] }
 0x195   :  { %v354_v24 = vld [vmem:[#allocation2 + $0x7b8] sm:$0xff]  ;;  %v5699_v46 = vcombine.high %v349_v40, %v353_v41  ;;  %v5698_v52 = vcombine.low %v349_v40, %v353_v41  ;;  %v409_v15 = vld [vmem:[#allocation2 + $0x970] sm:$0xff] }
 0x196   :  { %v5701_v47 = vcombine.high %v350_v42, %v354_v24  ;;  %v5700_v54 = vcombine.low %v350_v42, %v354_v24  ;;  %v5755_v40 = vcombine.high %v405_v33, %v409_v15  ;;  %v413_v42 = vld [vmem:[#allocation2 + $0x990] sm:$0xff] }
 0x197   :  { %2911 = vmatpush1.bf16.msra.mxu0 %v5634_v48  ;;  %3075 = vmatpush1.bf16.msra.mxu1 %v5636_v49  ;;  %v357_v48 = vld [vmem:[#allocation2 + $0x7d0] sm:$0xff] }
 0x198   :  { %2912 = vmatprep.subr.bf16.mxu0 %v5643_v50  ;;  %3076 = vmatprep.subr.bf16.mxu1 %v5645_v51  ;;  %v361_v49 = vld [vmem:[#allocation2 + $0x7f0] sm:$0xff]  ;;  %v358_v50 = vld [vmem:[#allocation2 + $0x7d8] sm:$0xff] }
 0x199   :  { %v362_v51 = vld [vmem:[#allocation2 + $0x7f8] sm:$0xff]  ;;  %v5707_v55 = vcombine.high %v357_v48, %v361_v49  ;;  %v5706_v62 = vcombine.low %v357_v48, %v361_v49  ;;  %v417_v24 = vld [vmem:[#allocation2 + $0x9b0] sm:$0xff] }
 0x19a   :  { %v5709_v56 = vcombine.high %v358_v50, %v362_v51  ;;  %v5708_v63 = vcombine.low %v358_v50, %v362_v51  ;;  %v5763_v48 = vcombine.high %v413_v42, %v417_v24  ;;  %v421_v50 = vld [vmem:[#allocation2 + $0x9d0] sm:$0xff] }
 0x19b   :  { %2913 = vmatpush1.bf16.msra.mxu0 %v5642_v58  ;;  %3077 = vmatpush1.bf16.msra.mxu1 %v5644_v59  ;;  %v365_v58 = vld [vmem:[#allocation2 + $0x810] sm:$0xff] }
 0x19c   :  { %2914 = vmatprep.subr.bf16.mxu0 %v5651_v60  ;;  %3078 = vmatprep.subr.bf16.mxu1 %v5653_v61  ;;  %v369_v59 = vld [vmem:[#allocation2 + $0x830] sm:$0xff]  ;;  %v366_v60 = vld [vmem:[#allocation2 + $0x818] sm:$0xff] }
 0x19d   :  { %v370_v61 = vld [vmem:[#allocation2 + $0x838] sm:$0xff]  ;;  %v5715_v0 = vcombine.high %v365_v58, %v369_v59  ;;  %v5714_v6 = vcombine.low %v365_v58, %v369_v59  ;;  %v425_v51 = vld [vmem:[#allocation2 + $0x9f0] sm:$0xff] }
 0x19e   :  { %v5717_v1 = vcombine.high %v366_v60, %v370_v61  ;;  %v5716_v7 = vcombine.low %v366_v60, %v370_v61  ;;  %v5771_v58 = vcombine.high %v421_v50, %v425_v51  ;;  %v429_v60 = vld [vmem:[#allocation2 + $0xa10] sm:$0xff] }
 0x19f   :  { %2915 = vmatpush1.bf16.msra.mxu0 %v5650_v2  ;;  %3079 = vmatpush1.bf16.msra.mxu1 %v5652_v3  ;;  %v373_v2 = vld [vmem:[#allocation2 + $0x850] sm:$0xff] }
 0x1a0   :  { %2916 = vmatprep.subr.bf16.mxu0 %v5659_v4  ;;  %3080 = vmatprep.subr.bf16.mxu1 %v5661_v5  ;;  %v377_v3 = vld [vmem:[#allocation2 + $0x870] sm:$0xff]  ;;  %v374_v4 = vld [vmem:[#allocation2 + $0x858] sm:$0xff] }
 0x1a1   :  { %v378_v5 = vld [vmem:[#allocation2 + $0x878] sm:$0xff]  ;;  %v5723_v8 = vcombine.high %v373_v2, %v377_v3  ;;  %v5722_v57 = vcombine.low %v373_v2, %v377_v3  ;;  %v433_v61 = vld [vmem:[#allocation2 + $0xa30] sm:$0xff] }
 0x1a2   :  { %v5725_v9 = vcombine.high %v374_v4, %v378_v5  ;;  %v5724_v12 = vcombine.low %v374_v4, %v378_v5  ;;  %v5779_v2 = vcombine.high %v429_v60, %v433_v61  ;;  %v437_v4 = vld [vmem:[#allocation2 + $0xa50] sm:$0xff] }
 0x1a3   :  { %2917 = vmatpush1.bf16.msra.mxu0 %v5658_v10  ;;  %3081 = vmatpush1.bf16.msra.mxu1 %v5660_v11  ;;  %v381_v10 = vld [vmem:[#allocation2 + $0x890] sm:$0xff] }
 0x1a4   :  { %2918 = vmatprep.subr.bf16.mxu0 %v5667_v13  ;;  %3082 = vmatprep.subr.bf16.mxu1 %v5669_v14  ;;  %v385_v11 = vld [vmem:[#allocation2 + $0x8b0] sm:$0xff]  ;;  %v382_v13 = vld [vmem:[#allocation2 + $0x898] sm:$0xff] }
 0x1a5   :  { %v386_v14 = vld [vmem:[#allocation2 + $0x8b8] sm:$0xff]  ;;  %v5731_v16 = vcombine.high %v381_v10, %v385_v11  ;;  %v5730_v22 = vcombine.low %v381_v10, %v385_v11  ;;  %v441_v5 = vld [vmem:[#allocation2 + $0xa70] sm:$0xff] }
 0x1a6   :  { %v5733_v17 = vcombine.high %v382_v13, %v386_v14  ;;  %v5787_v10 = vcombine.high %v437_v4, %v441_v5 }
 0x1a7   :  { %2919 = vmatpush1.bf16.msra.mxu0 %v5666_v18  ;;  %3083 = vmatpush1.bf16.msra.mxu1 %v5668_v19  ;;  %v389_v18 = vld [vmem:[#allocation2 + $0x8d0] sm:$0xff] }
 0x1a8   :  { %2920 = vmatprep.subr.bf16.mxu0 %v5675_v20  ;;  %3084 = vmatprep.subr.bf16.mxu1 %v5677_v21  ;;  %v393_v19 = vld [vmem:[#allocation2 + $0x8f0] sm:$0xff]  ;;  %v390_v20 = vld [vmem:[#allocation2 + $0x8d8] sm:$0xff] }
 0x1a9   :  { %v394_v21 = vld [vmem:[#allocation2 + $0x8f8] sm:$0xff]  ;;  %v5739_v23 = vcombine.high %v389_v18, %v393_v19 }
 0x1aa   :  { %v5741_v26 = vcombine.high %v390_v20, %v394_v21  ;;  %v5740_v31 = vcombine.low %v390_v20, %v394_v21  ;;  %v453_v20 = vld [vmem:[#allocation2 + $0xad0] sm:$0xff] }
 0x1ab   :  { %2921 = vmatpush1.bf16.msra.mxu0 %v5674_v27  ;;  %3085 = vmatpush1.bf16.msra.mxu1 %v5676_v28  ;;  %v401_v27 = vld [vmem:[#allocation2 + $0x930] sm:$0xff]  ;;  %v398_v28 = vld [vmem:[#allocation2 + $0x918] sm:$0xff] }
 0x1ac   :  { %2922 = vmatprep.subr.bf16.mxu0 %v5683_v29  ;;  %3086 = vmatprep.subr.bf16.mxu1 %v5685_v30  ;;  %v402_v29 = vld [vmem:[#allocation2 + $0x938] sm:$0xff]  ;;  %v5738_v30 = vcombine.low %v389_v18, %v393_v19  ;;  %v5747_v32 = vcombine.high %v397_v53, %v401_v27  ;;  %v457_v21 = vld [vmem:[#allocation2 + $0xaf0] sm:$0xff] }
 0x1af   :  { %2923 = vmatpush1.bf16.msra.mxu0 %v5682_v35  ;;  %3087 = vmatpush1.bf16.msra.mxu1 %v5684_v36  ;;  %v406_v35 = vld [vmem:[#allocation2 + $0x958] sm:$0xff] }
 0x1b0   :  { %2924 = vmatprep.subr.bf16.mxu0 %v5691_v37  ;;  %3088 = vmatprep.subr.bf16.mxu1 %v5693_v39  ;;  %v410_v36 = vld [vmem:[#allocation2 + $0x978] sm:$0xff]  ;;  %v5746_v37 = vcombine.low %v397_v53, %v401_v27  ;;  %v5748_v39 = vcombine.low %v398_v28, %v402_v29  ;;  %v5803_v53 = vcombine.high %v453_v20, %v457_v21 }
 0x1b1   :  { %v5757_v41 = vcombine.high %v406_v35, %v410_v36 }
 0x1b3   :  { %2925 = vmatpush1.bf16.msra.mxu0 %v5690_v44  ;;  %3089 = vmatpush1.bf16.msra.mxu1 %v5692_v45  ;;  %v414_v44 = vld [vmem:[#allocation2 + $0x998] sm:$0xff] }
 0x1b4   :  { %2926 = vmatprep.subr.bf16.mxu0 %v5699_v46  ;;  %3090 = vmatprep.subr.bf16.mxu1 %v5701_v47  ;;  %v418_v45 = vld [vmem:[#allocation2 + $0x9b8] sm:$0xff]  ;;  %v5754_v46 = vcombine.low %v405_v33, %v409_v15  ;;  %v5756_v47 = vcombine.low %v406_v35, %v410_v36  ;;  %v469_v35 = vld [vmem:[#allocation2 + $0xb50] sm:$0xff] }
 0x1b5   :  { %v5765_v49 = vcombine.high %v414_v44, %v418_v45  ;;  %v473_v36 = vld [vmem:[#allocation2 + $0xb70] sm:$0xff] }
 0x1b7   :  { %2927 = vmatpush1.bf16.msra.mxu0 %v5698_v52  ;;  %3091 = vmatpush1.bf16.msra.mxu1 %v5700_v54  ;;  %v422_v52 = vld [vmem:[#allocation2 + $0x9d8] sm:$0xff] }
 0x1b8   :  { %2928 = vmatprep.subr.bf16.mxu0 %v5707_v55  ;;  %3092 = vmatprep.subr.bf16.mxu1 %v5709_v56  ;;  %v426_v54 = vld [vmem:[#allocation2 + $0x9f8] sm:$0xff]  ;;  %v5762_v55 = vcombine.low %v413_v42, %v417_v24  ;;  %v5764_v56 = vcombine.low %v414_v44, %v418_v45  ;;  %v5819_v42 = vcombine.high %v469_v35, %v473_v36  ;;  %v477_v44 = vld [vmem:[#allocation2 + $0xb90] sm:$0xff] }
 0x1b9   :  { %v5773_v59 = vcombine.high %v422_v52, %v426_v54  ;;  %v481_v45 = vld [vmem:[#allocation2 + $0xbb0] sm:$0xff] }
 0x1bb   :  { %2929 = vmatpush1.bf16.msra.mxu0 %v5706_v62  ;;  %3093 = vmatpush1.bf16.msra.mxu1 %v5708_v63  ;;  %v430_v62 = vld [vmem:[#allocation2 + $0xa18] sm:$0xff] }
 0x1bc   :  { %2939 = vmatprep.subr.bf16.mxu0 %v5715_v0  ;;  %3103 = vmatprep.subr.bf16.mxu1 %v5717_v1  ;;  %v434_v63 = vld [vmem:[#allocation2 + $0xa38] sm:$0xff]  ;;  %v5770_v0 = vcombine.low %v421_v50, %v425_v51  ;;  %v5772_v1 = vcombine.low %v422_v52, %v426_v54  ;;  %v5827_v50 = vcombine.high %v477_v44, %v481_v45  ;;  %v485_v52 = vld [vmem:[#allocation2 + $0xbd0] sm:$0xff] }
 0x1bd   :  { %v5781_v3 = vcombine.high %v430_v62, %v434_v63  ;;  %v489_v54 = vld [vmem:[#allocation2 + $0xbf0] sm:$0xff] }
 0x1be   :  { %2931 = vmatmul.mubr.bf16.vlgmr.msra.gmra.mrb[4].mxu0 %v7005_v25  ;;  %3095 = vmatmul.mubr.bf16.vlgmr.msra.gmra.mrb[4].mxu1 %v7005_v25  ;;  %v5732_v25 = vcombine.low %v382_v13, %v386_v14  ;;  %v445_v13 = vld [vmem:[#allocation2 + $0xa90] sm:$0xff] }
 0x1bf   :  { %2940 = vmatpush1.bf16.msra.mxu0 %v5714_v6  ;;  %3104 = vmatpush1.bf16.msra.mxu1 %v5716_v7  ;;  %v438_v6 = vld [vmem:[#allocation2 + $0xa58] sm:$0xff]  ;;  %v449_v14 = vld [vmem:[#allocation2 + $0xab0] sm:$0xff] }
 0x1c0   :  { %2941 = vmatprep.subr.bf16.mxu0 %v5723_v8  ;;  %3105 = vmatprep.subr.bf16.mxu1 %v5725_v9  ;;  %v442_v7 = vld [vmem:[#allocation2 + $0xa78] sm:$0xff]  ;;  %v5778_v8 = vcombine.low %v429_v60, %v433_v61  ;;  %v5780_v9 = vcombine.low %v430_v62, %v434_v63  ;;  %v5795_v18 = vcombine.high %v445_v13, %v449_v14  ;;  %v493_v62 = vld [vmem:[#allocation2 + $0xc10] sm:$0xff] }
 0x1c1   :  { %2971 = vmatprep.mubr.bf16.mxu0 %v7009_v34  ;;  %3135 = vmatprep.mubr.bf16.mxu1 %v7009_v34  ;;  %v5749_v34 = vcombine.high %v398_v28, %v402_v29  ;;  %v5789_v11 = vcombine.high %v438_v6, %v442_v7  ;;  %v461_v28 = vld [vmem:[#allocation2 + $0xb10] sm:$0xff]  ;;  %v5835_v60 = vcombine.high %v485_v52, %v489_v54 }
 0x1c2   :  { %v465_v29 = vld [vmem:[#allocation2 + $0xb30] sm:$0xff] }
 0x1c3   :  { %2942 = vmatpush1.bf16.msra.mxu0 %v5722_v57  ;;  %3106 = vmatpush1.bf16.msra.mxu1 %v5724_v12  ;;  %v446_v57 = vld [vmem:[#allocation2 + $0xa98] sm:$0xff]  ;;  %v5811_v33 = vcombine.high %v461_v28, %v465_v29  ;;  %v497_v63 = vld [vmem:[#allocation2 + $0xc30] sm:$0xff] }
 0x1c4   :  { %2943 = vmatprep.subr.bf16.mxu0 %v5731_v16  ;;  %3107 = vmatprep.subr.bf16.mxu1 %v5733_v17  ;;  %v450_v12 = vld [vmem:[#allocation2 + $0xab8] sm:$0xff]  ;;  %v5786_v16 = vcombine.low %v437_v4, %v441_v5  ;;  %v5788_v17 = vcombine.low %v438_v6, %v442_v7  ;;  %v5843_v4 = vcombine.high %v493_v62, %v497_v63 }
 0x1c5   :  { %v5797_v19 = vcombine.high %v446_v57, %v450_v12  ;;  %v5842_v6 = vcombine.low %v493_v62, %v497_v63  ;;  %v6346_v62 = vld [vmem:[#allocation6 + $0x12c] ss:$16 sps:$4 sm:$0xff]   ;;  %v6341_v63 = vld [vmem:[#allocation6 + $0x120] ss:$16 sps:$4 sm:$0xff]  }
 0x1c7   :  { %2944 = vmatpush1.bf16.msra.mxu0 %v5730_v22  ;;  %3108 = vmatpush1.bf16.msra.mxu1 %v5732_v25  ;;  %v454_v22 = vld [vmem:[#allocation2 + $0xad8] sm:$0xff] }
 0x1c8   :  { %2945 = vmatprep.subr.bf16.mxu0 %v5739_v23  ;;  %3109 = vmatprep.subr.bf16.mxu1 %v5741_v26  ;;  %v458_v25 = vld [vmem:[#allocation2 + $0xaf8] sm:$0xff]  ;;  %v5794_v23 = vcombine.low %v445_v13, %v449_v14  ;;  %v5796_v26 = vcombine.low %v446_v57, %v450_v12  ;;  %v6290_v14 = vld [vmem:[#allocation6 + $0x8] ss:$16 sps:$4 sm:$0xff]   ;;  %v6298_v12 = vld [vmem:[#allocation6 + $0x2c] ss:$16 sps:$4 sm:$0xff]  }
 0x1c9   :  { %v5805_v27 = vcombine.high %v454_v22, %v458_v25  ;;  %v6295_v57 = vld [vmem:[#allocation6 + $0x24] ss:$16 sps:$4 sm:$0xff]  }
 0x1cb   :  { %2946 = vmatpush1.bf16.msra.mxu0 %v5738_v30  ;;  %3110 = vmatpush1.bf16.msra.mxu1 %v5740_v31  ;;  %v462_v30 = vld [vmem:[#allocation2 + $0xb18] sm:$0xff] }
 0x1cc   :  { %2947 = vmatprep.subr.bf16.mxu0 %v5747_v32  ;;  %3111 = vmatprep.subr.bf16.mxu1 %v5749_v34  ;;  %v466_v31 = vld [vmem:[#allocation2 + $0xb38] sm:$0xff]  ;;  %v5802_v32 = vcombine.low %v453_v20, %v457_v21  ;;  %v5804_v34 = vcombine.low %v454_v22, %v458_v25  ;;  %v6304_v20 = vld [vmem:[#allocation6 + $0x4c] ss:$16 sps:$4 sm:$0xff]   ;;  %v6302_v25 = vld [vmem:[#allocation6 + $0x48] ss:$16 sps:$4 sm:$0xff]  }
 0x1cd   :  { %v5813_v15 = vcombine.high %v462_v30, %v466_v31  ;;  %v6299_v21 = vld [vmem:[#allocation6 + $0x40] ss:$16 sps:$4 sm:$0xff]  }
 0x1cf   :  { %2948 = vmatpush1.bf16.msra.mxu0 %v5746_v37  ;;  %3112 = vmatpush1.bf16.msra.mxu1 %v5748_v39  ;;  %v470_v37 = vld [vmem:[#allocation2 + $0xb58] sm:$0xff] }
 0x1d0   :  { %2949 = vmatprep.subr.bf16.mxu0 %v5755_v40  ;;  %3113 = vmatprep.subr.bf16.mxu1 %v5757_v41  ;;  %v474_v39 = vld [vmem:[#allocation2 + $0xb78] sm:$0xff]  ;;  %v5810_v40 = vcombine.low %v461_v28, %v465_v29  ;;  %v5812_v41 = vcombine.low %v462_v30, %v466_v31 }
 0x1d1   :  { %v5821_v24 = vcombine.high %v470_v37, %v474_v39 }
 0x1d3   :  { %2950 = vmatpush1.bf16.msra.mxu0 %v5754_v46  ;;  %3114 = vmatpush1.bf16.msra.mxu1 %v5756_v47  ;;  %v478_v46 = vld [vmem:[#allocation2 + $0xb98] sm:$0xff] }
 0x1d4   :  { %2951 = vmatprep.subr.bf16.mxu0 %v5763_v48  ;;  %3115 = vmatprep.subr.bf16.mxu1 %v5765_v49  ;;  %v482_v47 = vld [vmem:[#allocation2 + $0xbb8] sm:$0xff]  ;;  %v5818_v48 = vcombine.low %v469_v35, %v473_v36  ;;  %v5820_v49 = vcombine.low %v470_v37, %v474_v39  ;;  %v6316_v39 = vld [vmem:[#allocation6 + $0x8c] ss:$16 sps:$4 sm:$0xff]  }
 0x1d5   :  { %v5829_v51 = vcombine.high %v478_v46, %v482_v47  ;;  %v6313_v35 = vld [vmem:[#allocation6 + $0x84] ss:$16 sps:$4 sm:$0xff]  }
 0x1d7   :  { %2952 = vmatpush1.bf16.msra.mxu0 %v5762_v55  ;;  %3116 = vmatpush1.bf16.msra.mxu1 %v5764_v56  ;;  %v486_v55 = vld [vmem:[#allocation2 + $0xbd8] sm:$0xff] }
 0x1d8   :  { %2953 = vmatprep.subr.bf16.mxu0 %v5771_v58  ;;  %3117 = vmatprep.subr.bf16.mxu1 %v5773_v59  ;;  %v490_v56 = vld [vmem:[#allocation2 + $0xbf8] sm:$0xff]  ;;  %v5826_v58 = vcombine.low %v477_v44, %v481_v45  ;;  %v5828_v59 = vcombine.low %v478_v46, %v482_v47  ;;  %v6322_v44 = vld [vmem:[#allocation6 + $0xac] ss:$16 sps:$4 sm:$0xff]   ;;  %v6320_v46 = vld [vmem:[#allocation6 + $0xa8] ss:$16 sps:$4 sm:$0xff]  }
 0x1d9   :  { %v5837_v61 = vcombine.high %v486_v55, %v490_v56  ;;  %v6317_v45 = vld [vmem:[#allocation6 + $0xa0] ss:$16 sps:$4 sm:$0xff]   ;;  %v6325_v47 = vld [vmem:[#allocation6 + $0xc4] ss:$16 sps:$4 sm:$0xff]  }
 0x1db   :  { %2954 = vmatpush1.bf16.msra.mxu0 %v5770_v0  ;;  %3118 = vmatpush1.bf16.msra.mxu1 %v5772_v1  ;;  %v494_v0 = vld [vmem:[#allocation2 + $0xc18] sm:$0xff] }
 0x1dc   :  { %2955 = vmatprep.subr.bf16.mxu0 %v5779_v2  ;;  %3119 = vmatprep.subr.bf16.mxu1 %v5781_v3  ;;  %v498_v1 = vld [vmem:[#allocation2 + $0xc38] sm:$0xff]  ;;  %v5834_v2 = vcombine.low %v485_v52, %v489_v54  ;;  %v5836_v3 = vcombine.low %v486_v55, %v490_v56  ;;  %v6334_v52 = vld [vmem:[#allocation6 + $0xec] ss:$16 sps:$4 sm:$0xff]   ;;  %v6332_v55 = vld [vmem:[#allocation6 + $0xe8] ss:$16 sps:$4 sm:$0xff]  }
 0x1dd   :  { %v5845_v5 = vcombine.high %v494_v0, %v498_v1  ;;  %v5844_v7 = vcombine.low %v494_v0, %v498_v1  ;;  %v6329_v54 = vld [vmem:[#allocation6 + $0xe0] ss:$16 sps:$4 sm:$0xff]   ;;  %v6337_v56 = vld [vmem:[#allocation6 + $0x104] ss:$16 sps:$4 sm:$0xff]   ;;  %v6344_v0 = vld [vmem:[#allocation6 + $0x128] ss:$16 sps:$4 sm:$0xff]  }
 0x1de   :  { %v6349_v1 = vld [vmem:[#allocation6 + $0x144] ss:$16 sps:$4 sm:$0xff]  }
 0x1df   :  { %2956 = vmatpush1.bf16.msra.mxu0 %v5778_v8  ;;  %3120 = vmatpush1.bf16.msra.mxu1 %v5780_v9  ;;  %v6289_v8 = vld [vmem:[#allocation6 + $0x4] ss:$16 sps:$4 sm:$0xff]   ;;  %v6292_v9 = vld [vmem:[#allocation6 + $0xc] ss:$16 sps:$4 sm:$0xff]  }
 0x1e0   :  { %2957 = vmatprep.subr.bf16.mxu0 %v5787_v10  ;;  %3121 = vmatprep.subr.bf16.mxu1 %v5789_v11  ;;  %v501_v10 = vlaneseq  ;;  %v6287_v11 = vld [vmem:[#allocation6] ss:$16 sps:$4 sm:$0xff]  }
 0x1e2   :  { %v7042_v13 = vshrl.u32 %v501_v10, 7  ;;  %v6364_v10 = vld [vmem:[#allocation6 + $0x18c] ss:$16 sps:$4 sm:$0xff]  }
 0x1e3   :  { %2958 = vmatpush1.bf16.msra.mxu0 %v5786_v16  ;;  %3122 = vmatpush1.bf16.msra.mxu1 %v5788_v17  ;;  %v6703_v16 = vld [vmem:[%s7097_s0 + $0x18] ss:$0 sps:$4 sm:$0xff]   ;;  %v6296_v17 = vld [vmem:[#allocation6 + $0x28] ss:$16 sps:$4 sm:$0xff]  }
 0x1e4   :  { %2959 = vmatprep.subr.bf16.mxu0 %v5795_v18  ;;  %3123 = vmatprep.subr.bf16.mxu1 %v5797_v19  ;;  %v6301_v18 = vld [vmem:[#allocation6 + $0x44] ss:$16 sps:$4 sm:$0xff]   ;;  %v7050_v19 = vld [vmem:[#allocation4] sm:$0xff] }
 0x1e7   :  { %2960 = vmatpush1.bf16.msra.mxu0 %v5794_v23  ;;  %3124 = vmatpush1.bf16.msra.mxu1 %v5796_v26  ;;  %v6307_v23 = vld [vmem:[#allocation6 + $0x64] ss:$16 sps:$4 sm:$0xff]  }
 0x1e8   :  { %2961 = vmatprep.subr.bf16.mxu0 %v5803_v53  ;;  %3125 = vmatprep.subr.bf16.mxu1 %v5805_v27  ;;  %v6310_v53 = vld [vmem:[#allocation6 + $0x6c] ss:$16 sps:$4 sm:$0xff]  }
 0x1eb   :  { %2962 = vmatpush1.bf16.msra.mxu0 %v5802_v32  ;;  %3126 = vmatpush1.bf16.msra.mxu1 %v5804_v34  ;;  %v6305_v32 = vld [vmem:[#allocation6 + $0x60] ss:$16 sps:$4 sm:$0xff]  }
 0x1ec   :  { %2963 = vmatprep.subr.bf16.mxu0 %v5811_v33  ;;  %3127 = vmatprep.subr.bf16.mxu1 %v5813_v15  ;;  %v6308_v15 = vld [vmem:[#allocation6 + $0x68] ss:$16 sps:$4 sm:$0xff]  }
 0x1ef   :  { %2964 = vmatpush1.bf16.msra.mxu0 %v5810_v40  ;;  %3128 = vmatpush1.bf16.msra.mxu1 %v5812_v41  ;;  %v6311_v41 = vld [vmem:[#allocation6 + $0x80] ss:$16 sps:$4 sm:$0xff]  }
 0x1f0   :  { %2965 = vmatprep.subr.bf16.mxu0 %v5819_v42  ;;  %3129 = vmatprep.subr.bf16.mxu1 %v5821_v24  ;;  %v6314_v42 = vld [vmem:[#allocation6 + $0x88] ss:$16 sps:$4 sm:$0xff]   ;;  %v6319_v24 = vld [vmem:[#allocation6 + $0xa4] ss:$16 sps:$4 sm:$0xff]  }
 0x1f3   :  { %2966 = vmatpush1.bf16.msra.mxu0 %v5818_v48  ;;  %3130 = vmatpush1.bf16.msra.mxu1 %v5820_v49  ;;  %v6328_v48 = vld [vmem:[#allocation6 + $0xcc] ss:$16 sps:$4 sm:$0xff]   ;;  %v6323_v49 = vld [vmem:[#allocation6 + $0xc0] ss:$16 sps:$4 sm:$0xff]  }
 0x1f4   :  { %2967 = vmatprep.subr.bf16.mxu0 %v5827_v50  ;;  %3131 = vmatprep.subr.bf16.mxu1 %v5829_v51  ;;  %v6326_v50 = vld [vmem:[#allocation6 + $0xc8] ss:$16 sps:$4 sm:$0xff]   ;;  %v6331_v51 = vld [vmem:[#allocation6 + $0xe4] ss:$16 sps:$4 sm:$0xff]  }
 0x1f7   :  { %2968 = vmatpush1.bf16.msra.mxu0 %v5826_v58  ;;  %3132 = vmatpush1.bf16.msra.mxu1 %v5828_v59  ;;  %v6340_v58 = vld [vmem:[#allocation6 + $0x10c] ss:$16 sps:$4 sm:$0xff]   ;;  %v6335_v59 = vld [vmem:[#allocation6 + $0x100] ss:$16 sps:$4 sm:$0xff]  }
 0x1f8   :  { %2969 = vmatprep.subr.bf16.mxu0 %v5835_v60  ;;  %3133 = vmatprep.subr.bf16.mxu1 %v5837_v61  ;;  %v6338_v60 = vld [vmem:[#allocation6 + $0x108] ss:$16 sps:$4 sm:$0xff]   ;;  %v6343_v61 = vld [vmem:[#allocation6 + $0x124] ss:$16 sps:$4 sm:$0xff]  }
 0x1fb   :  { %2970 = vmatpush1.bf16.msra.mxu0 %v5834_v2  ;;  %3134 = vmatpush1.bf16.msra.mxu1 %v5836_v3  ;;  %v6352_v2 = vld [vmem:[#allocation6 + $0x14c] ss:$16 sps:$4 sm:$0xff]   ;;  %v6347_v3 = vld [vmem:[#allocation6 + $0x140] ss:$16 sps:$4 sm:$0xff]  }
 0x1fc   :  { %2980 = vmatprep.subr.bf16.mxu0 %v5843_v4  ;;  %3144 = vmatprep.subr.bf16.mxu1 %v5845_v5  ;;  %v6350_v4 = vld [vmem:[#allocation6 + $0x148] ss:$16 sps:$4 sm:$0xff]   ;;  %v6355_v5 = vld [vmem:[#allocation6 + $0x164] ss:$16 sps:$4 sm:$0xff]  }
 0x1fe   :  { %2972 = vmatmul.mubr.bf16.vlgmr.msra.gmra.mrb[4].mxu0 %v7017_v38  ;;  %3136 = vmatmul.mubr.bf16.vlgmr.msra.gmra.mrb[4].mxu1 %v7017_v38  ;;  %v6293_v38 = vld [vmem:[#allocation6 + $0x20] ss:$16 sps:$4 sm:$0xff]  }
 0x1ff   :  { %2981 = vmatpush1.bf16.msra.mxu0 %v5842_v6  ;;  %3145 = vmatpush1.bf16.msra.mxu1 %v5844_v7  ;;  %v6358_v6 = vld [vmem:[#allocation6 + $0x16c] ss:$16 sps:$4 sm:$0xff]   ;;  %v6353_v7 = vld [vmem:[#allocation6 + $0x160] ss:$16 sps:$4 sm:$0xff]  }
 0x200   :  { %3012 = vmatprep.mubr.bf16.mxu0 %v6857_v43  ;;  %3176 = vmatprep.mubr.bf16.mxu1 %v6857_v43  ;;  %v507_v43 = vsub.s32 1, %v7042_v13 }
 0x201   :  { %4759 = vmatprep.subr.bf16.mxu0 %v6289_v8  ;;  %4923 = vmatprep.subr.bf16.mxu1 %v6292_v9  ;;  %v6356_v8 = vld [vmem:[#allocation6 + $0x168] ss:$16 sps:$4 sm:$0xff]   ;;  %v6361_v9 = vld [vmem:[#allocation6 + $0x184] ss:$16 sps:$4 sm:$0xff]  }
 0x202   :  { %v508_v22 = vrot.slane %v7050_v19, %v507_v43 }
 0x20a   :  { %5848 = vmatmul.mubr.msk.bf16.vlgmr.msra.gmra.mrb[4].mxu0 %vm2525_vm0, %v6703_v16  ;;  %5849 = vmatmul.mubr.msk.bf16.vlgmr.msra.gmra.mrb[4].mxu1 %vm2525_vm0, %v6703_v16  ;;  %v6370_v16 = vld [vmem:[#allocation6 + $0x1ac] ss:$16 sps:$4 sm:$0xff]  }
 0x20b   :  { %4760 = vmatpush1.bf16.msra.mxu0 %v6287_v11  ;;  %4924 = vmatpush1.bf16.msra.mxu1 %v6290_v14  ;;  %v6359_v11 = vld [vmem:[#allocation6 + $0x180] ss:$16 sps:$4 sm:$0xff]   ;;  %v503_v14 = vsub.s32 0, %v7042_v13 }
 0x20c   :  { %4761 = vmatprep.subr.bf16.mxu0 %v6295_v57  ;;  %4925 = vmatprep.subr.bf16.mxu1 %v6298_v12  ;;  %v6362_v57 = vld [vmem:[#allocation6 + $0x188] ss:$16 sps:$4 sm:$0xff]   ;;  %v6367_v12 = vld [vmem:[#allocation6 + $0x1a4] ss:$16 sps:$4 sm:$0xff]  }
 0x20f   :  { %4762 = vmatpush1.bf16.msra.mxu0 %v6293_v38  ;;  %4926 = vmatpush1.bf16.msra.mxu1 %v6296_v17  ;;  %v515_v38 = vsub.s32 3, %v7042_v13  ;;  %v6365_v17 = vld [vmem:[#allocation6 + $0x1a0] ss:$16 sps:$4 sm:$0xff]  }
 0x210   :  { %4763 = vmatprep.subr.bf16.mxu0 %v6301_v18  ;;  %4927 = vmatprep.subr.bf16.mxu1 %v6304_v20  ;;  %v504_v18 = vrot.slane %v7050_v19, %v503_v14  ;;  %v6368_v20 = vld [vmem:[#allocation6 + $0x1a8] ss:$16 sps:$4 sm:$0xff]  }
 0x211   :  { %v7055_v26 = vpop.f32.mrb[0].mxu0  ;;  %v7057_v27 = vpop.f32.mrb[0].mxu1 }
 0x212   :  { %v2688_v28 = vpop.f32.mrb[1].mxu0  ;;  %v7059_v30 = vpop.f32.mrb[1].mxu1 }
 0x213   :  { %4764 = vmatpush1.bf16.msra.mxu0 %v6299_v21  ;;  %v6184_v29 = vadd.f32 %v2688_v28, %v508_v22  ;;  %v2690_v31 = vpop.f32.mrb[2].mxu0  ;;  %4928 = vmatpush1.bf16.msra.mxu1 %v6302_v25  ;;  %v2854_v34 = vpop.f32.mrb[2].mxu1  ;;  %v6373_v21 = vld [vmem:[#allocation6 + $0x1c4] ss:$16 sps:$4 sm:$0xff]   ;;  %v6376_v22 = vld [vmem:[#allocation6 + $0x1cc] ss:$16 sps:$4 sm:$0xff]   ;;  %v516_v25 = vrot.slane %v7050_v19, %v515_v38 }
 0x214   :  { %v2691_v33 = vpop.f32.mrb[3].mxu0  ;;  %4765 = vmatprep.subr.bf16.mxu0 %v6307_v23  ;;  %v2855_v37 = vpop.f32.mrb[3].mxu1  ;;  %4929 = vmatprep.subr.bf16.mxu1 %v6310_v53  ;;  %v6371_v23 = vld [vmem:[#allocation6 + $0x1c0] ss:$16 sps:$4 sm:$0xff]   ;;  %v6183_v53 = vadd.f32 %v7055_v26, %v504_v18  ;;  %v6374_v28 = vld [vmem:[#allocation6 + $0x1c8] ss:$16 sps:$4 sm:$0xff]  }
 0x215   :  { %v3186_v36 = vmax.f32 %v6184_v29, 0.0  ;;  %v6379_v29 = vld [vmem:[#allocation6 + $0x1e4] ss:$16 sps:$4 sm:$0xff]   ;;  %v6382_v31 = vld [vmem:[#allocation6 + $0x1ec] ss:$16 sps:$4 sm:$0xff]  }
 0x216   :  { %v6377_v34 = vld [vmem:[#allocation6 + $0x1e0] ss:$16 sps:$4 sm:$0xff]   ;;  %v3185_v33 = vmax.f32 %v6183_v53, 0.0  ;;  %v6448_v18 = vld [vmem:[#allocation6 + $0x34c] ss:$16 sps:$4 sm:$0xff]  }
 0x217   :  { %v3194_v40 = vpack.c.bf16 %v3186_v36, %v3186_v36  ;;  %4766 = vmatpush1.bf16.msra.mxu0 %v6305_v32  ;;  %4930 = vmatpush1.bf16.msra.mxu1 %v6308_v15  ;;  %v6186_v32 = vadd.f32 %v7059_v30, %v516_v25  ;;  %v6380_v15 = vld [vmem:[#allocation6 + $0x1e8] ss:$16 sps:$4 sm:$0xff]   ;;  %v6388_v36 = vld [vmem:[#allocation6 + $0x20c] ss:$16 sps:$4 sm:$0xff]   ;;  %v6383_v26 = vld [vmem:[#allocation6 + $0x200] ss:$16 sps:$4 sm:$0xff]  }
 0x218   :  { %4767 = vmatprep.subr.bf16.mxu0 %v6313_v35  ;;  %4931 = vmatprep.subr.bf16.mxu1 %v6316_v39  ;;  %v6385_v35 = vld [vmem:[#allocation6 + $0x204] ss:$16 sps:$4 sm:$0xff]   ;;  %v3193_v39 = vpack.c.bf16 %v3185_v33, %v3185_v33  ;;  %v6394_v30 = vld [vmem:[#allocation6 + $0x22c] ss:$16 sps:$4 sm:$0xff]   ;;  %v6452_v53 = vld [vmem:[#allocation6 + $0x368] ss:$16 sps:$4 sm:$0xff]  }
 0x219   :  { %4791 = vmatprep.mubr.bf16.mxu0 %v3194_v40  ;;  %4955 = vmatprep.mubr.bf16.mxu1 %v3194_v40  ;;  %v3188_v37 = vmax.f32 %v6186_v32, 0.0  ;;  %v6386_v40 = vld [vmem:[#allocation6 + $0x208] ss:$16 sps:$4 sm:$0xff]   ;;  %v6454_v25 = vld [vmem:[#allocation6 + $0x36c] ss:$16 sps:$4 sm:$0xff]   ;;  %v511_v32 = vsub.s32 2, %v7042_v13 }
 0x21a   :  { %v6463_v33 = vld [vmem:[#allocation6 + $0x3a4] ss:$16 sps:$4 sm:$0xff]  }
 0x21b   :  { %4768 = vmatpush1.bf16.msra.mxu0 %v6311_v41  ;;  %4932 = vmatpush1.bf16.msra.mxu1 %v6314_v42  ;;  %v6391_v41 = vld [vmem:[#allocation6 + $0x224] ss:$16 sps:$4 sm:$0xff]   ;;  %v3196_v42 = vpack.c.bf16 %v3188_v37, %v3188_v37  ;;  %v6464_v37 = vld [vmem:[#allocation6 + $0x3a8] ss:$16 sps:$4 sm:$0xff]  }
 0x21c   :  { %4769 = vmatprep.subr.bf16.mxu0 %v6319_v24  ;;  %4933 = vmatprep.subr.bf16.mxu1 %v6322_v44  ;;  %v6389_v24 = vld [vmem:[#allocation6 + $0x220] ss:$16 sps:$4 sm:$0xff]   ;;  %v6392_v44 = vld [vmem:[#allocation6 + $0x228] ss:$16 sps:$4 sm:$0xff]  }
 0x21f   :  { %4770 = vmatpush1.bf16.msra.mxu0 %v6317_v45  ;;  %4934 = vmatpush1.bf16.msra.mxu1 %v6320_v46  ;;  %v6397_v45 = vld [vmem:[#allocation6 + $0x244] ss:$16 sps:$4 sm:$0xff]   ;;  %v6400_v46 = vld [vmem:[#allocation6 + $0x24c] ss:$16 sps:$4 sm:$0xff]  }
 0x220   :  { %4771 = vmatprep.subr.bf16.mxu0 %v6325_v47  ;;  %4935 = vmatprep.subr.bf16.mxu1 %v6328_v48  ;;  %v6395_v47 = vld [vmem:[#allocation6 + $0x240] ss:$16 sps:$4 sm:$0xff]   ;;  %v6398_v48 = vld [vmem:[#allocation6 + $0x248] ss:$16 sps:$4 sm:$0xff]  }
 0x223   :  { %4772 = vmatpush1.bf16.msra.mxu0 %v6323_v49  ;;  %4936 = vmatpush1.bf16.msra.mxu1 %v6326_v50  ;;  %v6403_v49 = vld [vmem:[#allocation6 + $0x264] ss:$16 sps:$4 sm:$0xff]   ;;  %v6406_v50 = vld [vmem:[#allocation6 + $0x26c] ss:$16 sps:$4 sm:$0xff]  }
 0x224   :  { %4773 = vmatprep.subr.bf16.mxu0 %v6331_v51  ;;  %4937 = vmatprep.subr.bf16.mxu1 %v6334_v52  ;;  %v6401_v51 = vld [vmem:[#allocation6 + $0x260] ss:$16 sps:$4 sm:$0xff]   ;;  %v6404_v52 = vld [vmem:[#allocation6 + $0x268] ss:$16 sps:$4 sm:$0xff]  }
 0x227   :  { %4774 = vmatpush1.bf16.msra.mxu0 %v6329_v54  ;;  %4938 = vmatpush1.bf16.msra.mxu1 %v6332_v55  ;;  %v6409_v54 = vld [vmem:[#allocation6 + $0x284] ss:$16 sps:$4 sm:$0xff]   ;;  %v6412_v55 = vld [vmem:[#allocation6 + $0x28c] ss:$16 sps:$4 sm:$0xff]  }
 0x228   :  { %4775 = vmatprep.subr.bf16.mxu0 %v6337_v56  ;;  %4939 = vmatprep.subr.bf16.mxu1 %v6340_v58  ;;  %v6407_v56 = vld [vmem:[#allocation6 + $0x280] ss:$16 sps:$4 sm:$0xff]   ;;  %v6410_v58 = vld [vmem:[#allocation6 + $0x288] ss:$16 sps:$4 sm:$0xff]  }
 0x22b   :  { %4776 = vmatpush1.bf16.msra.mxu0 %v6335_v59  ;;  %4940 = vmatpush1.bf16.msra.mxu1 %v6338_v60  ;;  %v6415_v59 = vld [vmem:[#allocation6 + $0x2a4] ss:$16 sps:$4 sm:$0xff]   ;;  %v6418_v60 = vld [vmem:[#allocation6 + $0x2ac] ss:$16 sps:$4 sm:$0xff]  }
 0x22c   :  { %4777 = vmatprep.subr.bf16.mxu0 %v6343_v61  ;;  %4941 = vmatprep.subr.bf16.mxu1 %v6346_v62  ;;  %v6413_v61 = vld [vmem:[#allocation6 + $0x2a0] ss:$16 sps:$4 sm:$0xff]   ;;  %v6416_v62 = vld [vmem:[#allocation6 + $0x2a8] ss:$16 sps:$4 sm:$0xff]  }
 0x22f   :  { %4778 = vmatpush1.bf16.msra.mxu0 %v6341_v63  ;;  %4942 = vmatpush1.bf16.msra.mxu1 %v6344_v0  ;;  %v6421_v63 = vld [vmem:[#allocation6 + $0x2c4] ss:$16 sps:$4 sm:$0xff]   ;;  %v6424_v0 = vld [vmem:[#allocation6 + $0x2cc] ss:$16 sps:$4 sm:$0xff]  }
 0x230   :  { %4779 = vmatprep.subr.bf16.mxu0 %v6349_v1  ;;  %4943 = vmatprep.subr.bf16.mxu1 %v6352_v2  ;;  %v6419_v1 = vld [vmem:[#allocation6 + $0x2c0] ss:$16 sps:$4 sm:$0xff]   ;;  %v6422_v2 = vld [vmem:[#allocation6 + $0x2c8] ss:$16 sps:$4 sm:$0xff]  }
 0x233   :  { %4780 = vmatpush1.bf16.msra.mxu0 %v6347_v3  ;;  %4944 = vmatpush1.bf16.msra.mxu1 %v6350_v4  ;;  %v6427_v3 = vld [vmem:[#allocation6 + $0x2e4] ss:$16 sps:$4 sm:$0xff]   ;;  %v6430_v4 = vld [vmem:[#allocation6 + $0x2ec] ss:$16 sps:$4 sm:$0xff]  }
 0x234   :  { %4781 = vmatprep.subr.bf16.mxu0 %v6355_v5  ;;  %4945 = vmatprep.subr.bf16.mxu1 %v6358_v6  ;;  %v6425_v5 = vld [vmem:[#allocation6 + $0x2e0] ss:$16 sps:$4 sm:$0xff]   ;;  %v6428_v6 = vld [vmem:[#allocation6 + $0x2e8] ss:$16 sps:$4 sm:$0xff]  }
 0x237   :  { %4782 = vmatpush1.bf16.msra.mxu0 %v6353_v7  ;;  %4946 = vmatpush1.bf16.msra.mxu1 %v6356_v8  ;;  %v6433_v7 = vld [vmem:[#allocation6 + $0x304] ss:$16 sps:$4 sm:$0xff]   ;;  %v6436_v8 = vld [vmem:[#allocation6 + $0x30c] ss:$16 sps:$4 sm:$0xff]  }
 0x238   :  { %4783 = vmatprep.subr.bf16.mxu0 %v6361_v9  ;;  %4947 = vmatprep.subr.bf16.mxu1 %v6364_v10  ;;  %v6431_v9 = vld [vmem:[#allocation6 + $0x300] ss:$16 sps:$4 sm:$0xff]   ;;  %v6434_v10 = vld [vmem:[#allocation6 + $0x308] ss:$16 sps:$4 sm:$0xff]  }
 0x23b   :  { %4784 = vmatpush1.bf16.msra.mxu0 %v6359_v11  ;;  %4948 = vmatpush1.bf16.msra.mxu1 %v6362_v57  ;;  %v6439_v11 = vld [vmem:[#allocation6 + $0x324] ss:$16 sps:$4 sm:$0xff]   ;;  %v6442_v57 = vld [vmem:[#allocation6 + $0x32c] ss:$16 sps:$4 sm:$0xff]  }
 0x23c   :  { %4785 = vmatprep.subr.bf16.mxu0 %v6367_v12  ;;  %4949 = vmatprep.subr.bf16.mxu1 %v6370_v16  ;;  %v6437_v12 = vld [vmem:[#allocation6 + $0x320] ss:$16 sps:$4 sm:$0xff]   ;;  %v6440_v16 = vld [vmem:[#allocation6 + $0x328] ss:$16 sps:$4 sm:$0xff]  }
 0x23f   :  { %4786 = vmatpush1.bf16.msra.mxu0 %v6365_v17  ;;  %4950 = vmatpush1.bf16.msra.mxu1 %v6368_v20  ;;  %v6445_v17 = vld [vmem:[#allocation6 + $0x344] ss:$16 sps:$4 sm:$0xff]   ;;  %v6443_v20 = vld [vmem:[#allocation6 + $0x340] ss:$16 sps:$4 sm:$0xff]  }
 0x240   :  { %4787 = vmatprep.subr.bf16.mxu0 %v6373_v21  ;;  %4951 = vmatprep.subr.bf16.mxu1 %v6376_v22  ;;  %v6446_v21 = vld [vmem:[#allocation6 + $0x348] ss:$16 sps:$4 sm:$0xff]   ;;  %v6451_v22 = vld [vmem:[#allocation6 + $0x364] ss:$16 sps:$4 sm:$0xff]  }
 0x243   :  { %4788 = vmatpush1.bf16.msra.mxu0 %v6371_v23  ;;  %4952 = vmatpush1.bf16.msra.mxu1 %v6374_v28  ;;  %v6449_v23 = vld [vmem:[#allocation6 + $0x360] ss:$16 sps:$4 sm:$0xff]   ;;  %v6457_v28 = vld [vmem:[#allocation6 + $0x384] ss:$16 sps:$4 sm:$0xff]  }
 0x244   :  { %4789 = vmatprep.subr.bf16.mxu0 %v6379_v29  ;;  %4953 = vmatprep.subr.bf16.mxu1 %v6382_v31  ;;  %v6460_v29 = vld [vmem:[#allocation6 + $0x38c] ss:$16 sps:$4 sm:$0xff]   ;;  %v6455_v31 = vld [vmem:[#allocation6 + $0x380] ss:$16 sps:$4 sm:$0xff]  }
 0x247   :  { %4790 = vmatpush1.bf16.msra.mxu0 %v6377_v34  ;;  %4954 = vmatpush1.bf16.msra.mxu1 %v6380_v15  ;;  %v6458_v34 = vld [vmem:[#allocation6 + $0x388] ss:$16 sps:$4 sm:$0xff]   ;;  %v6466_v15 = vld [vmem:[#allocation6 + $0x3ac] ss:$16 sps:$4 sm:$0xff]  }
 0x248   :  { %4800 = vmatprep.subr.bf16.mxu0 %v6385_v35  ;;  %4964 = vmatprep.subr.bf16.mxu1 %v6388_v36  ;;  %v6461_v35 = vld [vmem:[#allocation6 + $0x3a0] ss:$16 sps:$4 sm:$0xff]   ;;  %v512_v36 = vrot.slane %v7050_v19, %v511_v32 }
 0x24a   :  { %4792 = vmatmul.mubr.bf16.vlgmr.msra.gmra.mrb[8].mxu0 %v3193_v39  ;;  %4956 = vmatmul.mubr.bf16.vlgmr.msra.gmra.mrb[8].mxu1 %v3193_v39  ;;  %v6472_v39 = vld [vmem:[#allocation6 + $0x3cc] ss:$16 sps:$4 sm:$0xff]  }
 0x24b   :  { %4801 = vmatpush1.bf16.msra.mxu0 %v6383_v26  ;;  %4832 = vmatprep.mubr.bf16.mxu0 %v3196_v42  ;;  %v6469_v26 = vld [vmem:[#allocation6 + $0x3c4] ss:$16 sps:$4 sm:$0xff]  }
 0x24c   :  { %4965 = vmatpush1.bf16.msra.mxu1 %v6386_v40  ;;  %4996 = vmatprep.mubr.bf16.mxu1 %v3196_v42  ;;  %v6467_v40 = vld [vmem:[#allocation6 + $0x3c0] ss:$16 sps:$4 sm:$0xff]   ;;  %v6470_v42 = vld [vmem:[#allocation6 + $0x3c8] ss:$16 sps:$4 sm:$0xff]  }
 0x24d   :  { %4802 = vmatprep.subr.bf16.mxu0 %v6391_v41  ;;  %4966 = vmatprep.subr.bf16.mxu1 %v6394_v30  ;;  %v6185_v41 = vadd.f32 %v7057_v27, %v512_v36  ;;  %v6475_v30 = vld [vmem:[#allocation6 + $0x3e4] ss:$16 sps:$4 sm:$0xff]   ;;  %v6482_v27 = vld [vmem:[#allocation6 + $0x408] ss:$16 sps:$4 sm:$0xff]   ;;  %v6550_v36 = vld [vmem:[#allocation6 + $0x56c] ss:$16 sps:$4 sm:$0xff]  }
 0x24f   :  { %4803 = vmatpush1.bf16.msra.mxu0 %v6389_v24  ;;  %v6478_v24 = vld [vmem:[#allocation6 + $0x3ec] ss:$16 sps:$4 sm:$0xff]  }
 0x250   :  { %4967 = vmatpush1.bf16.msra.mxu1 %v6392_v44  ;;  %4804 = vmatprep.subr.bf16.mxu0 %v6397_v45  ;;  %v6473_v44 = vld [vmem:[#allocation6 + $0x3e0] ss:$16 sps:$4 sm:$0xff]   ;;  %v3187_v45 = vmax.f32 %v6185_v41, 0.0 }
 0x251   :  { %4968 = vmatprep.subr.bf16.mxu1 %v6400_v46  ;;  %v6476_v46 = vld [vmem:[#allocation6 + $0x3e8] ss:$16 sps:$4 sm:$0xff]   ;;  %v6551_v41 = vld [vmem:[#allocation6 + $0x580] ss:$16 sps:$4 sm:$0xff]  }
 0x253   :  { %4805 = vmatpush1.bf16.msra.mxu0 %v6395_v47  ;;  %v6481_v47 = vld [vmem:[#allocation6 + $0x404] ss:$16 sps:$4 sm:$0xff]  }
 0x254   :  { %4969 = vmatpush1.bf16.msra.mxu1 %v6398_v48  ;;  %4806 = vmatprep.subr.bf16.mxu0 %v6403_v49  ;;  %v6484_v48 = vld [vmem:[#allocation6 + $0x40c] ss:$16 sps:$4 sm:$0xff]   ;;  %v6479_v49 = vld [vmem:[#allocation6 + $0x400] ss:$16 sps:$4 sm:$0xff]  }
 0x255   :  { %4970 = vmatprep.subr.bf16.mxu1 %v6406_v50  ;;  %v3195_v50 = vpack.c.bf16 %v3187_v45, %v3187_v45  ;;  %v6560_v45 = vld [vmem:[#allocation6 + $0x5a8] ss:$16 sps:$4 sm:$0xff]  }
 0x257   :  { %4807 = vmatpush1.bf16.msra.mxu0 %v6401_v51  ;;  %v6487_v51 = vld [vmem:[#allocation6 + $0x424] ss:$16 sps:$4 sm:$0xff]  }
 0x258   :  { %4971 = vmatpush1.bf16.msra.mxu1 %v6404_v52  ;;  %4808 = vmatprep.subr.bf16.mxu0 %v6409_v54  ;;  %v6490_v52 = vld [vmem:[#allocation6 + $0x42c] ss:$16 sps:$4 sm:$0xff]   ;;  %v6485_v54 = vld [vmem:[#allocation6 + $0x420] ss:$16 sps:$4 sm:$0xff]  }
 0x259   :  { %4972 = vmatprep.subr.bf16.mxu1 %v6412_v55  ;;  %v6488_v55 = vld [vmem:[#allocation6 + $0x428] ss:$16 sps:$4 sm:$0xff]  }
 0x25b   :  { %4809 = vmatpush1.bf16.msra.mxu0 %v6407_v56  ;;  %v6493_v56 = vld [vmem:[#allocation6 + $0x444] ss:$16 sps:$4 sm:$0xff]  }
 0x25c   :  { %4973 = vmatpush1.bf16.msra.mxu1 %v6410_v58  ;;  %4810 = vmatprep.subr.bf16.mxu0 %v6415_v59  ;;  %v6496_v58 = vld [vmem:[#allocation6 + $0x44c] ss:$16 sps:$4 sm:$0xff]   ;;  %v6491_v59 = vld [vmem:[#allocation6 + $0x440] ss:$16 sps:$4 sm:$0xff]  }
 0x25d   :  { %4974 = vmatprep.subr.bf16.mxu1 %v6418_v60  ;;  %v6494_v60 = vld [vmem:[#allocation6 + $0x448] ss:$16 sps:$4 sm:$0xff]  }
 0x25f   :  { %4811 = vmatpush1.bf16.msra.mxu0 %v6413_v61  ;;  %v6499_v61 = vld [vmem:[#allocation6 + $0x464] ss:$16 sps:$4 sm:$0xff]  }
 0x260   :  { %4975 = vmatpush1.bf16.msra.mxu1 %v6416_v62  ;;  %4812 = vmatprep.subr.bf16.mxu0 %v6421_v63  ;;  %v6502_v62 = vld [vmem:[#allocation6 + $0x46c] ss:$16 sps:$4 sm:$0xff]   ;;  %v6497_v63 = vld [vmem:[#allocation6 + $0x460] ss:$16 sps:$4 sm:$0xff]  }
 0x261   :  { %4976 = vmatprep.subr.bf16.mxu1 %v6424_v0  ;;  %v6500_v0 = vld [vmem:[#allocation6 + $0x468] ss:$16 sps:$4 sm:$0xff]  }
 0x263   :  { %4813 = vmatpush1.bf16.msra.mxu0 %v6419_v1  ;;  %v6505_v1 = vld [vmem:[#allocation6 + $0x484] ss:$16 sps:$4 sm:$0xff]  }
 0x264   :  { %4977 = vmatpush1.bf16.msra.mxu1 %v6422_v2  ;;  %4814 = vmatprep.subr.bf16.mxu0 %v6427_v3  ;;  %v6508_v2 = vld [vmem:[#allocation6 + $0x48c] ss:$16 sps:$4 sm:$0xff]   ;;  %v6503_v3 = vld [vmem:[#allocation6 + $0x480] ss:$16 sps:$4 sm:$0xff]  }
 0x265   :  { %4978 = vmatprep.subr.bf16.mxu1 %v6430_v4  ;;  %v6506_v4 = vld [vmem:[#allocation6 + $0x488] ss:$16 sps:$4 sm:$0xff]  }
 0x267   :  { %4815 = vmatpush1.bf16.msra.mxu0 %v6425_v5  ;;  %v6511_v5 = vld [vmem:[#allocation6 + $0x4a4] ss:$16 sps:$4 sm:$0xff]  }
 0x268   :  { %4979 = vmatpush1.bf16.msra.mxu1 %v6428_v6  ;;  %4816 = vmatprep.subr.bf16.mxu0 %v6433_v7  ;;  %v6514_v6 = vld [vmem:[#allocation6 + $0x4ac] ss:$16 sps:$4 sm:$0xff]   ;;  %v6509_v7 = vld [vmem:[#allocation6 + $0x4a0] ss:$16 sps:$4 sm:$0xff]  }
 0x269   :  { %4980 = vmatprep.subr.bf16.mxu1 %v6436_v8  ;;  %v6512_v8 = vld [vmem:[#allocation6 + $0x4a8] ss:$16 sps:$4 sm:$0xff]  }
 0x26b   :  { %4817 = vmatpush1.bf16.msra.mxu0 %v6431_v9  ;;  %v6517_v9 = vld [vmem:[#allocation6 + $0x4c4] ss:$16 sps:$4 sm:$0xff]  }
 0x26c   :  { %4981 = vmatpush1.bf16.msra.mxu1 %v6434_v10  ;;  %4818 = vmatprep.subr.bf16.mxu0 %v6439_v11  ;;  %v6520_v10 = vld [vmem:[#allocation6 + $0x4cc] ss:$16 sps:$4 sm:$0xff]   ;;  %v6515_v11 = vld [vmem:[#allocation6 + $0x4c0] ss:$16 sps:$4 sm:$0xff]  }
 0x26d   :  { %4982 = vmatprep.subr.bf16.mxu1 %v6442_v57  ;;  %v6518_v57 = vld [vmem:[#allocation6 + $0x4c8] ss:$16 sps:$4 sm:$0xff]  }
 0x26f   :  { %4819 = vmatpush1.bf16.msra.mxu0 %v6437_v12  ;;  %v6523_v12 = vld [vmem:[#allocation6 + $0x4e4] ss:$16 sps:$4 sm:$0xff]  }
 0x270   :  { %4983 = vmatpush1.bf16.msra.mxu1 %v6440_v16  ;;  %4820 = vmatprep.subr.bf16.mxu0 %v6445_v17  ;;  %v6526_v16 = vld [vmem:[#allocation6 + $0x4ec] ss:$16 sps:$4 sm:$0xff]   ;;  %v6521_v17 = vld [vmem:[#allocation6 + $0x4e0] ss:$16 sps:$4 sm:$0xff]  }
 0x271   :  { %4984 = vmatprep.subr.bf16.mxu1 %v6448_v18  ;;  %v6524_v18 = vld [vmem:[#allocation6 + $0x4e8] ss:$16 sps:$4 sm:$0xff]  }
 0x273   :  { %4821 = vmatpush1.bf16.msra.mxu0 %v6443_v20  ;;  %v6529_v20 = vld [vmem:[#allocation6 + $0x504] ss:$16 sps:$4 sm:$0xff]  }
 0x274   :  { %4985 = vmatpush1.bf16.msra.mxu1 %v6446_v21  ;;  %4822 = vmatprep.subr.bf16.mxu0 %v6451_v22  ;;  %v6532_v21 = vld [vmem:[#allocation6 + $0x50c] ss:$16 sps:$4 sm:$0xff]   ;;  %v6527_v22 = vld [vmem:[#allocation6 + $0x500] ss:$16 sps:$4 sm:$0xff]  }
 0x275   :  { %4986 = vmatprep.subr.bf16.mxu1 %v6454_v25  ;;  %v6530_v25 = vld [vmem:[#allocation6 + $0x508] ss:$16 sps:$4 sm:$0xff]  }
 0x277   :  { %4823 = vmatpush1.bf16.msra.mxu0 %v6449_v23  ;;  %v6535_v23 = vld [vmem:[#allocation6 + $0x524] ss:$16 sps:$4 sm:$0xff]  }
 0x278   :  { %4987 = vmatpush1.bf16.msra.mxu1 %v6452_v53  ;;  %4824 = vmatprep.subr.bf16.mxu0 %v6457_v28  ;;  %v6538_v53 = vld [vmem:[#allocation6 + $0x52c] ss:$16 sps:$4 sm:$0xff]   ;;  %v6533_v28 = vld [vmem:[#allocation6 + $0x520] ss:$16 sps:$4 sm:$0xff]  }
 0x279   :  { %4988 = vmatprep.subr.bf16.mxu1 %v6460_v29  ;;  %v6536_v29 = vld [vmem:[#allocation6 + $0x528] ss:$16 sps:$4 sm:$0xff]  }
 0x27b   :  { %4825 = vmatpush1.bf16.msra.mxu0 %v6455_v31  ;;  %v6541_v31 = vld [vmem:[#allocation6 + $0x544] ss:$16 sps:$4 sm:$0xff]  }
 0x27c   :  { %4989 = vmatpush1.bf16.msra.mxu1 %v6458_v34  ;;  %4826 = vmatprep.subr.bf16.mxu0 %v6463_v33  ;;  %v6544_v34 = vld [vmem:[#allocation6 + $0x54c] ss:$16 sps:$4 sm:$0xff]   ;;  %v6539_v33 = vld [vmem:[#allocation6 + $0x540] ss:$16 sps:$4 sm:$0xff]  }
 0x27d   :  { %4990 = vmatprep.subr.bf16.mxu1 %v6466_v15  ;;  %v6542_v15 = vld [vmem:[#allocation6 + $0x548] ss:$16 sps:$4 sm:$0xff]  }
 0x27f   :  { %4827 = vmatpush1.bf16.msra.mxu0 %v6461_v35  ;;  %v6547_v35 = vld [vmem:[#allocation6 + $0x564] ss:$16 sps:$4 sm:$0xff]  }
 0x280   :  { %4991 = vmatpush1.bf16.msra.mxu1 %v6464_v37  ;;  %4828 = vmatprep.subr.bf16.mxu0 %v6469_v26  ;;  %v6545_v37 = vld [vmem:[#allocation6 + $0x560] ss:$16 sps:$4 sm:$0xff]   ;;  %v6548_v26 = vld [vmem:[#allocation6 + $0x568] ss:$16 sps:$4 sm:$0xff]  }
 0x281   :  { %4992 = vmatprep.subr.bf16.mxu1 %v6472_v39  ;;  %v6553_v39 = vld [vmem:[#allocation6 + $0x584] ss:$16 sps:$4 sm:$0xff]  }
 0x283   :  { %4829 = vmatpush1.bf16.msra.mxu0 %v6467_v40  ;;  %v6556_v40 = vld [vmem:[#allocation6 + $0x58c] ss:$16 sps:$4 sm:$0xff]  }
 0x284   :  { %4993 = vmatpush1.bf16.msra.mxu1 %v6470_v42  ;;  %4830 = vmatprep.subr.bf16.mxu0 %v6475_v30  ;;  %v6554_v42 = vld [vmem:[#allocation6 + $0x588] ss:$16 sps:$4 sm:$0xff]   ;;  %v6559_v30 = vld [vmem:[#allocation6 + $0x5a4] ss:$16 sps:$4 sm:$0xff]  }
 0x285   :  { %4994 = vmatprep.subr.bf16.mxu1 %v6478_v24  ;;  %v6562_v24 = vld [vmem:[#allocation6 + $0x5ac] ss:$16 sps:$4 sm:$0xff]  }
 0x287   :  { %4831 = vmatpush1.bf16.msra.mxu0 %v6473_v44  ;;  %v6557_v44 = vld [vmem:[#allocation6 + $0x5a0] ss:$16 sps:$4 sm:$0xff]  }
 0x288   :  { %4995 = vmatpush1.bf16.msra.mxu1 %v6476_v46  ;;  %4841 = vmatprep.subr.bf16.mxu0 %v6481_v47  ;;  %v6565_v46 = vld [vmem:[#allocation6 + $0x5c4] ss:$16 sps:$4 sm:$0xff]   ;;  %v6568_v47 = vld [vmem:[#allocation6 + $0x5cc] ss:$16 sps:$4 sm:$0xff]  }
 0x289   :  { %5005 = vmatprep.subr.bf16.mxu1 %v6484_v48  ;;  %v6563_v48 = vld [vmem:[#allocation6 + $0x5c0] ss:$16 sps:$4 sm:$0xff]  }
 0x28a   :  { %4833 = vmatmul.mubr.bf16.vlgmr.msra.gmra.mrb[8].mxu0 %v3195_v50 }
 0x28b   :  { %4997 = vmatmul.mubr.bf16.vlgmr.msra.gmra.mrb[8].mxu1 %v3195_v50  ;;  %4842 = vmatpush1.bf16.msra.mxu0 %v6479_v49  ;;  %v6566_v49 = vld [vmem:[#allocation6 + $0x5c8] ss:$16 sps:$4 sm:$0xff]   ;;  %v6571_v50 = vld [vmem:[#allocation6 + $0x5e4] ss:$16 sps:$4 sm:$0xff]  }
 0x28c   :  { %5006 = vmatpush1.bf16.msra.mxu1 %v6482_v27  ;;  %4843 = vmatprep.subr.bf16.mxu0 %v6487_v51  ;;  %v6574_v27 = vld [vmem:[#allocation6 + $0x5ec] ss:$16 sps:$4 sm:$0xff]   ;;  %v6569_v51 = vld [vmem:[#allocation6 + $0x5e0] ss:$16 sps:$4 sm:$0xff]  }
 0x28d   :  { %5007 = vmatprep.subr.bf16.mxu1 %v6490_v52  ;;  %v6572_v52 = vld [vmem:[#allocation6 + $0x5e8] ss:$16 sps:$4 sm:$0xff]  }
 0x28f   :  { %4844 = vmatpush1.bf16.msra.mxu0 %v6485_v54  ;;  %v6577_v54 = vld [vmem:[#allocation6 + $0x604] ss:$16 sps:$4 sm:$0xff]  }
 0x290   :  { %5008 = vmatpush1.bf16.msra.mxu1 %v6488_v55  ;;  %4845 = vmatprep.subr.bf16.mxu0 %v6493_v56  ;;  %v6580_v55 = vld [vmem:[#allocation6 + $0x60c] ss:$16 sps:$4 sm:$0xff]   ;;  %v519_v56 = vsub.s32 4, %v7042_v13 }
 0x291   :  { %5009 = vmatprep.subr.bf16.mxu1 %v6496_v58  ;;  %v523_v58 = vsub.s32 5, %v7042_v13 }
 0x293   :  { %4846 = vmatpush1.bf16.msra.mxu0 %v6491_v59  ;;  %v531_v59 = vsub.s32 7, %v7042_v13 }
 0x294   :  { %5010 = vmatpush1.bf16.msra.mxu1 %v6494_v60  ;;  %4847 = vmatprep.subr.bf16.mxu0 %v6499_v61  ;;  %v520_v60 = vrot.slane %v7050_v19, %v519_v56  ;;  %v524_v61 = vrot.slane %v7050_v19, %v523_v58  ;;  %v6629_v56 = vld [vmem:[#allocation6 + $0x720] ss:$16 sps:$4 sm:$0xff]   ;;  %v6632_v58 = vld [vmem:[#allocation6 + $0x728] ss:$16 sps:$4 sm:$0xff]  }
 0x295   :  { %5011 = vmatprep.subr.bf16.mxu1 %v6502_v62  ;;  %v532_v62 = vrot.slane %v7050_v19, %v531_v59  ;;  %v6583_v19 = vld [vmem:[#allocation6 + $0x624] ss:$16 sps:$4 sm:$0xff]  }
 0x296   :  { %v6637_v59 = vld [vmem:[#allocation6 + $0x744] ss:$16 sps:$4 sm:$0xff]  }
 0x297   :  { %4848 = vmatpush1.bf16.msra.mxu0 %v6497_v63 }
 0x298   :  { %5012 = vmatpush1.bf16.msra.mxu1 %v6500_v0  ;;  %4849 = vmatprep.subr.bf16.mxu0 %v6505_v1 }
 0x299   :  { %5013 = vmatprep.subr.bf16.mxu1 %v6508_v2 }
 0x29b   :  { %4850 = vmatpush1.bf16.msra.mxu0 %v6503_v3 }
 0x29c   :  { %5014 = vmatpush1.bf16.msra.mxu1 %v6506_v4  ;;  %4851 = vmatprep.subr.bf16.mxu0 %v6511_v5 }
 0x29d   :  { %5015 = vmatprep.subr.bf16.mxu1 %v6514_v6 }
 0x29f   :  { %4852 = vmatpush1.bf16.msra.mxu0 %v6509_v7 }
 0x2a0   :  { %5016 = vmatpush1.bf16.msra.mxu1 %v6512_v8  ;;  %4853 = vmatprep.subr.bf16.mxu0 %v6517_v9 }
 0x2a1   :  { %5017 = vmatprep.subr.bf16.mxu1 %v6520_v10 }
 0x2a3   :  { %4854 = vmatpush1.bf16.msra.mxu0 %v6515_v11 }
 0x2a4   :  { %5018 = vmatpush1.bf16.msra.mxu1 %v6518_v57  ;;  %4855 = vmatprep.subr.bf16.mxu0 %v6523_v12 }
 0x2a5   :  { %5019 = vmatprep.subr.bf16.mxu1 %v6526_v16  ;;  %v6575_v16 = vld [vmem:[#allocation6 + $0x600] ss:$16 sps:$4 sm:$0xff]  }
 0x2a7   :  { %4856 = vmatpush1.bf16.msra.mxu0 %v6521_v17  ;;  %v6578_v17 = vld [vmem:[#allocation6 + $0x608] ss:$16 sps:$4 sm:$0xff]  }
 0x2a8   :  { %5020 = vmatpush1.bf16.msra.mxu1 %v6524_v18  ;;  %4857 = vmatprep.subr.bf16.mxu0 %v6529_v20  ;;  %v6586_v20 = vld [vmem:[#allocation6 + $0x62c] ss:$16 sps:$4 sm:$0xff]  }
 0x2a9   :  { %5021 = vmatprep.subr.bf16.mxu1 %v6532_v21 }
 0x2ab   :  { %4858 = vmatpush1.bf16.msra.mxu0 %v6527_v22  ;;  %v6581_v22 = vld [vmem:[#allocation6 + $0x620] ss:$16 sps:$4 sm:$0xff]  }
 0x2ac   :  { %5022 = vmatpush1.bf16.msra.mxu1 %v6530_v25  ;;  %4859 = vmatprep.subr.bf16.mxu0 %v6535_v23  ;;  %v6584_v25 = vld [vmem:[#allocation6 + $0x628] ss:$16 sps:$4 sm:$0xff]   ;;  %v6589_v23 = vld [vmem:[#allocation6 + $0x644] ss:$16 sps:$4 sm:$0xff]  }
 0x2ad   :  { %5023 = vmatprep.subr.bf16.mxu1 %v6538_v53  ;;  %v6592_v53 = vld [vmem:[#allocation6 + $0x64c] ss:$16 sps:$4 sm:$0xff]  }
 0x2af   :  { %4860 = vmatpush1.bf16.msra.mxu0 %v6533_v28  ;;  %v6587_v28 = vld [vmem:[#allocation6 + $0x640] ss:$16 sps:$4 sm:$0xff]  }
 0x2b0   :  { %5024 = vmatpush1.bf16.msra.mxu1 %v6536_v29  ;;  %4861 = vmatprep.subr.bf16.mxu0 %v6541_v31  ;;  %v6590_v29 = vld [vmem:[#allocation6 + $0x648] ss:$16 sps:$4 sm:$0xff]   ;;  %v6595_v31 = vld [vmem:[#allocation6 + $0x664] ss:$16 sps:$4 sm:$0xff]  }
 0x2b1   :  { %5025 = vmatprep.subr.bf16.mxu1 %v6544_v34  ;;  %v6598_v34 = vld [vmem:[#allocation6 + $0x66c] ss:$16 sps:$4 sm:$0xff]  }
 0x2b3   :  { %4862 = vmatpush1.bf16.msra.mxu0 %v6539_v33  ;;  %v6593_v33 = vld [vmem:[#allocation6 + $0x660] ss:$16 sps:$4 sm:$0xff]  }
 0x2b4   :  { %5026 = vmatpush1.bf16.msra.mxu1 %v6542_v15  ;;  %4863 = vmatprep.subr.bf16.mxu0 %v6547_v35  ;;  %v6596_v15 = vld [vmem:[#allocation6 + $0x668] ss:$16 sps:$4 sm:$0xff]   ;;  %v6601_v35 = vld [vmem:[#allocation6 + $0x684] ss:$16 sps:$4 sm:$0xff]  }
 0x2b5   :  { %5027 = vmatprep.subr.bf16.mxu1 %v6550_v36  ;;  %v6604_v36 = vld [vmem:[#allocation6 + $0x68c] ss:$16 sps:$4 sm:$0xff]  }
 0x2b7   :  { %4864 = vmatpush1.bf16.msra.mxu0 %v6545_v37  ;;  %v6599_v37 = vld [vmem:[#allocation6 + $0x680] ss:$16 sps:$4 sm:$0xff]  }
 0x2b8   :  { %5028 = vmatpush1.bf16.msra.mxu1 %v6548_v26  ;;  %4865 = vmatprep.subr.bf16.mxu0 %v6553_v39  ;;  %v6602_v26 = vld [vmem:[#allocation6 + $0x688] ss:$16 sps:$4 sm:$0xff]   ;;  %v6607_v39 = vld [vmem:[#allocation6 + $0x6a4] ss:$16 sps:$4 sm:$0xff]  }
 0x2b9   :  { %5029 = vmatprep.subr.bf16.mxu1 %v6556_v40  ;;  %v6610_v40 = vld [vmem:[#allocation6 + $0x6ac] ss:$16 sps:$4 sm:$0xff]  }
 0x2bb   :  { %4866 = vmatpush1.bf16.msra.mxu0 %v6551_v41  ;;  %v6605_v41 = vld [vmem:[#allocation6 + $0x6a0] ss:$16 sps:$4 sm:$0xff]  }
 0x2bc   :  { %5030 = vmatpush1.bf16.msra.mxu1 %v6554_v42  ;;  %4867 = vmatprep.subr.bf16.mxu0 %v6559_v30  ;;  %v6608_v42 = vld [vmem:[#allocation6 + $0x6a8] ss:$16 sps:$4 sm:$0xff]   ;;  %v6613_v30 = vld [vmem:[#allocation6 + $0x6c4] ss:$16 sps:$4 sm:$0xff]  }
 0x2bd   :  { %5031 = vmatprep.subr.bf16.mxu1 %v6562_v24  ;;  %v6616_v24 = vld [vmem:[#allocation6 + $0x6cc] ss:$16 sps:$4 sm:$0xff]  }
 0x2bf   :  { %4868 = vmatpush1.bf16.msra.mxu0 %v6557_v44  ;;  %v6611_v44 = vld [vmem:[#allocation6 + $0x6c0] ss:$16 sps:$4 sm:$0xff]  }
 0x2c0   :  { %5032 = vmatpush1.bf16.msra.mxu1 %v6560_v45  ;;  %4869 = vmatprep.subr.bf16.mxu0 %v6565_v46  ;;  %v6614_v45 = vld [vmem:[#allocation6 + $0x6c8] ss:$16 sps:$4 sm:$0xff]   ;;  %v6619_v46 = vld [vmem:[#allocation6 + $0x6e4] ss:$16 sps:$4 sm:$0xff]  }
 0x2c1   :  { %5033 = vmatprep.subr.bf16.mxu1 %v6568_v47  ;;  %v6622_v47 = vld [vmem:[#allocation6 + $0x6ec] ss:$16 sps:$4 sm:$0xff]  }
 0x2c3   :  { %4870 = vmatpush1.bf16.msra.mxu0 %v6563_v48  ;;  %v6617_v48 = vld [vmem:[#allocation6 + $0x6e0] ss:$16 sps:$4 sm:$0xff]  }
 0x2c4   :  { %5034 = vmatpush1.bf16.msra.mxu1 %v6566_v49  ;;  %4871 = vmatprep.subr.bf16.mxu0 %v6571_v50  ;;  %v6620_v49 = vld [vmem:[#allocation6 + $0x6e8] ss:$16 sps:$4 sm:$0xff]   ;;  %v6625_v50 = vld [vmem:[#allocation6 + $0x704] ss:$16 sps:$4 sm:$0xff]  }
 0x2c5   :  { %5035 = vmatprep.subr.bf16.mxu1 %v6574_v27  ;;  %v6628_v27 = vld [vmem:[#allocation6 + $0x70c] ss:$16 sps:$4 sm:$0xff]  }
 0x2c7   :  { %4872 = vmatpush1.bf16.msra.mxu0 %v6569_v51  ;;  %v6623_v51 = vld [vmem:[#allocation6 + $0x700] ss:$16 sps:$4 sm:$0xff]  }
 0x2c8   :  { %5036 = vmatpush1.bf16.msra.mxu1 %v6572_v52  ;;  %4882 = vmatprep.subr.bf16.mxu0 %v6577_v54  ;;  %v6626_v52 = vld [vmem:[#allocation6 + $0x708] ss:$16 sps:$4 sm:$0xff]   ;;  %v6631_v54 = vld [vmem:[#allocation6 + $0x724] ss:$16 sps:$4 sm:$0xff]  }
 0x2c9   :  { %5046 = vmatprep.subr.bf16.mxu1 %v6580_v55  ;;  %v6634_v55 = vld [vmem:[#allocation6 + $0x72c] ss:$16 sps:$4 sm:$0xff]  }
 0x2dd   :  { %v3014_v63 = vpop.f32.mrb[4].mxu0  ;;  %v7082_v1 = vpop.f32.mrb[4].mxu1 }
 0x2de   :  { %v6187_v0 = vadd.f32 %v3014_v63, %v520_v60  ;;  %v3016_v2 = vpop.f32.mrb[5].mxu0  ;;  %v3180_v4 = vpop.f32.mrb[5].mxu1  ;;  %v6640_v60 = vld [vmem:[#allocation6 + $0x74c] ss:$16 sps:$4 sm:$0xff]   ;;  %v6643_v63 = vld [vmem:[#allocation6 + $0x764] ss:$16 sps:$4 sm:$0xff]  }
 0x2df   :  { %v6188_v3 = vadd.f32 %v3016_v2, %v524_v61  ;;  %v3018_v5 = vpop.f32.mrb[6].mxu0  ;;  %v6190_v7 = vadd.f32 %v3180_v4, %v532_v62  ;;  %v3182_v8 = vpop.f32.mrb[6].mxu1  ;;  %v6635_v61 = vld [vmem:[#allocation6 + $0x740] ss:$16 sps:$4 sm:$0xff]   ;;  %v6638_v62 = vld [vmem:[#allocation6 + $0x748] ss:$16 sps:$4 sm:$0xff]  }
 0x2e0   :  { %v3189_v6 = vmax.f32 %v6187_v0, 0.0  ;;  %v3019_v9 = vpop.f32.mrb[7].mxu0  ;;  %v3183_v11 = vpop.f32.mrb[7].mxu1  ;;  %v6646_v0 = vld [vmem:[#allocation6 + $0x76c] ss:$16 sps:$4 sm:$0xff]   ;;  %v527_v8 = vsub.s32 6, %v7042_v13 }
 0x2e1   :  { %v3190_v10 = vmax.f32 %v6188_v3, 0.0  ;;  %v3192_v57 = vmax.f32 %v6190_v7, 0.0  ;;  %v6641_v2 = vld [vmem:[#allocation6 + $0x760] ss:$16 sps:$4 sm:$0xff]   ;;  %v6644_v3 = vld [vmem:[#allocation6 + $0x768] ss:$16 sps:$4 sm:$0xff]  }
 0x2e2   :  { %v3197_v18 = vpack.c.bf16 %v3189_v6, %v3189_v6  ;;  %v6649_v4 = vld [vmem:[#allocation6 + $0x784] ss:$16 sps:$4 sm:$0xff]   ;;  %v6652_v5 = vld [vmem:[#allocation6 + $0x78c] ss:$16 sps:$4 sm:$0xff]   ;;  %v6647_v6 = vld [vmem:[#allocation6 + $0x780] ss:$16 sps:$4 sm:$0xff]  }
 0x2e3   :  { %v3198_v12 = vpack.c.bf16 %v3190_v10, %v3190_v10  ;;  %v3200_v21 = vpack.c.bf16 %v3192_v57, %v3192_v57  ;;  %v6650_v7 = vld [vmem:[#allocation6 + $0x788] ss:$16 sps:$4 sm:$0xff]   ;;  %v6655_v9 = vld [vmem:[#allocation6 + $0x7a4] ss:$16 sps:$4 sm:$0xff]   ;;  %v6658_v10 = vld [vmem:[#allocation6 + $0x7ac] ss:$16 sps:$4 sm:$0xff]  }
 0x2e4   :  { %v6653_v11 = vld [vmem:[#allocation6 + $0x7a0] ss:$16 sps:$4 sm:$0xff]   ;;  %v6656_v57 = vld [vmem:[#allocation6 + $0x7a8] ss:$16 sps:$4 sm:$0xff]  }
 0x2e5   :  { %4873 = vmatprep.mubr.bf16.mxu0 %v3198_v12  ;;  %5037 = vmatprep.mubr.bf16.mxu1 %v3198_v12  ;;  %v6704_v12 = vld [vmem:[#allocation4] sm:$0xff] }
 0x2e6   :  { %4874 = vmatmul.mubr.bf16.vlgmr.msra.gmra.mrb[8].mxu0 %v3197_v18  ;;  %5038 = vmatmul.mubr.bf16.vlgmr.msra.gmra.mrb[8].mxu1 %v3197_v18  ;;  %v6664_v18 = vld [vmem:[#allocation6 + $0x7cc] ss:$16 sps:$4 sm:$0xff]  }
 0x2e7   :  { %4883 = vmatpush1.bf16.msra.mxu0 %v6575_v16  ;;  %5047 = vmatpush1.bf16.msra.mxu1 %v6578_v17  ;;  %v528_v16 = vrot.slane %v6704_v12, %v527_v8  ;;  %v6661_v17 = vld [vmem:[#allocation6 + $0x7c4] ss:$16 sps:$4 sm:$0xff]  }
 0x2e8   :  { %4914 = vmatprep.mubr.bf16.mxu0 %v3200_v21  ;;  %5078 = vmatprep.mubr.bf16.mxu1 %v3200_v21 }
 0x2e9   :  { %4884 = vmatprep.subr.bf16.mxu0 %v6583_v19  ;;  %5048 = vmatprep.subr.bf16.mxu1 %v6586_v20  ;;  %v6659_v19 = vld [vmem:[#allocation6 + $0x7c0] ss:$16 sps:$4 sm:$0xff]   ;;  %v6662_v20 = vld [vmem:[#allocation6 + $0x7c8] ss:$16 sps:$4 sm:$0xff]   ;;  %v6189_v21 = vadd.f32 %v7082_v1, %v528_v16 }
 0x2ea   :  { %v6675_v1 = vld [vmem:[#allocation9 + $0x48] sm:$0xff]  }
 0x2eb   :  { %4885 = vmatpush1.bf16.msra.mxu0 %v6581_v22  ;;  %5049 = vmatpush1.bf16.msra.mxu1 %v6584_v25  ;;  %v6667_v22 = vld [vmem:[#allocation6 + $0x7e4] ss:$16 sps:$4 sm:$0xff]   ;;  %v6670_v25 = vld [vmem:[#allocation6 + $0x7ec] ss:$16 sps:$4 sm:$0xff]  }
 0x2ec   :  { %4886 = vmatprep.subr.bf16.mxu0 %v6589_v23  ;;  %5050 = vmatprep.subr.bf16.mxu1 %v6592_v53  ;;  %v6665_v23 = vld [vmem:[#allocation6 + $0x7e0] ss:$16 sps:$4 sm:$0xff]   ;;  %v6668_v53 = vld [vmem:[#allocation6 + $0x7e8] ss:$16 sps:$4 sm:$0xff]  }
 0x2ef   :  { %4887 = vmatpush1.bf16.msra.mxu0 %v6587_v28  ;;  %5051 = vmatpush1.bf16.msra.mxu1 %v6590_v29  ;;  %v3191_v28 = vmax.f32 %v6189_v21, 0.0  ;;  %v6671_v29 = vld [vmem:[#allocation9 + $0x40] sm:$0xff]  }
 0x2f0   :  { %4888 = vmatprep.subr.bf16.mxu0 %v6595_v31  ;;  %5052 = vmatprep.subr.bf16.mxu1 %v6598_v34  ;;  %v6672_v31 = vld [vmem:[#allocation9 + $0xc0] sm:$0xff]  }
 0x2f1   :  { %v6673_v34 = vld [vmem:[#allocation9] sm:$0xff]  }
 0x2f3   :  { %4889 = vmatpush1.bf16.msra.mxu0 %v6593_v33  ;;  %5053 = vmatpush1.bf16.msra.mxu1 %v6596_v15  ;;  %v6674_v33 = vld [vmem:[#allocation9 + $0x80] sm:$0xff]   ;;  %v3199_v15 = vpack.c.bf16 %v3191_v28, %v3191_v28 }
 0x2f4   :  { %4890 = vmatprep.subr.bf16.mxu0 %v6601_v35  ;;  %5054 = vmatprep.subr.bf16.mxu1 %v6604_v36  ;;  %v6676_v35 = vld [vmem:[#allocation9 + $0xc8] sm:$0xff]  }
 0x2f5   :  { %v6677_v36 = vld [vmem:[#allocation9 + $0x8] sm:$0xff]  }
 0x2f7   :  { %4891 = vmatpush1.bf16.msra.mxu0 %v6599_v37  ;;  %5055 = vmatpush1.bf16.msra.mxu1 %v6602_v26  ;;  %v6678_v37 = vld [vmem:[#allocation9 + $0x88] sm:$0xff]   ;;  %v6679_v26 = vld [vmem:[#allocation9 + $0x50] sm:$0xff]  }
 0x2f8   :  { %4892 = vmatprep.subr.bf16.mxu0 %v6607_v39  ;;  %5056 = vmatprep.subr.bf16.mxu1 %v6610_v40  ;;  %v6680_v39 = vld [vmem:[#allocation9 + $0xd0] sm:$0xff]  }
 0x2f9   :  { %v6681_v40 = vld [vmem:[#allocation9 + $0x10] sm:$0xff]  }
 0x2fb   :  { %4893 = vmatpush1.bf16.msra.mxu0 %v6605_v41  ;;  %5057 = vmatpush1.bf16.msra.mxu1 %v6608_v42  ;;  %v6682_v41 = vld [vmem:[#allocation9 + $0x90] sm:$0xff]   ;;  %v6683_v42 = vld [vmem:[#allocation9 + $0x58] sm:$0xff]  }
 0x2fc   :  { %4894 = vmatprep.subr.bf16.mxu0 %v6613_v30  ;;  %5058 = vmatprep.subr.bf16.mxu1 %v6616_v24  ;;  %v6684_v30 = vld [vmem:[#allocation9 + $0xd8] sm:$0xff]  }
 0x2fd   :  { %v6685_v24 = vld [vmem:[#allocation9 + $0x18] sm:$0xff]  }
 0x2ff   :  { %4895 = vmatpush1.bf16.msra.mxu0 %v6611_v44  ;;  %5059 = vmatpush1.bf16.msra.mxu1 %v6614_v45  ;;  %v6686_v44 = vld [vmem:[#allocation9 + $0x98] sm:$0xff]   ;;  %v6687_v45 = vld [vmem:[#allocation9 + $0x60] sm:$0xff]  }
 0x300   :  { %4896 = vmatprep.subr.bf16.mxu0 %v6619_v46  ;;  %5060 = vmatprep.subr.bf16.mxu1 %v6622_v47  ;;  %v6688_v46 = vld [vmem:[#allocation9 + $0xe0] sm:$0xff]  }
 0x301   :  { %v6689_v47 = vld [vmem:[#allocation9 + $0x20] sm:$0xff]  }
 0x303   :  { %4897 = vmatpush1.bf16.msra.mxu0 %v6617_v48  ;;  %5061 = vmatpush1.bf16.msra.mxu1 %v6620_v49  ;;  %v6690_v48 = vld [vmem:[#allocation9 + $0xa0] sm:$0xff]   ;;  %v6691_v49 = vld [vmem:[#allocation9 + $0x68] sm:$0xff]  }
 0x304   :  { %4898 = vmatprep.subr.bf16.mxu0 %v6625_v50  ;;  %5062 = vmatprep.subr.bf16.mxu1 %v6628_v27  ;;  %v6692_v50 = vld [vmem:[#allocation9 + $0xe8] sm:$0xff]  }
 0x305   :  { %v6693_v27 = vld [vmem:[#allocation9 + $0x28] sm:$0xff]  }
 0x307   :  { %4899 = vmatpush1.bf16.msra.mxu0 %v6623_v51  ;;  %5063 = vmatpush1.bf16.msra.mxu1 %v6626_v52  ;;  %v6694_v51 = vld [vmem:[#allocation9 + $0xa8] sm:$0xff]   ;;  %v6695_v52 = vld [vmem:[#allocation9 + $0x70] sm:$0xff]  }
 0x308   :  { %4900 = vmatprep.subr.bf16.mxu0 %v6631_v54  ;;  %5064 = vmatprep.subr.bf16.mxu1 %v6634_v55  ;;  %v6696_v54 = vld [vmem:[#allocation9 + $0xf0] sm:$0xff]  }
 0x309   :  { %v6697_v55 = vld [vmem:[#allocation9 + $0x30] sm:$0xff]  }
 0x30b   :  { %4901 = vmatpush1.bf16.msra.mxu0 %v6629_v56  ;;  %5065 = vmatpush1.bf16.msra.mxu1 %v6632_v58  ;;  %v6698_v56 = vld [vmem:[#allocation9 + $0xb0] sm:$0xff]   ;;  %v6699_v58 = vld [vmem:[#allocation9 + $0x78] sm:$0xff]  }
 0x30c   :  { %4902 = vmatprep.subr.bf16.mxu0 %v6637_v59  ;;  %5066 = vmatprep.subr.bf16.mxu1 %v6640_v60  ;;  %v6700_v59 = vld [vmem:[#allocation9 + $0xf8] sm:$0xff]  }
 0x30d   :  { %v6701_v60 = vld [vmem:[#allocation9 + $0x38] sm:$0xff]  }
 0x30f   :  { %4903 = vmatpush1.bf16.msra.mxu0 %v6635_v61  ;;  %5067 = vmatpush1.bf16.msra.mxu1 %v6638_v62  ;;  %v6702_v61 = vld [vmem:[#allocation9 + $0xb8] sm:$0xff]  }
 0x310   :  { %4904 = vmatprep.subr.bf16.mxu0 %v6643_v63  ;;  %5068 = vmatprep.subr.bf16.mxu1 %v6646_v0  ;;  %v3457_v62 = vld [vmem:[#allocation7] sm:$0xf] }
 0x311   :  { %v3462_v63 = vrot.slane %v3457_v62, %v503_v14  ;;  %v3470_v0 = vrot.slane %v3457_v62, %v511_v32 }
 0x313   :  { %4905 = vmatpush1.bf16.msra.mxu0 %v6641_v2  ;;  %5069 = vmatpush1.bf16.msra.mxu1 %v6644_v3  ;;  %v3466_v2 = vrot.slane %v3457_v62, %v507_v43  ;;  %v3474_v3 = vrot.slane %v3457_v62, %v515_v38 }
 0x314   :  { %4906 = vmatprep.subr.bf16.mxu0 %v6649_v4  ;;  %5070 = vmatprep.subr.bf16.mxu1 %v6652_v5 }
 0x317   :  { %4907 = vmatpush1.bf16.msra.mxu0 %v6647_v6  ;;  %5071 = vmatpush1.bf16.msra.mxu1 %v6650_v7 }
 0x318   :  { %4908 = vmatprep.subr.bf16.mxu0 %v6655_v9  ;;  %5072 = vmatprep.subr.bf16.mxu1 %v6658_v10 }
 0x31b   :  { %4909 = vmatpush1.bf16.msra.mxu0 %v6653_v11  ;;  %5073 = vmatpush1.bf16.msra.mxu1 %v6656_v57 }
 0x31c   :  { %4910 = vmatprep.subr.bf16.mxu0 %v6661_v17  ;;  %5074 = vmatprep.subr.bf16.mxu1 %v6664_v18 }
 0x31f   :  { %4911 = vmatpush1.bf16.msra.mxu0 %v6659_v19  ;;  %5075 = vmatpush1.bf16.msra.mxu1 %v6662_v20 }
 0x320   :  { %4912 = vmatprep.subr.bf16.mxu0 %v6667_v22  ;;  %5076 = vmatprep.subr.bf16.mxu1 %v6670_v25  ;;  %v6106_v25 = vld [vmem:[#allocation10] ss:$0 sm:$0xff] }
 0x323   :  { %4913 = vmatpush1.bf16.msra.mxu0 %v6665_v23  ;;  %5077 = vmatpush1.bf16.msra.mxu1 %v6668_v53 }
 0x324   :  { %6139 = vmatprep.subr.bf16.mxu0 %v6671_v29  ;;  %6161 = vmatprep.subr.bf16.mxu1 %v6672_v31 }
 0x326   :  { %4915 = vmatmul.mubr.bf16.vlgmr.msra.gmra.mrb[8].mxu0 %v3199_v15  ;;  %5079 = vmatmul.mubr.bf16.vlgmr.msra.gmra.mrb[8].mxu1 %v3199_v15 }
 0x327   :  { %6140 = vmatpush3.bf16.msra.mxu0 %v6673_v34  ;;  %6162 = vmatpush3.bf16.msra.mxu1 %v6674_v33 }
 0x328   :  { %6141 = vmatprep.subr.bf16.mxu0 %v6675_v1  ;;  %6163 = vmatprep.subr.bf16.mxu1 %v6676_v35 }
 0x32b   :  { %6142 = vmatpush3.bf16.msra.mxu0 %v6677_v36  ;;  %6164 = vmatpush3.bf16.msra.mxu1 %v6678_v37 }
 0x32c   :  { %6143 = vmatprep.subr.bf16.mxu0 %v6679_v26  ;;  %6165 = vmatprep.subr.bf16.mxu1 %v6680_v39 }
 0x32f   :  { %6144 = vmatpush3.bf16.msra.mxu0 %v6681_v40  ;;  %6166 = vmatpush3.bf16.msra.mxu1 %v6682_v41 }
 0x330   :  { %6145 = vmatprep.subr.bf16.mxu0 %v6683_v42  ;;  %6167 = vmatprep.subr.bf16.mxu1 %v6684_v30 }
 0x333   :  { %6146 = vmatpush3.bf16.msra.mxu0 %v6685_v24  ;;  %6168 = vmatpush3.bf16.msra.mxu1 %v6686_v44 }
 0x334   :  { %6147 = vmatprep.subr.bf16.mxu0 %v6687_v45  ;;  %6169 = vmatprep.subr.bf16.mxu1 %v6688_v46 }
 0x337   :  { %6148 = vmatpush3.bf16.msra.mxu0 %v6689_v47  ;;  %6170 = vmatpush3.bf16.msra.mxu1 %v6690_v48 }
 0x338   :  { %6149 = vmatprep.subr.bf16.mxu0 %v6691_v49  ;;  %6171 = vmatprep.subr.bf16.mxu1 %v6692_v50 }
 0x33b   :  { %6150 = vmatpush3.bf16.msra.mxu0 %v6693_v27  ;;  %6172 = vmatpush3.bf16.msra.mxu1 %v6694_v51 }
 0x33c   :  { %6151 = vmatprep.subr.bf16.mxu0 %v6695_v52  ;;  %6173 = vmatprep.subr.bf16.mxu1 %v6696_v54 }
 0x33f   :  { %6152 = vmatpush3.bf16.msra.mxu0 %v6697_v55  ;;  %6174 = vmatpush3.bf16.msra.mxu1 %v6698_v56 }
 0x340   :  { %6153 = vmatprep.subr.bf16.mxu0 %v6699_v58  ;;  %6175 = vmatprep.subr.bf16.mxu1 %v6700_v59 }
 0x343   :  { %6154 = vmatpush3.bf16.msra.mxu0 %v6701_v60  ;;  %6176 = vmatpush3.bf16.msra.mxu1 %v6702_v61 }
 0x3f9   :  { %v4916_v4 = vpop.f32.mrb[8].mxu0  ;;  %v5080_v5 = vpop.f32.mrb[8].mxu1 }
 0x3fa   :  { %v6191_v6 = vadd.f32 %v4916_v4, %v3462_v63  ;;  %v6193_v7 = vadd.f32 %v5080_v5, %v3470_v0  ;;  %v4918_v8 = vpop.f32.mrb[9].mxu0  ;;  %v5082_v9 = vpop.f32.mrb[9].mxu1 }
 0x3fb   :  { %v6192_v10 = vadd.f32 %v4918_v8, %v3466_v2  ;;  %v6194_v11 = vadd.f32 %v5082_v9, %v3474_v3  ;;  %v4920_v57 = vpop.f32.mrb[10].mxu0  ;;  %v5084_v12 = vpop.f32.mrb[10].mxu1 }
 0x3fc   :  { %v5087_v14 = vmax.f32 %v6191_v6, 0.0  ;;  %v5089_v16 = vmax.f32 %v6193_v7, 0.0  ;;  %v4921_v17 = vpop.f32.mrb[11].mxu0  ;;  %v5085_v32 = vpop.f32.mrb[11].mxu1 }
 0x3fd   :  { %v5088_v18 = vmax.f32 %v6192_v10, 0.0  ;;  %v5090_v19 = vmax.f32 %v6194_v11, 0.0 }
 0x3fe   :  { %v5091_v13 = vpack.c.bf16 %v5087_v14, %v5087_v14  ;;  %v5093_v38 = vpack.c.bf16 %v5089_v16, %v5089_v16 }
 0x3ff   :  { %v5092_v43 = vpack.c.bf16 %v5088_v18, %v5088_v18  ;;  %v5094_v20 = vpack.c.bf16 %v5090_v19, %v5090_v19 }
 0x401   :  { %5390 = vmatprep.mubr.bf16.mxu0 %v5092_v43  ;;  %5430 = vmatprep.mubr.bf16.mxu1 %v5094_v20 }
 0x402   :  { %5391 = vmatmul.mubr.bf16.vlgmr.msra.gmra.mrb[12].mxu0 %v5091_v13  ;;  %5431 = vmatmul.mubr.bf16.vlgmr.msra.gmra.mrb[12].mxu1 %v5093_v38 }
 0x4d5   :  { %v6155_v21 = vpop.f32.mrb[12].mxu0  ;;  %v6177_v22 = vpop.f32.mrb[12].mxu1 }
 0x4d6   :  { %v6156_v23 = vpop.f32.mrb[13].mxu0  ;;  %v6178_v53 = vpop.f32.mrb[13].mxu1 }
 0x4d7   :  { %v6157_v28 = vadd.f32 %v6156_v23, %v6155_v21  ;;  %v6179_v29 = vadd.f32 %v6178_v53, %v6177_v22  ;;  %v6158_v31 = vpop.f32.mrb[14].mxu0  ;;  %v6180_v34 = vpop.f32.mrb[14].mxu1 }
 0x4d8   :  { %v6159_v33 = vpop.f32.mrb[15].mxu0  ;;  %v6181_v15 = vpop.f32.mrb[15].mxu1 }
 0x4d9   :  { %v5393_v1 = vadd.f32 %v6157_v28, %v6106_v25 }
 0x4db   :  { %v5433_v35 = vadd.f32 %v6179_v29, %v5393_v1 }
 0x4dd   :  { %5438 = vst [vmem:[%s7104_s7] sm:$0xff] %v5433_v35 }
 0x4de   :  { %5443 = vsyncpa [#allocation3], 1 }
 0x4df   :  { %5444 = vsyncpa [#allocation5], 1 }
 0x4e0   :  { %5445 = vsyncpa [#allocation8], 1 }
 0x4e1   :  { %5446 = vsyncpa [#allocation11], 1 }

</bundles_post_ra>
